<compile_context>
chip_gen: v7x
topology: tpu7x:2x2x1
jax: 0.10.0
libtpu: 0.0.40
codegen_flags: <defaults>
</compile_context>

<pallas_src>
import numpy as np
import jax
import jax.numpy as jnp
from jax.experimental import pallas as pl
from jax.experimental.pallas import tpu as pltpu


def _snake(x, a_ref):
    # snake(x) = x + 1/(alpha + 1e-9) * sin(alpha * x)^2 ; a_ref packs [alpha | 1/(alpha+1e-9)]
    a = a_ref[:, 0:1]
    inv_a = a_ref[:, 1:2]
    s = jnp.sin(a * x)
    return x + inv_a * (s * s)


def _shift_cols(xs, shift, width):
    """(C, T) -> (C, width) with out[:, j] = xs[:, j - shift] (zero outside). Static shift."""
    C, T = xs.shape
    lo = max(0, shift)
    hi = min(width, T + shift)
    parts = []
    if lo > 0:
        parts.append(jnp.zeros((C, lo), xs.dtype))
    if hi > lo:
        parts.append(xs[:, lo - shift:hi - shift])
    if width > hi:
        parts.append(jnp.zeros((C, width - hi), xs.dtype))
    return parts[0] if len(parts) == 1 else jnp.concatenate(parts, axis=1)


# ------------------------------ fused kernel ---------------------------------

def _build_kernel(*, C_in, C_out, K_ct, T, L, L_pad, PAD, padding, dilations, K_ru):
    n_ru_refs = 6 * len(dilations)
    n_stages = len(dilations)

    def kernel(x_ref, a0_ref, ctw_ref, ctb_ref, *rest):
        o_ref = rest[n_ru_refs]
        h_ref = rest[n_ru_refs + 1]            # VMEM scratch: (C_out, PAD + L_pad + PAD) f32

        # Lane-validity mask, hoisted (JAX does not CSE broadcast_in_dim).
        lane = jax.lax.broadcasted_iota(jnp.int32, (C_out, L_pad), 1)
        valid = lane < L

        # Zero ONLY the 128-lane-aligned halo columns; the interior is fully
        # overwritten below with `=`.  Done unconditionally (2 aligned vreg stores,
        # negligible) so it is correct even if the batch axis is megacore-sharded.
        zero_halo = jnp.zeros((C_out, PAD), jnp.float32)
        h_ref[:, pl.ds(0, PAD)] = zero_halo
        h_ref[:, pl.ds(PAD + L_pad, PAD)] = zero_halo

        # ---- Stage 0: Snake1d + ConvTranspose1d (stride 1) as ONE stacked matmul ----
        xs = _snake(x_ref[0], a0_ref)                                     # (C_in, T) f32
        xstack = jnp.concatenate(
            [_shift_cols(xs, k - padding, L_pad) for k in range(K_ct)],
            axis=0).astype(jnp.bfloat16)                                  # (K_ct*C_in, L_pad)
        y0 = jnp.dot(ctw_ref[...], xstack,
                     preferred_element_type=jnp.float32) + ctb_ref[...]   # (C_out, L_pad) f32
        # Single aligned full-width (multiple-of-128) store; tail masked in registers.
        h_ref[:, pl.ds(PAD, L_pad)] = jnp.where(valid, y0, 0.0)

        # ---- Residual units --------------------------------------------------
        for r, d in enumerate(dilations):
            a1, w1f, b1, a2, w2, b2 = rest[6 * r:6 * r + 6]
            halo = (K_ru - 1) // 2 * d                                    # 3*d
            # Snake hoisted out of the tap loop; full-scratch read is vreg-aligned.
            # Halos are zero and snake(0) == 0, so padding <-> snake commute.
            hs = _snake(h_ref[...], a1)                                   # (C_out, 2*PAD+L_pad)
            # Stack the K_ru dilated windows along the contraction axis -> 1 MXU matmul.
            hstack = jnp.concatenate(
                [hs[:, PAD - halo + k * d: PAD - halo + k * d + L_pad]
                 for k in range(K_ru)], axis=0).astype(jnp.bfloat16)      # (K_ru*C_out, L_pad)
            y1 = jnp.dot(w1f[...], hstack,
                         preferred_element_type=jnp.float32) + b1[...]    # (C_out, L_pad)
            y2 = jnp.dot(w2[...], _snake(y1, a2).astype(jnp.bfloat16),
                         preferred_element_type=jnp.float32) + b2[...]    # (C_out, L_pad)
            new = h_ref[:, pl.ds(PAD, L_pad)] + jnp.where(valid, y2, 0.0)  # residual, tail stays 0
            if r + 1 < n_stages:
                h_ref[:, pl.ds(PAD, L_pad)] = new        # aligned full-width store
            else:
                o_ref[0] = new                           # last stage: write output directly

    return kernel


def decoder_block_pallas(x, a0, ctw2d, ctb, ru_args, *, C_in, C_out, K_ct, T, L,
                         padding, dilations, K_ru):
    B = x.shape[0]
    PAD = 128                                   # halo rounded to the 128-lane vreg width
    L_pad = pl.cdiv(L, 128) * 128               # lane-dense interior / output width

    kernel = _build_kernel(C_in=C_in, C_out=C_out, K_ct=K_ct, T=T, L=L, L_pad=L_pad,
                           PAD=PAD, padding=padding, dilations=dilations, K_ru=K_ru)

    ru_specs = []
    for _ in dilations:
        ru_specs += [
            pl.BlockSpec((C_out, 2), lambda b: (0, 0)),                # [alpha1 | 1/alpha1]
            pl.BlockSpec((C_out, K_ru * C_out), lambda b: (0, 0)),     # w1 tap-stacked (bf16)
            pl.BlockSpec((C_out, 1), lambda b: (0, 0)),                # b1
            pl.BlockSpec((C_out, 2), lambda b: (0, 0)),                # [alpha2 | 1/alpha2]
            pl.BlockSpec((C_out, C_out), lambda b: (0, 0)),            # w2 (1x1, bf16)
            pl.BlockSpec((C_out, 1), lambda b: (0, 0)),                # b2
        ]

    flops = B * (2 * L_pad * (K_ct * C_in) * C_out
                 + len(dilations) * 2 * L_pad * (K_ru + 1) * C_out * C_out)
    trans = B * (C_in * T + len(dilations) * C_out * (2 * PAD + 2 * L_pad))
    bytes_acc = (4 * (int(x.size) + B * C_out * L_pad)
                 + 2 * (int(ctw2d.size) + sum(int(a.size) for a in ru_args))
                 + 4 * (int(a0.size) + int(ctb.size)))

    return pl.pallas_call(
        kernel,
        out_shape=jax.ShapeDtypeStruct((B, C_out, L_pad), jnp.float32),
        grid=(B,),
        in_specs=[
            pl.BlockSpec((1, C_in, T), lambda b: (b, 0, 0)),           # x (NCL)
            pl.BlockSpec((C_in, 2), lambda b: (0, 0)),                 # [alpha0 | 1/alpha0]
            pl.BlockSpec((C_out, K_ct * C_in), lambda b: (0, 0)),      # convT taps stacked (bf16)
            pl.BlockSpec((C_out, 1), lambda b: (0, 0)),                # convT bias
            *ru_specs,
        ],
        out_specs=pl.BlockSpec((1, C_out, L_pad), lambda b: (b, 0, 0)),
        scratch_shapes=[pltpu.VMEM((C_out, 2 * PAD + L_pad), jnp.float32)],
        compiler_params=pltpu.CompilerParams(
            dimension_semantics=("parallel",),
            vmem_limit_bytes=32 * 1024 * 1024),
        cost_estimate=pl.CostEstimate(flops=flops, transcendentals=trans,
                                      bytes_accessed=bytes_acc),
    )(x, a0, ctw2d, ctb, *ru_args)


# ----------------------------- parameter setup ------------------------------

def _weight_norm(v, g):
    # PyTorch weight_norm, dim=0: per-slice-along-dim0 normalization.
    axes = tuple(range(1, v.ndim))
    norm = jnp.sqrt(jnp.sum(v * v, axis=axes, keepdims=True))
    return g * v / norm


def init_params(key, input_dim=16, output_dim=8, kernel_size=2, stride=1):
    ks = list(jax.random.split(key, 32))
    nxt = iter(ks).__next__
    p = {"input_dim": input_dim, "output_dim": output_dim,
         "kernel_size": kernel_size, "stride": stride,
         "ct_padding": (kernel_size - stride) // 2}
    p["alpha0"] = jnp.ones((1, input_dim, 1)) + 0.1 * jax.random.normal(nxt(), (1, input_dim, 1))
    v = 0.3 * jax.random.normal(nxt(), (input_dim, output_dim, kernel_size))
    g = 0.5 + 0.5 * jax.random.uniform(nxt(), (input_dim, 1, 1))
    p["ct_w"] = _weight_norm(v, g)                       # effective ConvTranspose1d weight
    p["ct_b"] = 0.1 * jax.random.normal(nxt(), (output_dim,))
    p["rus"] = []
    for d in (1, 3, 9):
        ru = {"dilation": d}
        ru["alpha1"] = jnp.ones((1, output_dim, 1)) + 0.1 * jax.random.normal(nxt(), (1, output_dim, 1))
        v1 = 0.3 * jax.random.normal(nxt(), (output_dim, output_dim, 7))
        g1 = 0.5 + 0.5 * jax.random.uniform(nxt(), (output_dim, 1, 1))
        ru["w1"] = _weight_norm(v1, g1)
        ru["b1"] = 0.1 * jax.random.normal(nxt(), (output_dim,))
        ru["alpha2"] = jnp.ones((1, output_dim, 1)) + 0.1 * jax.random.normal(nxt(), (1, output_dim, 1))
        v2 = 0.3 * jax.random.normal(nxt(), (output_dim, output_dim, 1))
        g2 = 0.5 + 0.5 * jax.random.uniform(nxt(), (output_dim, 1, 1))
        ru["w2"] = _weight_norm(v2, g2)
        ru["b2"] = 0.1 * jax.random.normal(nxt(), (output_dim,))
        p["rus"].append(ru)
    return p


# ------------------------------ forward wrapper ------------------------------

def _alpha_pack(alpha_1c1):
    a = alpha_1c1[0].astype(jnp.float32)                          # (C, 1)
    return jnp.concatenate([a, 1.0 / (a + 1e-9)], axis=1)         # (C, 2): [alpha | 1/(alpha+eps)]


def decoder_block_forward(x_ncl, params):
    x = x_ncl.astype(jnp.float32)                        # (B, C_in, T) -- NCL IS kernel layout
    B, C_in, T = x.shape
    C_out = params["output_dim"]
    K_ct = params["kernel_size"]
    stride = params["stride"]
    padding = params["ct_padding"]
    assert stride == 1  # TODO(synk): stride>1 ConvTranspose1d (lhs dilation) not handled here
    L = (T - 1) * stride - 2 * padding + K_ct

    dilations = tuple(ru["dilation"] for ru in params["rus"])
    K_ru = int(params["rus"][0]["w1"].shape[-1])

    # Effective weights, tap-stacked along the contraction axis, bf16 for the MXU.
    a0 = _alpha_pack(params["alpha0"])
    Wt = params["ct_w"]                                  # (C_in, C_out, K_ct)
    ctw2d = jnp.concatenate([Wt[:, :, k].T for k in range(K_ct)],
                            axis=1).astype(jnp.bfloat16)             # (C_out, K_ct*C_in)
    ctb = params["ct_b"][:, None].astype(jnp.float32)                # (C_out, 1)

    ru_args = []
    for ru in params["rus"]:
        w1f = jnp.transpose(ru["w1"], (0, 2, 1)).reshape(C_out, K_ru * C_out).astype(jnp.bfloat16)
        ru_args += [_alpha_pack(ru["alpha1"]), w1f, ru["b1"][:, None].astype(jnp.float32),
                    _alpha_pack(ru["alpha2"]), ru["w2"][:, :, 0].astype(jnp.bfloat16),
                    ru["b2"][:, None].astype(jnp.float32)]

    out_pad = decoder_block_pallas(x, a0, ctw2d, ctb, ru_args,
                                   C_in=C_in, C_out=C_out, K_ct=K_ct, T=T, L=L,
                                   padding=padding, dilations=dilations, K_ru=K_ru)
    # TODO(synk): skip this trim (extra HBM pass) when the consumer accepts the
    #             lane-padded (..., L_pad) layout and fuses the trim itself.
    return out_pad[:, :, :L]                             # (B, C_out, L)


# --------------------------- numpy reference (NCL) ---------------------------

def reference_forward(x_ncl, params):
    def snake(x, a):
        return x + (1.0 / (a + 1e-9)) * np.sin(a * x) ** 2

    x = np.asarray(x_ncl, np.float64)
    a0 = np.asarray(params["alpha0"], np.float64)
    W = np.asarray(params["ct_w"], np.float64)
    b = np.asarray(params["ct_b"], np.float64)
    h = snake(x, a0)
    B, Cin, Lx = h.shape
    _, Cout, K = W.shape
    s, p = params["stride"], params["ct_padding"]
    Lout = (Lx - 1) * s - 2 * p + K
    y = np.zeros((B, Cout, Lout))
    for i in range(Lx):
        for k in range(K):
            j = i * s + k - p
            if 0 <= j < Lout:
                y[:, :, j] += h[:, :, i] @ W[:, :, k]
    h = y + b[None, :, None]
    for ru in params["rus"]:
        d = ru["dilation"]
        a1, w1, b1 = (np.asarray(ru[k], np.float64) for k in ("alpha1", "w1", "b1"))
        a2, w2, b2 = (np.asarray(ru[k], np.float64) for k in ("alpha2", "w2", "b2"))
        sp = np.pad(snake(h, a1), ((0, 0), (0, 0), (3 * d, 3 * d)))
        Lc = h.shape[2]
        y = np.zeros((h.shape[0], w1.shape[0], Lc))
        for k in range(7):
            y += np.einsum("oc,bct->bot", w1[:, :, k], sp[:, :, k * d:k * d + Lc])
        y += b1[None, :, None]
        y2 = np.einsum("oc,bct->bot", w2[:, :, 0], snake(y, a2)) + b2[None, :, None]
        h = h + y2
    return h


if __name__ == "__main__":
    key = jax.random.PRNGKey(0)
    kx, kp = jax.random.split(key)
    B, C_in, T = 2, 16, 16
    x = jax.random.normal(kx, (B, C_in, T), dtype=jnp.float32)   # PyTorch NCL input
    params = init_params(kp)

    out = decoder_block_forward(x, params)
    out = jax.block_until_ready(out)

    ref = reference_forward(np.asarray(x), params)
    assert out.shape == ref.shape == (B, params["output_dim"], T + 1)
    # bf16 MXU operands (f32 accumulation) -> slightly looser tolerance than pure f32.
    np.testing.assert_allclose(np.asarray(out), ref, rtol=5e-2, atol=5e-2)
    print("KERNEL_OK")
</pallas_src>

<mosaic_0001>
module attributes {stable_mosaic.version = 11 : i64} {
  func.func @kernel(%arg0: i32, %arg1: memref<1x16x16xf32, #tpu.memory_space<vmem>>, %arg2: memref<16x2xf32, #tpu.memory_space<vmem>>, %arg3: memref<8x32xbf16, #tpu.memory_space<vmem>>, %arg4: memref<8x1xf32, #tpu.memory_space<vmem>>, %arg5: memref<8x2xf32, #tpu.memory_space<vmem>>, %arg6: memref<8x56xbf16, #tpu.memory_space<vmem>>, %arg7: memref<8x1xf32, #tpu.memory_space<vmem>>, %arg8: memref<8x2xf32, #tpu.memory_space<vmem>>, %arg9: memref<8x8xbf16, #tpu.memory_space<vmem>>, %arg10: memref<8x1xf32, #tpu.memory_space<vmem>>, %arg11: memref<8x2xf32, #tpu.memory_space<vmem>>, %arg12: memref<8x56xbf16, #tpu.memory_space<vmem>>, %arg13: memref<8x1xf32, #tpu.memory_space<vmem>>, %arg14: memref<8x2xf32, #tpu.memory_space<vmem>>, %arg15: memref<8x8xbf16, #tpu.memory_space<vmem>>, %arg16: memref<8x1xf32, #tpu.memory_space<vmem>>, %arg17: memref<8x2xf32, #tpu.memory_space<vmem>>, %arg18: memref<8x56xbf16, #tpu.memory_space<vmem>>, %arg19: memref<8x1xf32, #tpu.memory_space<vmem>>, %arg20: memref<8x2xf32, #tpu.memory_space<vmem>>, %arg21: memref<8x8xbf16, #tpu.memory_space<vmem>>, %arg22: memref<8x1xf32, #tpu.memory_space<vmem>>, %arg23: memref<1x8x128xf32, #tpu.memory_space<vmem>>, %arg24: memref<8x384xf32, #tpu.memory_space<vmem>>) attributes {dimension_semantics = [#tpu.dimension_semantics<parallel>], iteration_bounds = array<i64: 2>, scalar_prefetch = 0 : i64, scratch_operands = 1 : i64, tpu.core_type = #tpu.core_type<tc>, window_params = [{transform_indices = @transform_0, window_bounds = array<i64: 1, 16, 16>}, {pipeline_mode = #tpu.pipeline_mode<synchronous>, transform_indices = @transform_1, window_bounds = array<i64: 16, 2>}, {pipeline_mode = #tpu.pipeline_mode<synchronous>, transform_indices = @transform_2, window_bounds = array<i64: 8, 32>}, {pipeline_mode = #tpu.pipeline_mode<synchronous>, transform_indices = @transform_3, window_bounds = array<i64: 8, 1>}, {pipeline_mode = #tpu.pipeline_mode<synchronous>, transform_indices = @transform_4, window_bounds = array<i64: 8, 2>}, {pipeline_mode = #tpu.pipeline_mode<synchronous>, transform_indices = @transform_5, window_bounds = array<i64: 8, 56>}, {pipeline_mode = #tpu.pipeline_mode<synchronous>, transform_indices = @transform_6, window_bounds = array<i64: 8, 1>}, {pipeline_mode = #tpu.pipeline_mode<synchronous>, transform_indices = @transform_7, window_bounds = array<i64: 8, 2>}, {pipeline_mode = #tpu.pipeline_mode<synchronous>, transform_indices = @transform_8, window_bounds = array<i64: 8, 8>}, {pipeline_mode = #tpu.pipeline_mode<synchronous>, transform_indices = @transform_9, window_bounds = array<i64: 8, 1>}, {pipeline_mode = #tpu.pipeline_mode<synchronous>, transform_indices = @transform_10, window_bounds = array<i64: 8, 2>}, {pipeline_mode = #tpu.pipeline_mode<synchronous>, transform_indices = @transform_11, window_bounds = array<i64: 8, 56>}, {pipeline_mode = #tpu.pipeline_mode<synchronous>, transform_indices = @transform_12, window_bounds = array<i64: 8, 1>}, {pipeline_mode = #tpu.pipeline_mode<synchronous>, transform_indices = @transform_13, window_bounds = array<i64: 8, 2>}, {pipeline_mode = #tpu.pipeline_mode<synchronous>, transform_indices = @transform_14, window_bounds = array<i64: 8, 8>}, {pipeline_mode = #tpu.pipeline_mode<synchronous>, transform_indices = @transform_15, window_bounds = array<i64: 8, 1>}, {pipeline_mode = #tpu.pipeline_mode<synchronous>, transform_indices = @transform_16, window_bounds = array<i64: 8, 2>}, {pipeline_mode = #tpu.pipeline_mode<synchronous>, transform_indices = @transform_17, window_bounds = array<i64: 8, 56>}, {pipeline_mode = #tpu.pipeline_mode<synchronous>, transform_indices = @transform_18, window_bounds = array<i64: 8, 1>}, {pipeline_mode = #tpu.pipeline_mode<synchronous>, transform_indices = @transform_19, window_bounds = array<i64: 8, 2>}, {pipeline_mode = #tpu.pipeline_mode<synchronous>, transform_indices = @transform_20, window_bounds = array<i64: 8, 8>}, {pipeline_mode = #tpu.pipeline_mode<synchronous>, transform_indices = @transform_21, window_bounds = array<i64: 8, 1>}, {transform_indices = @transform_22, window_bounds = array<i64: 1, 8, 128>}]} {
    %0 = tpu.iota {dimensions = array<i32: 1>} : vector<8x128xi32>
    %c17_i32 = arith.constant 17 : i32
    %1 = vector.broadcast %c17_i32 : i32 to vector<8x128xi32>
    %2 = arith.cmpi slt, %0, %1 : vector<8x128xi32>
    %cst = arith.constant 0.000000e+00 : f32
    %3 = vector.broadcast %cst : f32 to vector<8x128xf32>
    %c0 = arith.constant 0 : index
    %c0_0 = arith.constant 0 : index
    %4 = vector.load %arg24[%c0, %c0_0] : memref<8x384xf32, #tpu.memory_space<vmem>>, vector<8x128xf32>
    tpu.vector_store %arg24[%c0, %c0_0], %3 {strides = array<i32>} : memref<8x384xf32, #tpu.memory_space<vmem>>, vector<8x128xf32>,
    %c0_1 = arith.constant 0 : index
    %c256 = arith.constant 256 : index
    %5 = vector.load %arg24[%c0_1, %c256] : memref<8x384xf32, #tpu.memory_space<vmem>>, vector<8x128xf32>
    tpu.vector_store %arg24[%c0_1, %c256], %3 {strides = array<i32>} : memref<8x384xf32, #tpu.memory_space<vmem>>, vector<8x128xf32>,
    %c0_2 = arith.constant 0 : index
    %c0_3 = arith.constant 0 : index
    %c0_4 = arith.constant 0 : index
    %6 = vector.load %arg1[%c0_2, %c0_3, %c0_4] : memref<1x16x16xf32, #tpu.memory_space<vmem>>, vector<1x16x16xf32>
    %7 = vector.shape_cast %6 : vector<1x16x16xf32> to vector<16x16xf32>
    %c0_5 = arith.constant 0 : index
    %c0_6 = arith.constant 0 : index
    %8 = vector.load %arg2[%c0_5, %c0_6] : memref<16x2xf32, #tpu.memory_space<vmem>>, vector<16x1xf32>
    %c0_7 = arith.constant 0 : index
    %c1 = arith.constant 1 : index
    %9 = vector.load %arg2[%c0_7, %c1] : memref<16x2xf32, #tpu.memory_space<vmem>>, vector<16x1xf32>
    %10 = vector.broadcast %8 : vector<16x1xf32> to vector<16x16xf32>
    %11 = arith.mulf %10, %7 : vector<16x16xf32>
    %12 = math.sin %11 : vector<16x16xf32>
    %13 = arith.mulf %12, %12 : vector<16x16xf32>
    %14 = vector.broadcast %9 : vector<16x1xf32> to vector<16x16xf32>
    %15 = arith.mulf %14, %13 : vector<16x16xf32>
    %16 = arith.addf %7, %15 : vector<16x16xf32>
    %cst_8 = arith.constant 0.000000e+00 : f32
    %17 = vector.broadcast %cst_8 : f32 to vector<16x112xf32>
    %18 = tpu.concatenate %16, %17 in 1 : vector<16x16xf32>, vector<16x112xf32> -> vector<16x128xf32>
    %cst_9 = arith.constant 0.000000e+00 : f32
    %19 = vector.broadcast %cst_9 : f32 to vector<16x1xf32>
    %cst_10 = arith.constant 0.000000e+00 : f32
    %20 = vector.broadcast %cst_10 : f32 to vector<16x111xf32>
    %21 = tpu.concatenate %19, %16, %20 in 1 : vector<16x1xf32>, vector<16x16xf32>, vector<16x111xf32> -> vector<16x128xf32>
    %22 = tpu.concatenate %18, %21 in 0 : vector<16x128xf32>, vector<16x128xf32> -> vector<32x128xf32>
    %23 = arith.truncf %22 : vector<32x128xf32> to vector<32x128xbf16>
    %c0_11 = arith.constant 0 : index
    %c0_12 = arith.constant 0 : index
    %24 = vector.load %arg3[%c0_11, %c0_12] : memref<8x32xbf16, #tpu.memory_space<vmem>>, vector<8x32xbf16>
    %cst_13 = arith.constant dense<0.000000e+00> : vector<8x128xf32>
    %25 = tpu.matmul %24, %23, %cst_13 {dimension_numbers = #tpu.dot_dimension_numbers<[1], [0], [0], [1], [0, 0, 1, 1], [], []>} : vector<8x32xbf16>, vector<32x128xbf16>, vector<8x128xf32> -> vector<8x128xf32>
    %c0_14 = arith.constant 0 : index
    %c0_15 = arith.constant 0 : index
    %26 = vector.load %arg4[%c0_14, %c0_15] : memref<8x1xf32, #tpu.memory_space<vmem>>, vector<8x1xf32>
    %27 = vector.broadcast %26 : vector<8x1xf32> to vector<8x128xf32>
    %28 = arith.addf %25, %27 : vector<8x128xf32>
    %cst_16 = arith.constant 0.000000e+00 : f32
    %29 = vector.broadcast %cst_16 : f32 to vector<8x128xf32>
    %30 = arith.select %2, %28, %29 : vector<8x128xi1>, vector<8x128xf32>
    %c0_17 = arith.constant 0 : index
    %c128 = arith.constant 128 : index
    %31 = vector.load %arg24[%c0_17, %c128] : memref<8x384xf32, #tpu.memory_space<vmem>>, vector<8x128xf32>
    tpu.vector_store %arg24[%c0_17, %c128], %30 {strides = array<i32>} : memref<8x384xf32, #tpu.memory_space<vmem>>, vector<8x128xf32>,
    %c0_18 = arith.constant 0 : index
    %c0_19 = arith.constant 0 : index
    %32 = vector.load %arg24[%c0_18, %c0_19] : memref<8x384xf32, #tpu.memory_space<vmem>>, vector<8x384xf32>
    %c0_20 = arith.constant 0 : index
    %c0_21 = arith.constant 0 : index
    %33 = vector.load %arg5[%c0_20, %c0_21] : memref<8x2xf32, #tpu.memory_space<vmem>>, vector<8x1xf32>
    %c0_22 = arith.constant 0 : index
    %c1_23 = arith.constant 1 : index
    %34 = vector.load %arg5[%c0_22, %c1_23] : memref<8x2xf32, #tpu.memory_space<vmem>>, vector<8x1xf32>
    %35 = vector.broadcast %33 : vector<8x1xf32> to vector<8x384xf32>
    %36 = arith.mulf %35, %32 : vector<8x384xf32>
    %37 = math.sin %36 : vector<8x384xf32>
    %38 = arith.mulf %37, %37 : vector<8x384xf32>
    %39 = vector.broadcast %34 : vector<8x1xf32> to vector<8x384xf32>
    %40 = arith.mulf %39, %38 : vector<8x384xf32>
    %41 = arith.addf %32, %40 : vector<8x384xf32>
    %42 = vector.extract_strided_slice %41 {offsets = [0, 125], sizes = [8, 128], strides = [1, 1]} : vector<8x384xf32> to vector<8x128xf32>
    %43 = vector.extract_strided_slice %41 {offsets = [0, 126], sizes = [8, 128], strides = [1, 1]} : vector<8x384xf32> to vector<8x128xf32>
    %44 = vector.extract_strided_slice %41 {offsets = [0, 127], sizes = [8, 128], strides = [1, 1]} : vector<8x384xf32> to vector<8x128xf32>
    %45 = vector.extract_strided_slice %41 {offsets = [0, 128], sizes = [8, 128], strides = [1, 1]} : vector<8x384xf32> to vector<8x128xf32>
    %46 = vector.extract_strided_slice %41 {offsets = [0, 129], sizes = [8, 128], strides = [1, 1]} : vector<8x384xf32> to vector<8x128xf32>
    %47 = vector.extract_strided_slice %41 {offsets = [0, 130], sizes = [8, 128], strides = [1, 1]} : vector<8x384xf32> to vector<8x128xf32>
    %48 = vector.extract_strided_slice %41 {offsets = [0, 131], sizes = [8, 128], strides = [1, 1]} : vector<8x384xf32> to vector<8x128xf32>
    %49 = tpu.concatenate %42, %43, %44, %45, %46, %47, %48 in 0 : vector<8x128xf32>, vector<8x128xf32>, vector<8x128xf32>, vector<8x128xf32>, vector<8x128xf32>, vector<8x128xf32>, vector<8x128xf32> -> vector<56x128xf32>
    %50 = arith.truncf %49 : vector<56x128xf32> to vector<56x128xbf16>
    %c0_24 = arith.constant 0 : index
    %c0_25 = arith.constant 0 : index
    %51 = vector.load %arg6[%c0_24, %c0_25] : memref<8x56xbf16, #tpu.memory_space<vmem>>, vector<8x56xbf16>
    %cst_26 = arith.constant dense<0.000000e+00> : vector<8x128xf32>
    %52 = tpu.matmul %51, %50, %cst_26 {dimension_numbers = #tpu.dot_dimension_numbers<[1], [0], [0], [1], [0, 0, 1, 1], [], []>} : vector<8x56xbf16>, vector<56x128xbf16>, vector<8x128xf32> -> vector<8x128xf32>
    %c0_27 = arith.constant 0 : index
    %c0_28 = arith.constant 0 : index
    %53 = vector.load %arg7[%c0_27, %c0_28] : memref<8x1xf32, #tpu.memory_space<vmem>>, vector<8x1xf32>
    %54 = vector.broadcast %53 : vector<8x1xf32> to vector<8x128xf32>
    %55 = arith.addf %52, %54 : vector<8x128xf32>
    %c0_29 = arith.constant 0 : index
    %c0_30 = arith.constant 0 : index
    %56 = vector.load %arg9[%c0_29, %c0_30] : memref<8x8xbf16, #tpu.memory_space<vmem>>, vector<8x8xbf16>
    %c0_31 = arith.constant 0 : index
    %c0_32 = arith.constant 0 : index
    %57 = vector.load %arg8[%c0_31, %c0_32] : memref<8x2xf32, #tpu.memory_space<vmem>>, vector<8x1xf32>
    %c0_33 = arith.constant 0 : index
    %c1_34 = arith.constant 1 : index
    %58 = vector.load %arg8[%c0_33, %c1_34] : memref<8x2xf32, #tpu.memory_space<vmem>>, vector<8x1xf32>
    %59 = vector.broadcast %57 : vector<8x1xf32> to vector<8x128xf32>
    %60 = arith.mulf %59, %55 : vector<8x128xf32>
    %61 = math.sin %60 : vector<8x128xf32>
    %62 = arith.mulf %61, %61 : vector<8x128xf32>
    %63 = vector.broadcast %58 : vector<8x1xf32> to vector<8x128xf32>
    %64 = arith.mulf %63, %62 : vector<8x128xf32>
    %65 = arith.addf %55, %64 : vector<8x128xf32>
    %66 = arith.truncf %65 : vector<8x128xf32> to vector<8x128xbf16>
    %cst_35 = arith.constant dense<0.000000e+00> : vector<8x128xf32>
    %67 = tpu.matmul %56, %66, %cst_35 {dimension_numbers = #tpu.dot_dimension_numbers<[1], [0], [0], [1], [0, 0, 1, 1], [], []>} : vector<8x8xbf16>, vector<8x128xbf16>, vector<8x128xf32> -> vector<8x128xf32>
    %c0_36 = arith.constant 0 : index
    %c0_37 = arith.constant 0 : index
    %68 = vector.load %arg10[%c0_36, %c0_37] : memref<8x1xf32, #tpu.memory_space<vmem>>, vector<8x1xf32>
    %69 = vector.broadcast %68 : vector<8x1xf32> to vector<8x128xf32>
    %70 = arith.addf %67, %69 : vector<8x128xf32>
    %c0_38 = arith.constant 0 : index
    %c128_39 = arith.constant 128 : index
    %71 = vector.load %arg24[%c0_38, %c128_39] : memref<8x384xf32, #tpu.memory_space<vmem>>, vector<8x128xf32>
    %cst_40 = arith.constant 0.000000e+00 : f32
    %72 = vector.broadcast %cst_40 : f32 to vector<8x128xf32>
    %73 = arith.select %2, %70, %72 : vector<8x128xi1>, vector<8x128xf32>
    %74 = arith.addf %71, %73 : vector<8x128xf32>
    %c0_41 = arith.constant 0 : index
    %c128_42 = arith.constant 128 : index
    %75 = vector.load %arg24[%c0_41, %c128_42] : memref<8x384xf32, #tpu.memory_space<vmem>>, vector<8x128xf32>
    tpu.vector_store %arg24[%c0_41, %c128_42], %74 {strides = array<i32>} : memref<8x384xf32, #tpu.memory_space<vmem>>, vector<8x128xf32>,
    %c0_43 = arith.constant 0 : index
    %c0_44 = arith.constant 0 : index
    %76 = vector.load %arg24[%c0_43, %c0_44] : memref<8x384xf32, #tpu.memory_space<vmem>>, vector<8x384xf32>
    %c0_45 = arith.constant 0 : index
    %c0_46 = arith.constant 0 : index
    %77 = vector.load %arg11[%c0_45, %c0_46] : memref<8x2xf32, #tpu.memory_space<vmem>>, vector<8x1xf32>
    %c0_47 = arith.constant 0 : index
    %c1_48 = arith.constant 1 : index
    %78 = vector.load %arg11[%c0_47, %c1_48] : memref<8x2xf32, #tpu.memory_space<vmem>>, vector<8x1xf32>
    %79 = vector.broadcast %77 : vector<8x1xf32> to vector<8x384xf32>
    %80 = arith.mulf %79, %76 : vector<8x384xf32>
    %81 = math.sin %80 : vector<8x384xf32>
    %82 = arith.mulf %81, %81 : vector<8x384xf32>
    %83 = vector.broadcast %78 : vector<8x1xf32> to vector<8x384xf32>
    %84 = arith.mulf %83, %82 : vector<8x384xf32>
    %85 = arith.addf %76, %84 : vector<8x384xf32>
    %86 = vector.extract_strided_slice %85 {offsets = [0, 119], sizes = [8, 128], strides = [1, 1]} : vector<8x384xf32> to vector<8x128xf32>
    %87 = vector.extract_strided_slice %85 {offsets = [0, 122], sizes = [8, 128], strides = [1, 1]} : vector<8x384xf32> to vector<8x128xf32>
    %88 = vector.extract_strided_slice %85 {offsets = [0, 125], sizes = [8, 128], strides = [1, 1]} : vector<8x384xf32> to vector<8x128xf32>
    %89 = vector.extract_strided_slice %85 {offsets = [0, 128], sizes = [8, 128], strides = [1, 1]} : vector<8x384xf32> to vector<8x128xf32>
    %90 = vector.extract_strided_slice %85 {offsets = [0, 131], sizes = [8, 128], strides = [1, 1]} : vector<8x384xf32> to vector<8x128xf32>
    %91 = vector.extract_strided_slice %85 {offsets = [0, 134], sizes = [8, 128], strides = [1, 1]} : vector<8x384xf32> to vector<8x128xf32>
    %92 = vector.extract_strided_slice %85 {offsets = [0, 137], sizes = [8, 128], strides = [1, 1]} : vector<8x384xf32> to vector<8x128xf32>
    %93 = tpu.concatenate %86, %87, %88, %89, %90, %91, %92 in 0 : vector<8x128xf32>, vector<8x128xf32>, vector<8x128xf32>, vector<8x128xf32>, vector<8x128xf32>, vector<8x128xf32>, vector<8x128xf32> -> vector<56x128xf32>
    %94 = arith.truncf %93 : vector<56x128xf32> to vector<56x128xbf16>
    %c0_49 = arith.constant 0 : index
    %c0_50 = arith.constant 0 : index
    %95 = vector.load %arg12[%c0_49, %c0_50] : memref<8x56xbf16, #tpu.memory_space<vmem>>, vector<8x56xbf16>
    %cst_51 = arith.constant dense<0.000000e+00> : vector<8x128xf32>
    %96 = tpu.matmul %95, %94, %cst_51 {dimension_numbers = #tpu.dot_dimension_numbers<[1], [0], [0], [1], [0, 0, 1, 1], [], []>} : vector<8x56xbf16>, vector<56x128xbf16>, vector<8x128xf32> -> vector<8x128xf32>
    %c0_52 = arith.constant 0 : index
    %c0_53 = arith.constant 0 : index
    %97 = vector.load %arg13[%c0_52, %c0_53] : memref<8x1xf32, #tpu.memory_space<vmem>>, vector<8x1xf32>
    %98 = vector.broadcast %97 : vector<8x1xf32> to vector<8x128xf32>
    %99 = arith.addf %96, %98 : vector<8x128xf32>
    %c0_54 = arith.constant 0 : index
    %c0_55 = arith.constant 0 : index
    %100 = vector.load %arg15[%c0_54, %c0_55] : memref<8x8xbf16, #tpu.memory_space<vmem>>, vector<8x8xbf16>
    %c0_56 = arith.constant 0 : index
    %c0_57 = arith.constant 0 : index
    %101 = vector.load %arg14[%c0_56, %c0_57] : memref<8x2xf32, #tpu.memory_space<vmem>>, vector<8x1xf32>
    %c0_58 = arith.constant 0 : index
    %c1_59 = arith.constant 1 : index
    %102 = vector.load %arg14[%c0_58, %c1_59] : memref<8x2xf32, #tpu.memory_space<vmem>>, vector<8x1xf32>
    %103 = vector.broadcast %101 : vector<8x1xf32> to vector<8x128xf32>
    %104 = arith.mulf %103, %99 : vector<8x128xf32>
    %105 = math.sin %104 : vector<8x128xf32>
    %106 = arith.mulf %105, %105 : vector<8x128xf32>
    %107 = vector.broadcast %102 : vector<8x1xf32> to vector<8x128xf32>
    %108 = arith.mulf %107, %106 : vector<8x128xf32>
    %109 = arith.addf %99, %108 : vector<8x128xf32>
    %110 = arith.truncf %109 : vector<8x128xf32> to vector<8x128xbf16>
    %cst_60 = arith.constant dense<0.000000e+00> : vector<8x128xf32>
    %111 = tpu.matmul %100, %110, %cst_60 {dimension_numbers = #tpu.dot_dimension_numbers<[1], [0], [0], [1], [0, 0, 1, 1], [], []>} : vector<8x8xbf16>, vector<8x128xbf16>, vector<8x128xf32> -> vector<8x128xf32>
    %c0_61 = arith.constant 0 : index
    %c0_62 = arith.constant 0 : index
    %112 = vector.load %arg16[%c0_61, %c0_62] : memref<8x1xf32, #tpu.memory_space<vmem>>, vector<8x1xf32>
    %113 = vector.broadcast %112 : vector<8x1xf32> to vector<8x128xf32>
    %114 = arith.addf %111, %113 : vector<8x128xf32>
    %c0_63 = arith.constant 0 : index
    %c128_64 = arith.constant 128 : index
    %115 = vector.load %arg24[%c0_63, %c128_64] : memref<8x384xf32, #tpu.memory_space<vmem>>, vector<8x128xf32>
    %cst_65 = arith.constant 0.000000e+00 : f32
    %116 = vector.broadcast %cst_65 : f32 to vector<8x128xf32>
    %117 = arith.select %2, %114, %116 : vector<8x128xi1>, vector<8x128xf32>
    %118 = arith.addf %115, %117 : vector<8x128xf32>
    %c0_66 = arith.constant 0 : index
    %c128_67 = arith.constant 128 : index
    %119 = vector.load %arg24[%c0_66, %c128_67] : memref<8x384xf32, #tpu.memory_space<vmem>>, vector<8x128xf32>
    tpu.vector_store %arg24[%c0_66, %c128_67], %118 {strides = array<i32>} : memref<8x384xf32, #tpu.memory_space<vmem>>, vector<8x128xf32>,
    %c0_68 = arith.constant 0 : index
    %c0_69 = arith.constant 0 : index
    %120 = vector.load %arg24[%c0_68, %c0_69] : memref<8x384xf32, #tpu.memory_space<vmem>>, vector<8x384xf32>
    %c0_70 = arith.constant 0 : index
    %c0_71 = arith.constant 0 : index
    %121 = vector.load %arg17[%c0_70, %c0_71] : memref<8x2xf32, #tpu.memory_space<vmem>>, vector<8x1xf32>
    %c0_72 = arith.constant 0 : index
    %c1_73 = arith.constant 1 : index
    %122 = vector.load %arg17[%c0_72, %c1_73] : memref<8x2xf32, #tpu.memory_space<vmem>>, vector<8x1xf32>
    %123 = vector.broadcast %121 : vector<8x1xf32> to vector<8x384xf32>
    %124 = arith.mulf %123, %120 : vector<8x384xf32>
    %125 = math.sin %124 : vector<8x384xf32>
    %126 = arith.mulf %125, %125 : vector<8x384xf32>
    %127 = vector.broadcast %122 : vector<8x1xf32> to vector<8x384xf32>
    %128 = arith.mulf %127, %126 : vector<8x384xf32>
    %129 = arith.addf %120, %128 : vector<8x384xf32>
    %130 = vector.extract_strided_slice %129 {offsets = [0, 101], sizes = [8, 128], strides = [1, 1]} : vector<8x384xf32> to vector<8x128xf32>
    %131 = vector.extract_strided_slice %129 {offsets = [0, 110], sizes = [8, 128], strides = [1, 1]} : vector<8x384xf32> to vector<8x128xf32>
    %132 = vector.extract_strided_slice %129 {offsets = [0, 119], sizes = [8, 128], strides = [1, 1]} : vector<8x384xf32> to vector<8x128xf32>
    %133 = vector.extract_strided_slice %129 {offsets = [0, 128], sizes = [8, 128], strides = [1, 1]} : vector<8x384xf32> to vector<8x128xf32>
    %134 = vector.extract_strided_slice %129 {offsets = [0, 137], sizes = [8, 128], strides = [1, 1]} : vector<8x384xf32> to vector<8x128xf32>
    %135 = vector.extract_strided_slice %129 {offsets = [0, 146], sizes = [8, 128], strides = [1, 1]} : vector<8x384xf32> to vector<8x128xf32>
    %136 = vector.extract_strided_slice %129 {offsets = [0, 155], sizes = [8, 128], strides = [1, 1]} : vector<8x384xf32> to vector<8x128xf32>
    %137 = tpu.concatenate %130, %131, %132, %133, %134, %135, %136 in 0 : vector<8x128xf32>, vector<8x128xf32>, vector<8x128xf32>, vector<8x128xf32>, vector<8x128xf32>, vector<8x128xf32>, vector<8x128xf32> -> vector<56x128xf32>
    %138 = arith.truncf %137 : vector<56x128xf32> to vector<56x128xbf16>
    %c0_74 = arith.constant 0 : index
    %c0_75 = arith.constant 0 : index
    %139 = vector.load %arg18[%c0_74, %c0_75] : memref<8x56xbf16, #tpu.memory_space<vmem>>, vector<8x56xbf16>
    %cst_76 = arith.constant dense<0.000000e+00> : vector<8x128xf32>
    %140 = tpu.matmul %139, %138, %cst_76 {dimension_numbers = #tpu.dot_dimension_numbers<[1], [0], [0], [1], [0, 0, 1, 1], [], []>} : vector<8x56xbf16>, vector<56x128xbf16>, vector<8x128xf32> -> vector<8x128xf32>
    %c0_77 = arith.constant 0 : index
    %c0_78 = arith.constant 0 : index
    %141 = vector.load %arg19[%c0_77, %c0_78] : memref<8x1xf32, #tpu.memory_space<vmem>>, vector<8x1xf32>
    %142 = vector.broadcast %141 : vector<8x1xf32> to vector<8x128xf32>
    %143 = arith.addf %140, %142 : vector<8x128xf32>
    %c0_79 = arith.constant 0 : index
    %c0_80 = arith.constant 0 : index
    %144 = vector.load %arg21[%c0_79, %c0_80] : memref<8x8xbf16, #tpu.memory_space<vmem>>, vector<8x8xbf16>
    %c0_81 = arith.constant 0 : index
    %c0_82 = arith.constant 0 : index
    %145 = vector.load %arg20[%c0_81, %c0_82] : memref<8x2xf32, #tpu.memory_space<vmem>>, vector<8x1xf32>
    %c0_83 = arith.constant 0 : index
    %c1_84 = arith.constant 1 : index
    %146 = vector.load %arg20[%c0_83, %c1_84] : memref<8x2xf32, #tpu.memory_space<vmem>>, vector<8x1xf32>
    %147 = vector.broadcast %145 : vector<8x1xf32> to vector<8x128xf32>
    %148 = arith.mulf %147, %143 : vector<8x128xf32>
    %149 = math.sin %148 : vector<8x128xf32>
    %150 = arith.mulf %149, %149 : vector<8x128xf32>
    %151 = vector.broadcast %146 : vector<8x1xf32> to vector<8x128xf32>
    %152 = arith.mulf %151, %150 : vector<8x128xf32>
    %153 = arith.addf %143, %152 : vector<8x128xf32>
    %154 = arith.truncf %153 : vector<8x128xf32> to vector<8x128xbf16>
    %cst_85 = arith.constant dense<0.000000e+00> : vector<8x128xf32>
    %155 = tpu.matmul %144, %154, %cst_85 {dimension_numbers = #tpu.dot_dimension_numbers<[1], [0], [0], [1], [0, 0, 1, 1], [], []>} : vector<8x8xbf16>, vector<8x128xbf16>, vector<8x128xf32> -> vector<8x128xf32>
    %c0_86 = arith.constant 0 : index
    %c0_87 = arith.constant 0 : index
    %156 = vector.load %arg22[%c0_86, %c0_87] : memref<8x1xf32, #tpu.memory_space<vmem>>, vector<8x1xf32>
    %157 = vector.broadcast %156 : vector<8x1xf32> to vector<8x128xf32>
    %158 = arith.addf %155, %157 : vector<8x128xf32>
    %c0_88 = arith.constant 0 : index
    %c128_89 = arith.constant 128 : index
    %159 = vector.load %arg24[%c0_88, %c128_89] : memref<8x384xf32, #tpu.memory_space<vmem>>, vector<8x128xf32>
    %cst_90 = arith.constant 0.000000e+00 : f32
    %160 = vector.broadcast %cst_90 : f32 to vector<8x128xf32>
    %161 = arith.select %2, %158, %160 : vector<8x128xi1>, vector<8x128xf32>
    %162 = arith.addf %159, %161 : vector<8x128xf32>
    %c0_91 = arith.constant 0 : index
    %c0_92 = arith.constant 0 : index
    %c0_93 = arith.constant 0 : index
    %163 = vector.load %arg23[%c0_91, %c0_92, %c0_93] : memref<1x8x128xf32, #tpu.memory_space<vmem>>, vector<1x8x128xf32>
    %164 = vector.shape_cast %163 : vector<1x8x128xf32> to vector<8x128xf32>
    %165 = vector.shape_cast %162 : vector<8x128xf32> to vector<1x8x128xf32>
    tpu.vector_store %arg23[%c0_91, %c0_92, %c0_93], %165 {strides = array<i32>} : memref<1x8x128xf32, #tpu.memory_space<vmem>>, vector<1x8x128xf32>,
    return
  }
  func.func @transform_0(%arg0: i32) -> (i32, i32, i32) {
    %c0_i32 = arith.constant 0 : i32
    %c0_i32_0 = arith.constant 0 : i32
    %c0_i32_1 = arith.constant 0 : i32
    return %arg0, %c0_i32, %c0_i32_0 : i32, i32, i32
  }
  func.func @transform_1(%arg0: i32) -> (i32, i32) {
    %c0_i32 = arith.constant 0 : i32
    %c0_i32_0 = arith.constant 0 : i32
    %c0_i32_1 = arith.constant 0 : i32
    return %c0_i32, %c0_i32_0 : i32, i32
  }
  func.func @transform_2(%arg0: i32) -> (i32, i32) {
    %c0_i32 = arith.constant 0 : i32
    %c0_i32_0 = arith.constant 0 : i32
    %c0_i32_1 = arith.constant 0 : i32
    return %c0_i32, %c0_i32_0 : i32, i32
  }
  func.func @transform_3(%arg0: i32) -> (i32, i32) {
    %c0_i32 = arith.constant 0 : i32
    %c0_i32_0 = arith.constant 0 : i32
    %c0_i32_1 = arith.constant 0 : i32
    return %c0_i32, %c0_i32_0 : i32, i32
  }
  func.func @transform_4(%arg0: i32) -> (i32, i32) {
    %c0_i32 = arith.constant 0 : i32
    %c0_i32_0 = arith.constant 0 : i32
    %c0_i32_1 = arith.constant 0 : i32
    return %c0_i32, %c0_i32_0 : i32, i32
  }
  func.func @transform_5(%arg0: i32) -> (i32, i32) {
    %c0_i32 = arith.constant 0 : i32
    %c0_i32_0 = arith.constant 0 : i32
    %c0_i32_1 = arith.constant 0 : i32
    return %c0_i32, %c0_i32_0 : i32, i32
  }
  func.func @transform_6(%arg0: i32) -> (i32, i32) {
    %c0_i32 = arith.constant 0 : i32
    %c0_i32_0 = arith.constant 0 : i32
    %c0_i32_1 = arith.constant 0 : i32
    return %c0_i32, %c0_i32_0 : i32, i32
  }
  func.func @transform_7(%arg0: i32) -> (i32, i32) {
    %c0_i32 = arith.constant 0 : i32
    %c0_i32_0 = arith.constant 0 : i32
    %c0_i32_1 = arith.constant 0 : i32
    return %c0_i32, %c0_i32_0 : i32, i32
  }
  func.func @transform_8(%arg0: i32) -> (i32, i32) {
    %c0_i32 = arith.constant 0 : i32
    %c0_i32_0 = arith.constant 0 : i32
    %c0_i32_1 = arith.constant 0 : i32
    return %c0_i32, %c0_i32_0 : i32, i32
  }
  func.func @transform_9(%arg0: i32) -> (i32, i32) {
    %c0_i32 = arith.constant 0 : i32
    %c0_i32_0 = arith.constant 0 : i32
    %c0_i32_1 = arith.constant 0 : i32
    return %c0_i32, %c0_i32_0 : i32, i32
  }
  func.func @transform_10(%arg0: i32) -> (i32, i32) {
    %c0_i32 = arith.constant 0 : i32
    %c0_i32_0 = arith.constant 0 : i32
    %c0_i32_1 = arith.constant 0 : i32
    return %c0_i32, %c0_i32_0 : i32, i32
  }
  func.func @transform_11(%arg0: i32) -> (i32, i32) {
    %c0_i32 = arith.constant 0 : i32
    %c0_i32_0 = arith.constant 0 : i32
    %c0_i32_1 = arith.constant 0 : i32
    return %c0_i32, %c0_i32_0 : i32, i32
  }
  func.func @transform_12(%arg0: i32) -> (i32, i32) {
    %c0_i32 = arith.constant 0 : i32
    %c0_i32_0 = arith.constant 0 : i32
    %c0_i32_1 = arith.constant 0 : i32
    return %c0_i32, %c0_i32_0 : i32, i32
  }
  func.func @transform_13(%arg0: i32) -> (i32, i32) {
    %c0_i32 = arith.constant 0 : i32
    %c0_i32_0 = arith.constant 0 : i32
    %c0_i32_1 = arith.constant 0 : i32
    return %c0_i32, %c0_i32_0 : i32, i32
  }
  func.func @transform_14(%arg0: i32) -> (i32, i32) {
    %c0_i32 = arith.constant 0 : i32
    %c0_i32_0 = arith.constant 0 : i32
    %c0_i32_1 = arith.constant 0 : i32
    return %c0_i32, %c0_i32_0 : i32, i32
  }
  func.func @transform_15(%arg0: i32) -> (i32, i32) {
    %c0_i32 = arith.constant 0 : i32
    %c0_i32_0 = arith.constant 0 : i32
    %c0_i32_1 = arith.constant 0 : i32
    return %c0_i32, %c0_i32_0 : i32, i32
  }
  func.func @transform_16(%arg0: i32) -> (i32, i32) {
    %c0_i32 = arith.constant 0 : i32
    %c0_i32_0 = arith.constant 0 : i32
    %c0_i32_1 = arith.constant 0 : i32
    return %c0_i32, %c0_i32_0 : i32, i32
  }
  func.func @transform_17(%arg0: i32) -> (i32, i32) {
    %c0_i32 = arith.constant 0 : i32
    %c0_i32_0 = arith.constant 0 : i32
    %c0_i32_1 = arith.constant 0 : i32
    return %c0_i32, %c0_i32_0 : i32, i32
  }
  func.func @transform_18(%arg0: i32) -> (i32, i32) {
    %c0_i32 = arith.constant 0 : i32
    %c0_i32_0 = arith.constant 0 : i32
    %c0_i32_1 = arith.constant 0 : i32
    return %c0_i32, %c0_i32_0 : i32, i32
  }
  func.func @transform_19(%arg0: i32) -> (i32, i32) {
    %c0_i32 = arith.constant 0 : i32
    %c0_i32_0 = arith.constant 0 : i32
    %c0_i32_1 = arith.constant 0 : i32
    return %c0_i32, %c0_i32_0 : i32, i32
  }
  func.func @transform_20(%arg0: i32) -> (i32, i32) {
    %c0_i32 = arith.constant 0 : i32
    %c0_i32_0 = arith.constant 0 : i32
    %c0_i32_1 = arith.constant 0 : i32
    return %c0_i32, %c0_i32_0 : i32, i32
  }
  func.func @transform_21(%arg0: i32) -> (i32, i32) {
    %c0_i32 = arith.constant 0 : i32
    %c0_i32_0 = arith.constant 0 : i32
    %c0_i32_1 = arith.constant 0 : i32
    return %c0_i32, %c0_i32_0 : i32, i32
  }
  func.func @transform_22(%arg0: i32) -> (i32, i32, i32) {
    %c0_i32 = arith.constant 0 : i32
    %c0_i32_0 = arith.constant 0 : i32
    %c0_i32_1 = arith.constant 0 : i32
    return %arg0, %c0_i32, %c0_i32_0 : i32, i32, i32
  }
}

</mosaic_0001>

<bundles_post_ra>
// kernel: tpu_custom_call.1
= control target key start
LH: loop header
LB: loop body
LE: loop exit
PB: predicated region body
PF: predicated region fallthrough
CT: control target
= control target key end

     0   :  { %s4433_s0 = inlined_call_operand.vmem [shape: f32[2,16,16], index: 0, kind: input, shape index: {}]   ;;  %s4434_s1 = inlined_call_operand.vmem [shape: f32[16,2], index: 1, kind: input, shape index: {}]   ;;  %s4435_s2 = inlined_call_operand.vmem [shape: bf16[8,32], index: 2, kind: input, shape index: {}]   ;;  %s4436_s3 = inlined_call_operand.vmem [shape: f32[8,1], index: 3, kind: input, shape index: {}]   ;;  %s4437_s4 = inlined_call_operand.vmem [shape: f32[8,2], index: 4, kind: input, shape index: {}]   ;;  %s4438_s5 = inlined_call_operand.vmem [shape: bf16[8,56], index: 5, kind: input, shape index: {}]   ;;  %s4439_s6 = inlined_call_operand.vmem [shape: f32[8,1], index: 6, kind: input, shape index: {}]   ;;  %s4440_s7 = inlined_call_operand.vmem [shape: f32[8,2], index: 7, kind: input, shape index: {}]   ;;  %s4441_s8 = inlined_call_operand.vmem [shape: bf16[8,8], index: 8, kind: input, shape index: {}]   ;;  %s4442_s9 = inlined_call_operand.vmem [shape: f32[8,1], index: 9, kind: input, shape index: {}]   ;;  %s4443_s10 = inlined_call_operand.vmem [shape: f32[8,2], index: 10, kind: input, shape index: {}]   ;;  %s4444_s11 = inlined_call_operand.vmem [shape: bf16[8,56], index: 11, kind: input, shape index: {}]   ;;  %s4445_s12 = inlined_call_operand.vmem [shape: f32[8,1], index: 12, kind: input, shape index: {}]   ;;  %s4446_s13 = inlined_call_operand.vmem [shape: f32[8,2], index: 13, kind: input, shape index: {}]   ;;  %s4447_s14 = inlined_call_operand.vmem [shape: bf16[8,8], index: 14, kind: input, shape index: {}]   ;;  %s4448_s15 = inlined_call_operand.vmem [shape: f32[8,1], index: 15, kind: input, shape index: {}]   ;;  %s4449_s16 = inlined_call_operand.vmem [shape: f32[8,2], index: 16, kind: input, shape index: {}]   ;;  %s4450_s17 = inlined_call_operand.vmem [shape: bf16[8,56], index: 17, kind: input, shape index: {}]   ;;  %s4451_s18 = inlined_call_operand.vmem [shape: f32[8,1], index: 18, kind: input, shape index: {}]   ;;  %s4452_s19 = inlined_call_operand.vmem [shape: f32[8,2], index: 19, kind: input, shape index: {}]   ;;  %s4453_s20 = inlined_call_operand.vmem [shape: bf16[8,8], index: 20, kind: input, shape index: {}]   ;;  %s4454_s21 = inlined_call_operand.vmem [shape: f32[8,1], index: 21, kind: input, shape index: {}]   ;;  %s4455_s22 = inlined_call_operand.hbm [shape: f32[2,8,128], index: 22, kind: output, shape index: {}]  }
   0x1   :  { %4464 = sst [smem:[#allocation11_spill]] %s4433_s0 }
   0x2   :  { %4465 = sst [smem:[#allocation12_spill]] %s4434_s1 }
   0x3   :  { %4466 = sst [smem:[#allocation13_spill]] %s4435_s2 }
   0x4   :  { %4467 = sst [smem:[#allocation14_spill]] %s4436_s3 }
   0x5   :  { %4468 = sst [smem:[#allocation15_spill]] %s4437_s4 }
   0x6   :  { %4469 = sst [smem:[#allocation16_spill]] %s4438_s5 }
   0x7   :  { %4470 = sst [smem:[#allocation17_spill]] %s4439_s6 }
   0x8   :  { %27 = vsyncpa [#allocation4], 0 }
   0x9   :  { %29 = vsyncpa [#allocation4 + $0x1], 0  ;;  %s3651_s3 = smov 0   ;;  %s3653_s28 = smov 0  }
   0xa   :  { %s3655_s29 = smov 0   ;;  %s3657_s30 = smov 0  }
   0xb LB: > { %4471 = sst [smem:[#allocation6_spill]] %s3493_s3  ;;  %s3672_s4 = sadd.s32 4294967295, %s3505_s30   ;;  %s3505_s30 = sphi %s3657_s30, %s4494_s30   ;;  %s3501_s29 = sphi %s3655_s29, %s4496_s29   ;;  %s3497_s28 = sphi %s3653_s28, %s4498_s28   ;;  %s3493_s3 = sphi %s3651_s3, %s4497_s3  }
   0xc   : > { %4472 = sst [smem:[#allocation7_spill]] %s3501_s29  ;;  %s3028_s0 = sadd.s32 4294967294, %s3505_s30  }
   0xd   : > { %s3676_s23 = sadd.s32 1, %s3505_s30   ;;  %s509_s1 = sadd.s32 1, %s3501_s29 }
   0xe   : > { %4473 = sst [smem:[#allocation8_spill]] %s3676_s23  ;;  %s506_s5 = ssub.s32 %s3505_s30, %s3676_s23 }
   0xf   : > { %p519_p0 = scmp.ne.s32.totalorder %s3501_s29, %s3497_s28  ;;  %p507_p1 = scmp.eq.s32.totalorder %s506_s5, 0 }
  0x10   : > { %p520_p2 = scmp.eq.s32.totalorder %s3672_s4, 1  ;;  %p525_p3 = scmp.ne.s32.totalorder %s3497_s28, %s3493_s3 }
  0x11   : > { %p526_p4 = scmp.eq.s32.totalorder %s3028_s0, 1  ;;  %p3031_p7 = scmp.ge.s32.totalorder %s3505_s30, 1 }
  0x12   : > { %s3687_s24 = scalar_select %p507_p1, %s3501_s29, %s509_s1  }
  0x13   : > { %p3689_p5 = por %p520_p2, %p519_p0  ;;  %p3693_p6 = por %p526_p4, %p525_p3 }
  0x14   : > { %4474 = sst [smem:[#allocation9_spill]] %s3687_s24  ;;  %p615_p8 = scmp.lt.s32.totalorder %s3505_s30, 3 }
  0x15   : > { %s4476_s25 = scalar_select %p3693_p6, 1, 0 }
  0x16   : > { %p616_p9 = pnand %p3031_p7, %p615_p8 }
  0x17   : > { %4477 = sst [smem:[#allocation10_spill]] %s4476_s25  ;;  %s4478_s27 = sld [smem:[#allocation12_spill]] (!%p616_p9)  ;;  %v3507_v1 = vmov (!%p616_p9), 0   ;;  %v3508_v2 = vmov (!%p616_p9), 1   ;;  %v3509_v4 = vmov (!%p616_p9), 0.0  }
  0x18   : > { %619 = sbr.rel (%p616_p9) target bundleno = 3205 (0xc85), region = 108  ;;  %3306 = vset.pattern.permute.xlu0 (!%p616_p9), %v3507_v1  ;;  %3307 = vset.pattern.permute.xlu1 (!%p616_p9), %v3508_v2  ;;  %s4479_s2 = sld [smem:[#allocation14_spill]] (!%p616_p9)  ;;  %v3510_v29 = vmov (!%p616_p9), 683565275   ;;  %v3511_v33 = vmov (!%p616_p9), 2475754826  }
  0x19   : > { %3133 = vmatprep.subr.bf16.mxu0 (!%p616_p9), %v3509_v4  ;;  %3141 = vmatprep.subr.bf16.mxu1 (!%p616_p9), %v3509_v4  ;;  %p677_p10 = scmp.lt.s32.totalorder (!%p616_p9), %s3672_s4, 1  ;;  %s4480_s23 = sld [smem:[#allocation15_spill]] (!%p616_p9)  ;;  %v3512_v35 = vmov (!%p616_p9), 2131351028   ;;  %v3513_v37 = vmov (!%p616_p9), 2102212464  }
  0x1a   : > { %s4481_s3 = sld [smem:[#allocation11_spill]] (!%p616_p9)  ;;  %v3514_v39 = vmov (!%p616_p9), 920167782   ;;  %v3515_v46 = vmov (!%p616_p9), 1326507024   ;;  %s4482_s24 = sld [smem:[#allocation13_spill]] (!%p616_p9) }
  0x1b   : > { %s3518_s25 = smov (!%p616_p9), 126   ;;  %s3520_s26 = smov (!%p616_p9), 124  }
  0x1c   : > { %s3530_s29 = smov (!%p616_p9), 92  }
  0x1d   : > { %v690_v0 = vld [vmem:[%s4478_s27] sm:$0xff] (!%p616_p9)  ;;  %v691_v3 = vld [vmem:[%s4478_s27 + $0x8] sm:$0xff] (!%p616_p9)  ;;  %s3519_s27 = smov (!%p616_p9), 127  }
  0x1e   : > { %694 = vperm.xlu0 (!%p616_p9), %3306, %v690_v0   ;;  %915 = vperm.xlu1 (!%p616_p9), %3307, %v690_v0   ;;  %v946_v5 = vld [vmem:[%s4479_s2] sm:$0xff] (!%p616_p9)  ;;  %s4463_s2 = smov (!%p616_p9), 125  }
  0x1f   : > { %v3717_v6 = vld [vmem:[%s4480_s23] sm:$0xff]  ;;  %s678_s0 = scalar_select %p677_p10, %s3672_s4, 1 }
  0x20   : > { %s4485_s23 = sld [smem:[#allocation17_spill]] }
  0x21   : > { %s3108_s1 = sshll.u32 %s678_s0, 4  ;;  %s3522_s0 = smov 122  }
  0x22   : > { %699 = vperm.xlu0 %3306, %v691_v3   ;;  %919 = vperm.xlu1 %3307, %v691_v3   ;;  %s681_s5 = scalar_lea.vmem %s4481_s3, %s3108_s1  ;;  %s3517_s3 = smov 1  }
  0x23   : > { %v3726_v7 = vld [vmem:[%s681_s5] sm:$0xff]  ;;  %v3731_v10 = vld [vmem:[%s681_s5 + $0x8] sm:$0xff]  ;;  %s3523_s1 = smov 123   ;;  %s3524_s5 = smov 3  }
  0x26   : > { %3313 = vset.pattern.permute.xlu1 %v3507_v1 }
  0x27   : > { %949 = vperm.xlu1 %3313, %v946_v5  }
  0x2b   : > { %3314 = vset.pattern.permute.xlu1 %v3508_v2 }
  0x2c   : > { %1326 = vperm.xlu1 %3314, %v3717_v6  }
  0x30   : > { %3340 = vset.pattern.permute.xlu1 %v3507_v1 }
  0x9d   : > { %v695_v8 = vpop.permute.xlu0 %694 }
  0x9e   : > { %v3729_v9 = vmul.f32 %v695_v8, %v3726_v7 }
  0xa0   : > { %v704_v11 = vand.u32 2147483647, %v3729_v9  ;;  %v707_v12 = vand.u32 2139095040, %v3729_v9  ;;  %vm706_vm14 = vcmp.lt.s32.totalorder %v3729_v9, 0 }
  0xa1   : > { %v700_v13 = vpop.permute.xlu0 %699 }
  0xa2   : > { %v708_v14 = vshrl.u32 %v707_v12, 23  ;;  %v3736_v15 = vmul.f32 %v700_v13, %v3731_v10  ;;  %v711_v16 = vand.u32 8388607, %v704_v11  ;;  %vm705_vm15 = vcmp.le.f32.partialorder %v704_v11, 0.7853982 }
  0xa4   : > { %v3035_v17 = vadd.s32 4294967169, %v708_v14  ;;  %v811_v18 = vand.u32 2139095040, %v3736_v15  ;;  %v712_v20 = vor.u32 8388608, %v711_v16  ;;  %v808_v22 = vand.u32 2147483647, %v3736_v15 }
  0xa6   : > { %v714_v19 = vadd.s32 1, %v3035_v17  ;;  %v812_v21 = vshrl.u32 %v811_v18, 23  ;;  %v3742_v27 = vshll.u32 %v712_v20, 8  ;;  %v815_v31 = vand.u32 8388607, %v808_v22 }
  0xa8   : > { %vm715_vm0 = vcmp.gt.s32.totalorder %v714_v19, 0  ;;  %v3039_v24 = vadd.s32 4294967169, %v812_v21  ;;  %v816_v61 = vor.u32 8388608, %v815_v31 }
  0xa9   : > { %v716_v23 = vsel %vm715_vm0, %v714_v19, 0  ;;  %vm810_vm0 = vcmp.lt.s32.totalorder %v3736_v15, 0 }
  0xaa   : > { %v717_v25 = vshrl.u32 %v716_v23, 5  ;;  %v718_v26 = vand.u32 31, %v716_v23  ;;  %v818_v32 = vadd.s32 1, %v3039_v24  ;;  %v856_v19 = vshll.u32 %v816_v61, 8 }
  0xac   : > { %v719_v28 = vsub.s32 32, %v718_v26  ;;  %v721_v30 = vshll.u32 %v3510_v29, %v718_v26  ;;  %v724_v34 = vshll.u32 %v3511_v33, %v718_v26  ;;  %v727_v36 = vshll.u32 %v3512_v35, %v718_v26 }
  0xad   : > { %v730_v38 = vshll.u32 %v3513_v37, %v718_v26  ;;  %v733_v40 = vshll.u32 %v3514_v39, %v718_v26  ;;  %vm736_vm1 = vcmp.lt.s32.totalorder %v717_v25, 1  ;;  %vm738_vm2 = vcmp.lt.s32.totalorder %v717_v25, 3 }
  0xae   : > { %v722_v41 = vshrl.u32 %v3511_v33, %v719_v28  ;;  %v725_v42 = vshrl.u32 %v3512_v35, %v719_v28  ;;  %v728_v43 = vshrl.u32 %v3513_v37, %v719_v28  ;;  %v720_v44 = vshrl.u32 %v3510_v29, %v719_v28 }
  0xaf   : > { %v731_v45 = vshrl.u32 %v3514_v39, %v719_v28  ;;  %v734_v47 = vshrl.u32 %v3515_v46, %v719_v28  ;;  %vm819_vm3 = vcmp.gt.s32.totalorder %v818_v32, 0  ;;  %vm739_vm4 = vcmp.lt.s32.totalorder %v717_v25, 4 }
  0xb0   : > { %v723_v48 = vor.u32 %v722_v41, %v721_v30  ;;  %v726_v49 = vor.u32 %v725_v42, %v724_v34  ;;  %v729_v50 = vor.u32 %v728_v43, %v727_v36  ;;  %v820_v53 = vsel %vm819_vm3, %v818_v32, 0 }
  0xb1   : > { %v732_v51 = vor.u32 %v731_v45, %v730_v38  ;;  %v735_v52 = vor.u32 %v734_v47, %v733_v40  ;;  %vm737_vm5 = vcmp.lt.s32.totalorder %v717_v25, 2  ;;  %v822_v0 = vand.u32 31, %v820_v53 }
  0xb2   : > { %v740_v54 = vsel %vm736_vm1, %v720_v44, %v723_v48  ;;  %v741_v55 = vsel %vm739_vm4, %v729_v50, 2102212464  ;;  %v744_v56 = vsel %vm736_vm1, %v723_v48, %v726_v49  ;;  %v748_v57 = vsel %vm736_vm1, %v726_v49, %v729_v50 }
  0xb3   : > { %v742_v58 = vsel %vm738_vm2, %v726_v49, %v741_v55  ;;  %v745_v59 = vsel %vm739_vm4, %v732_v51, 920167782  ;;  %v749_v60 = vsel %vm739_vm4, %v735_v52, 1326507024  ;;  %v821_v17 = vshrl.u32 %v820_v53, 5 }
  0xb4   : > { %v746_v62 = vsel %vm738_vm2, %v729_v50, %v745_v59  ;;  %v750_v63 = vsel %vm738_vm2, %v732_v51, %v749_v60  ;;  %v743_v3 = vsel %vm737_vm5, %v740_v54, %v742_v58  ;;  %v823_v18 = vsub.s32 32, %v822_v0 }
  0xb5   : > { %v747_v5 = vsel %vm737_vm5, %v744_v56, %v746_v62  ;;  %v751_v8 = vsel %vm737_vm5, %v748_v57, %v750_v63  ;;  %v759_v20 = vmul.u32 %v3742_v27, %v743_v3  ;;  %v825_v21 = vshll.u32 %v3510_v29, %v822_v0 }
  0xb6   : > { %v3764_v12 = vmul.u32.u64.low %v3742_v27, %v751_v8  ;;  %v3765_v13 = vmul.u32.u64.high %v3742_v27, %v751_v8, %v3764_v12  ;;  %v3768_v14 = vmul.u32.u64.low %v3742_v27, %v747_v5  ;;  %v3769_v16 = vmul.u32.u64.high %v3742_v27, %v747_v5, %v3768_v14 }
  0xb7   : > { %v828_v23 = vshll.u32 %v3511_v33, %v822_v0  ;;  %v831_v24 = vshll.u32 %v3512_v35, %v822_v0  ;;  %v826_v25 = vshrl.u32 %v3511_v33, %v823_v18  ;;  %v829_v26 = vshrl.u32 %v3512_v35, %v823_v18 }
  0xb8   : > { %v832_v28 = vshrl.u32 %v3513_v37, %v823_v18  ;;  %v834_v30 = vshll.u32 %v3513_v37, %v822_v0  ;;  %vm761_vm6 = vc.u32 %v3765_v13, %v3768_v14  ;;  %v762_v31 = vadd.s32 1, %v3769_v16 }
  0xb9   : > { %v835_v27 = vshrl.u32 %v3514_v39, %v823_v18  ;;  %v837_v32 = vshll.u32 %v3514_v39, %v822_v0  ;;  %v827_v34 = vor.u32 %v826_v25, %v825_v21  ;;  %v830_v36 = vor.u32 %v829_v26, %v828_v23 }
  0xba   : > { %v833_v38 = vor.u32 %v832_v28, %v831_v24  ;;  %v838_v40 = vshrl.u32 %v3515_v46, %v823_v18  ;;  %v763_v41 = vsel %vm761_vm6, %v762_v31, %v3769_v16  ;;  %vm840_vm7 = vcmp.lt.s32.totalorder %v821_v17, 1 }
  0xbb   : > { %v836_v42 = vor.u32 %v835_v27, %v834_v30  ;;  %vm843_vm8 = vcmp.lt.s32.totalorder %v821_v17, 4  ;;  %v764_v43 = vadd.s32 %v763_v41, %v759_v20  ;;  %vm842_vm9 = vcmp.lt.s32.totalorder %v821_v17, 3 }
  0xbc   : > { %v839_v44 = vor.u32 %v838_v40, %v837_v32  ;;  %v845_v45 = vsel %vm843_vm8, %v833_v38, 2102212464  ;;  %v824_v47 = vshrl.u32 %v3510_v29, %v823_v18  ;;  %v848_v48 = vsel %vm840_vm7, %v827_v34, %v830_v36 }
  0xbd   : > { %v849_v49 = vsel %vm843_vm8, %v836_v42, 920167782  ;;  %v852_v50 = vsel %vm840_vm7, %v830_v36, %v833_v38  ;;  %v765_v51 = vadd.s32 536870912, %v764_v43  ;;  %vm841_vm10 = vcmp.lt.s32.totalorder %v821_v17, 2 }
  0xbe   : > { %v850_v52 = vsel %vm842_vm9, %v833_v38, %v849_v49  ;;  %v853_v53 = vsel %vm843_vm8, %v839_v44, 1326507024  ;;  %v844_v54 = vsel %vm840_vm7, %v824_v47, %v827_v34  ;;  %v846_v55 = vsel %vm842_vm9, %v830_v36, %v845_v45 }
  0xbf   : > { %v851_v56 = vsel %vm841_vm10, %v848_v48, %v850_v52  ;;  %v854_v57 = vsel %vm842_vm9, %v836_v42, %v853_v53  ;;  %v766_v58 = vshrl.u32 %v765_v51, 30  ;;  %v847_v3 = vsel %vm841_vm10, %v844_v54, %v846_v55 }
  0xc0   : > { %v855_v59 = vsel %vm841_vm10, %v852_v50, %v854_v57  ;;  %v3788_v60 = vmul.u32.u64.low %v856_v19, %v851_v56  ;;  %v3789_v61 = vmul.u32.u64.high %v856_v19, %v851_v56, %v3788_v60  ;;  %v863_v12 = vmul.u32 %v856_v19, %v847_v3 }
  0xc1   : > { %v3791_v62 = vmul.u32.u64.low %v856_v19, %v855_v59  ;;  %v3792_v63 = vmul.u32.u64.high %v856_v19, %v855_v59, %v3791_v62  ;;  %v767_v0 = vshll.u32 %v766_v58, 30  ;;  %v760_v31 = vadd.s32 %v3768_v14, %v3765_v13 }
  0xc2   : > { %v866_v8 = vadd.s32 1, %v3789_v61  ;;  %v790_v53 = vsub.s32 4, %v766_v58  ;;  %vm809_vm1 = vcmp.le.f32.partialorder %v808_v22, 0.7853982  ;;  %vm796_vm5 = vweird.f32 %v3729_v9 }
  0xc3   : > { %v768_v5 = vsub.s32 %v764_v43, %v767_v0  ;;  %vm865_vm11 = vc.u32 %v3792_v63, %v3788_v60  ;;  %v864_v51 = vadd.s32 %v3788_v60, %v3792_v63  ;;  %vm900_vm9 = vweird.f32 %v3736_v15 }
  0xc4   : > { %v867_v17 = vsel %vm865_vm11, %v866_v8, %v3789_v61  ;;  %v791_v0 = vsel %vm706_vm14, %v790_v53, %v766_v58  ;;  %vm3516_vm10 = vmmov 0   ;;  %vm926_vm11 = vcmask 130048  }
  0xc5   : > { %v770_v16 = vsub.s32 0, %v768_v5  ;;  %v868_v18 = vadd.s32 %v867_v17, %v863_v12  ;;  %3137 = vmatprep.mubr.msk.bf16.mxu0 %vm3516_vm10, %v3509_v4  ;;  %3149 = vmatprep.mubr.msk.bf16.mxu1 %vm3516_vm10, %v3509_v4 }
  0xc7   : > { %v3036_v20 = vmin.u32 %v770_v16, %v768_v5  ;;  %v869_v21 = vadd.s32 536870912, %v868_v18 }
  0xc9   : > { %v772_v23 = vclz %v3036_v20  ;;  %v870_v24 = vshrl.u32 %v869_v21, 30 }
  0xcb   : > { %v3037_v25 = vadd.s32 4294967294, %v772_v23  ;;  %v871_v26 = vshll.u32 %v870_v24, 30  ;;  %v894_v12 = vsub.s32 4, %v870_v24 }
  0xcd   : > { %vm3038_vm12 = vcmp.lt.s32.totalorder %v3037_v25, 0  ;;  %v872_v30 = vsub.s32 %v868_v18, %v871_v26  ;;  %v895_v11 = vsel %vm810_vm0, %v894_v12, %v870_v24 }
  0xce   : > { %v775_v28 = vsel %vm3038_vm12, 0, %v3037_v25  ;;  %vm3043_vm12 = vmpackc.low %vm926_vm11, %vm926_vm11 }
  0xcf   : > { %v776_v27 = vsub.s32 32, %v775_v28  ;;  %v780_v19 = vsub.s32 4294967266, %v775_v28  ;;  %v874_v32 = vsub.s32 0, %v872_v30  ;;  %v777_v34 = vshll.u32 %v768_v5, %v775_v28 }
  0xd0   : > { %v793_v5 = vsel %vm705_vm15, 0, %v791_v0  ;;  %v897_v28 = vsel %vm809_vm1, 0, %v895_v11 }
  0xd1   : > { %v778_v36 = vshrl.u32 %v760_v31, %v776_v27  ;;  %v781_v38 = vadd.s32 127, %v780_v19  ;;  %v3040_v40 = vmin.u32 %v874_v32, %v872_v30  ;;  %v797_v16 = vadd.s32 3, %v793_v5 }
  0xd2   : > { %v901_v27 = vadd.s32 3, %v897_v28 }
  0xd3   : > { %v779_v41 = vor.u32 %v778_v36, %v777_v34  ;;  %v782_v42 = vshll.u32 %v781_v38, 23  ;;  %v876_v43 = vclz %v3040_v40  ;;  %v798_v21 = vand.u32 3, %v797_v16  ;;  %v916_v38 = vpop.permute.xlu1 %915 }
  0xd4   : > { %v902_v32 = vand.u32 3, %v901_v27 }
  0xd5   : > { %v783_v44 = vor.u32 4788187, %v782_v42  ;;  %v3041_v45 = vadd.s32 4294967294, %v876_v43  ;;  %v786_v48 = vcvt.s32.f32 %v779_v41  ;;  %vm800_vm2 = vcmp.eq.s32.totalorder %v798_v21, 0 }
  0xd6   : > { %vm803_vm3 = vcmp.eq.s32.totalorder %v798_v21, 2  ;;  %vm799_vm4 = vcmp.lt.s32.totalorder %v798_v21, 2  ;;  %vm907_vm6 = vcmp.eq.s32.totalorder %v902_v32, 2  ;;  %vm904_vm7 = vcmp.eq.s32.totalorder %v902_v32, 0 }
  0xd7   : > { %v784_v47 = vand.u32 2147483647, %v783_v44  ;;  %vm3042_vm13 = vcmp.lt.s32.totalorder %v3041_v45, 0  ;;  %vm903_vm8 = vcmp.lt.s32.totalorder %v902_v32, 2 }
  0xd8   : > { %v879_v50 = vsel %vm3042_vm13, 0, %v3041_v45  ;;  %vm937_vm13 = vcmask 7168  }
  0xd9   : > { %v787_v49 = vmul.f32 %v786_v48, %v784_v47  ;;  %v880_v13 = vsub.s32 32, %v879_v50  ;;  %v884_v14 = vsub.s32 4294967266, %v879_v50  ;;  %v881_v54 = vshll.u32 %v872_v30, %v879_v50 }
  0xdb   : > { %v788_v52 = vxor.u32 2147483648, %v787_v49  ;;  %v882_v55 = vshrl.u32 %v864_v51, %v880_v13  ;;  %v885_v56 = vadd.s32 127, %v884_v14 }
  0xdd   : > { %v789_v57 = vsel %vm706_vm14, %v788_v52, %v787_v49  ;;  %v883_v59 = vor.u32 %v882_v55, %v881_v54  ;;  %v886_v61 = vshll.u32 %v885_v56, 23  ;;  %v920_v49 = vpop.permute.xlu1 %919  ;;  %vm940_vm14 = vcmask 138240  }
  0xde   : > { %v792_v62 = vsel %vm705_vm15, %v3729_v9, %v789_v57  ;;  %vm3046_vm15 = vmpackc.low %vm940_vm14, %vm940_vm14 }
  0xdf   : > { %3399 = vcosq.f32 %v792_v62  ;;  %v887_v60 = vor.u32 4788187, %v886_v61  ;;  %v890_v3 = vcvt.s32.f32 %v883_v59 }
  0xe0   : > { %3401 = vsinq.f32 %v792_v62 }
  0xe1   : > { %v888_v63 = vand.u32 2147483647, %v887_v60 }
  0xe3   : > { %v891_v8 = vmul.f32 %v890_v3, %v888_v63 }
  0xe5   : > { %v892_v17 = vxor.u32 2147483648, %v891_v8 }
  0xe7   : > { %v893_v18 = vsel %vm810_vm0, %v892_v17, %v891_v8  ;;  %vm952_vm0 = vcmask 261120  }
  0xe8   : > { %v896_v58 = vsel %vm809_vm1, %v3736_v15, %v893_v18 }
  0xe9   : > { %v3400_v20 = vpop.eup %3399  ;;  %3403 = vcosq.f32 %v896_v58 }
  0xea   : > { %v3402_v23 = vpop.eup %3401  ;;  %v804_v25 = vxor.u32 2147483648, %v3400_v20  ;;  %3405 = vsinq.f32 %v896_v58 }
  0xeb   : > { %v801_v26 = vxor.u32 2147483648, %v3402_v23 }
  0xec   : > { %v805_v31 = vsel %vm803_vm3, %v804_v25, %v3402_v23 }
  0xed   : > { %v802_v30 = vsel %vm800_vm2, %v3400_v20, %v801_v26 }
  0xee   : > { %v806_v19 = vsel %vm799_vm4, %v802_v30, %v805_v31 }
  0xef   : > { %v807_v24 = vsel %vm796_vm5, nan, %v806_v19 }
  0xf0   : > { %v912_v41 = vmul.f32 %v807_v24, %v807_v24 }
  0xf2   : > { %v922_v47 = vmul.f32 %v916_v38, %v912_v41 }
  0xf3   : > { %v3404_v22 = vpop.eup %3403 }
  0xf4   : > { %v3406_v34 = vpop.eup %3405  ;;  %v908_v36 = vxor.u32 2147483648, %v3404_v22  ;;  %v924_v50 = vadd.f32 %v922_v47, %v3726_v7 }
  0xf5   : > { %v905_v40 = vxor.u32 2147483648, %v3406_v34 }
  0xf6   : > { %v909_v42 = vsel %vm907_vm6, %v908_v36, %v3406_v34 }
  0xf7   : > { %v906_v43 = vsel %vm904_vm7, %v3404_v22, %v905_v40 }
  0xf8   : > { %v910_v44 = vsel %vm903_vm8, %v906_v43, %v909_v42 }
  0xf9   : > { %v911_v45 = vsel %vm900_vm9, nan, %v910_v44 }
  0xfa   : > { %v913_v48 = vmul.f32 %v911_v45, %v911_v45 }
  0xfc   : > { %v923_v9 = vmul.f32 %v920_v49, %v913_v48 }
  0xfe   : > { %v925_v51 = vadd.f32 %v923_v9, %v3731_v10  ;;  %v945_v10 = vld [vmem:[%s4482_s24] sm:$0xf]  ;;  %s4489_s24 = smov 125  }
 0x100   : > { %v3308_v15 = vpack.i.bf16 %v925_v51, %v924_v50  ;;  %v3044_v13 = vpack.c.bf16 %v925_v51, %v924_v50 }
 0x102   : > { %3309 = vrot.lane.b32.xlu0 %v3308_v15, %s3517_s3  ;;  %3134 = vmatpush3.bf16.msk.msra.mxu0 %vm3043_vm12, %v3044_v13  ;;  %s4486_s3 = sld [smem:[#allocation16_spill]] }
 0x103   : > { %3135 = vmatprep.subr.bf16.mxu0 %v3509_v4 }
 0x106   : > { %1004 = vperm.xlu0 %3306, %v3717_v6  }
 0x174   : > { %v3310_v14 = vpop.permute.xlu0 %3309 }
 0x175   : > { %v3312_v52 = vunpack.i.h.bf16 %v3310_v14  ;;  %v3311_v53 = vunpack.i.l.bf16 %v3310_v14 }
 0x177   : > { %v939_v54 = vsel %vm937_vm13, 0.0, %v3312_v52  ;;  %v938_v55 = vsel %vm937_vm13, 0.0, %v3311_v53 }
 0x178   : > { %v3047_v7 = vpack.c.bf16 %v939_v54, %v938_v55 }
 0x17a   : > { %3136 = vmatpush3.bf16.msk.msra.mxu0 %vm3046_vm15, %v3047_v7  ;;  %v683_v7 = vlaneseq }
 0x17b   : > { %3153 = vmatprep.subr.bf16.mxu0 %v3509_v4 }
 0x17d   : > { %3138 = vmatmul.mubr.msk.bf16.vlgmr.msra.gmra.mrb[0].mxu0 %vm952_vm0, %v945_v10 }
 0x17e   : > { %3155 = vmatprep.mubr.msk.bf16.mxu0 %vm3516_vm10, %v3509_v4 }
 0x185   : > { %v3824_v6 = vpop.permute.xlu0 %1004 }
 0x186   : > { %v3827_v56 = vmul.f32 0.0, %v3824_v6 }
 0x188   : > { %v1013_v57 = vand.u32 2139095040, %v3827_v56  ;;  %v1010_v8 = vand.u32 2147483647, %v3827_v56 }
 0x18a   : > { %v1014_v59 = vshrl.u32 %v1013_v57, 23  ;;  %v1017_v28 = vand.u32 8388607, %v1010_v8  ;;  %v3869_v57 = vand.u32 127, %v683_v7 }
 0x18c   : > { %v3050_v61 = vadd.s32 4294967169, %v1014_v59  ;;  %v1018_v22 = vor.u32 8388608, %v1017_v28  ;;  %vm685_vm7 = vcmp.lt.s32.totalorder %v3869_v57, 17 }
 0x18e   : > { %v1020_v62 = vadd.s32 1, %v3050_v61  ;;  %v1058_v42 = vshll.u32 %v1018_v22, 8  ;;  %v950_v61 = vpop.permute.xlu1 %949 }
 0x190   : > { %vm1021_vm1 = vcmp.gt.s32.totalorder %v1020_v62, 0 }
 0x191   : > { %v1022_v0 = vsel %vm1021_vm1, %v1020_v62, 0  ;;  %vm1012_vm1 = vcmp.lt.s32.totalorder %v3827_v56, 0 }
 0x192   : > { %v1024_v60 = vand.u32 31, %v1022_v0  ;;  %v1023_v12 = vshrl.u32 %v1022_v0, 5 }
 0x194   : > { %v1025_v63 = vsub.s32 32, %v1024_v60  ;;  %v1036_v16 = vshll.u32 %v3513_v37, %v1024_v60  ;;  %v1039_v20 = vshll.u32 %v3514_v39, %v1024_v60  ;;  %v1027_v58 = vshll.u32 %v3510_v29, %v1024_v60 }
 0x195   : > { %v1030_v23 = vshll.u32 %v3511_v33, %v1024_v60  ;;  %v1033_v25 = vshll.u32 %v3512_v35, %v1024_v60  ;;  %vm1045_vm2 = vcmp.lt.s32.totalorder %v1023_v12, 4  ;;  %vm1042_vm3 = vcmp.lt.s32.totalorder %v1023_v12, 1 }
 0x196   : > { %v1037_v3 = vshrl.u32 %v3514_v39, %v1025_v63  ;;  %v1040_v5 = vshrl.u32 %v3515_v46, %v1025_v63  ;;  %v1028_v17 = vshrl.u32 %v3511_v33, %v1025_v63  ;;  %v1031_v18 = vshrl.u32 %v3512_v35, %v1025_v63 }
 0x197   : > { %v1034_v11 = vshrl.u32 %v3513_v37, %v1025_v63  ;;  %vm1044_vm4 = vcmp.lt.s32.totalorder %v1023_v12, 3  ;;  %vm1043_vm5 = vcmp.lt.s32.totalorder %v1023_v12, 2  ;;  %v1026_v49 = vshrl.u32 %v3510_v29, %v1025_v63 }
 0x198   : > { %v1038_v21 = vor.u32 %v1037_v3, %v1036_v16  ;;  %v1041_v26 = vor.u32 %v1040_v5, %v1039_v20  ;;  %v1029_v30 = vor.u32 %v1028_v17, %v1027_v58  ;;  %v1032_v31 = vor.u32 %v1031_v18, %v1030_v23 }
 0x199   : > { %v1035_v27 = vor.u32 %v1034_v11, %v1033_v25 }
 0x19a   : > { %v1051_v19 = vsel %vm1045_vm2, %v1038_v21, 920167782  ;;  %v1055_v32 = vsel %vm1045_vm2, %v1041_v26, 1326507024  ;;  %v1050_v24 = vsel %vm1042_vm3, %v1029_v30, %v1032_v31  ;;  %v1046_v9 = vsel %vm1042_vm3, %v1026_v49, %v1029_v30 }
 0x19b   : > { %v1052_v34 = vsel %vm1044_vm4, %v1035_v27, %v1051_v19  ;;  %v1054_v36 = vsel %vm1042_vm3, %v1032_v31, %v1035_v27  ;;  %v1056_v38 = vsel %vm1044_vm4, %v1038_v21, %v1055_v32  ;;  %v1047_v48 = vsel %vm1045_vm2, %v1035_v27, 2102212464 }
 0x19c   : > { %v1053_v40 = vsel %vm1043_vm5, %v1050_v24, %v1052_v34  ;;  %v1057_v41 = vsel %vm1043_vm5, %v1054_v36, %v1056_v38  ;;  %v1048_v50 = vsel %vm1044_vm4, %v1032_v31, %v1047_v48  ;;  %vm3915_vm2 = vcmp.le.f32.partialorder %v1010_v8, 0.7853982 }
 0x19d   : > { %v3849_v43 = vmul.u32.u64.low %v1058_v42, %v1053_v40  ;;  %v3850_v44 = vmul.u32.u64.high %v1058_v42, %v1053_v40, %v3849_v43  ;;  %v3853_v45 = vmul.u32.u64.low %v1058_v42, %v1057_v41  ;;  %v3854_v47 = vmul.u32.u64.high %v1058_v42, %v1057_v41, %v3853_v45 }
 0x19e   : > { %v1049_v15 = vsel %vm1043_vm5, %v1046_v9, %v1048_v50 }
 0x19f   : > { %v1068_v51 = vadd.s32 1, %v3850_v44  ;;  %vm1067_vm6 = vc.u32 %v3854_v47, %v3849_v43  ;;  %v1065_v14 = vmul.u32 %v1058_v42, %v1049_v15 }
 0x1a1   : > { %v1069_v13 = vsel %vm1067_vm6, %v1068_v51, %v3850_v44 }
 0x1a2   : > { %v1070_v52 = vadd.s32 %v1069_v13, %v1065_v14 }
 0x1a4   : > { %v1071_v53 = vadd.s32 536870912, %v1070_v52 }
 0x1a6   : > { %v3864_v54 = vshrl.u32 %v1071_v53, 30 }
 0x1a8   : > { %v1073_v55 = vshll.u32 %v3864_v54, 30 }
 0x1aa   : > { %v3867_v10 = vsub.s32 %v1070_v52, %v1073_v55 }
 0x1ac   : > { %v1076_v59 = vsub.s32 0, %v3867_v10 }
 0x1ae   : > { %v3051_v12 = vmin.u32 %v1076_v59, %v3867_v10 }
 0x1b0   : > { %v1078_v18 = vclz %v3051_v12 }
 0x1b2   : > { %v3052_v21 = vadd.s32 4294967294, %v1078_v18 }
 0x1b4   : > { %vm3053_vm9 = vcmp.lt.s32.totalorder %v3052_v21, 0 }
 0x1b5   : > { %v1081_v31 = vsel %vm3053_vm9, 0, %v3052_v21 }
 0x1b6   : > { %v1086_v50 = vsub.s32 4294967266, %v1081_v31  ;;  %v1082_v21 = vsub.s32 32, %v1081_v31 }
 0x250   : > { %v990_v62 = vpop.f32.mrb[0].mxu0 }
 0x251   : > { %v991_v0 = vadd.f32 %v990_v62, %v950_v61  ;;  %v3139_v60 = vpop.f32.mrb[1].mxu0 }
 0x252   : > { %v993_v63 = vpop.f32.mrb[2].mxu0 }
 0x253   : > { %v3875_v3 = vsel %vm685_vm7, %v991_v0, 0.0  ;;  %v3140_v5 = vpop.f32.mrb[3].mxu0 }
 0x254   : > { %v3880_v16 = vmul.f32 %v3824_v6, %v3875_v3 }
 0x256   : > { %v1117_v17 = vand.u32 2139095040, %v3880_v16  ;;  %v1114_v23 = vand.u32 2147483647, %v3880_v16  ;;  %vm1116_vm3 = vcmp.lt.s32.totalorder %v3880_v16, 0 }
 0x258   : > { %v1118_v11 = vshrl.u32 %v1117_v17, 23  ;;  %v1121_v28 = vand.u32 8388607, %v1114_v23  ;;  %vm1115_vm4 = vcmp.le.f32.partialorder %v1114_v23, 0.7853982 }
 0x25a   : > { %v3054_v20 = vadd.s32 4294967169, %v1118_v11  ;;  %v1122_v42 = vor.u32 8388608, %v1121_v28  ;;  %v1087_v11 = vadd.s32 127, %v1086_v50 }
 0x25c   : > { %v1124_v58 = vadd.s32 1, %v3054_v20  ;;  %v1162_v59 = vshll.u32 %v1122_v42, 8  ;;  %v1088_v28 = vshll.u32 %v1087_v11, 23 }
 0x25e   : > { %vm1125_vm8 = vcmp.gt.s32.totalorder %v1124_v58, 0 }
 0x25f   : > { %v1126_v25 = vsel %vm1125_vm8, %v1124_v58, 0 }
 0x260   : > { %v1128_v26 = vand.u32 31, %v1126_v25  ;;  %v1127_v6 = vshrl.u32 %v1126_v25, 5 }
 0x262   : > { %v1129_v30 = vsub.s32 32, %v1128_v26  ;;  %v1131_v27 = vshll.u32 %v3510_v29, %v1128_v26  ;;  %v1134_v19 = vshll.u32 %v3511_v33, %v1128_v26  ;;  %v1137_v24 = vshll.u32 %v3512_v35, %v1128_v26 }
 0x263   : > { %v1140_v36 = vshll.u32 %v3513_v37, %v1128_v26  ;;  %v1143_v40 = vshll.u32 %v3514_v39, %v1128_v26  ;;  %vm1146_vm11 = vcmp.lt.s32.totalorder %v1127_v6, 1  ;;  %vm1149_vm12 = vcmp.lt.s32.totalorder %v1127_v6, 4 }
 0x264   : > { %v1132_v32 = vshrl.u32 %v3511_v33, %v1129_v30  ;;  %v1135_v22 = vshrl.u32 %v3512_v35, %v1129_v30  ;;  %v1138_v34 = vshrl.u32 %v3513_v37, %v1129_v30  ;;  %v1141_v38 = vshrl.u32 %v3514_v39, %v1129_v30 }
 0x265   : > { %v1144_v41 = vshrl.u32 %v3515_v46, %v1129_v30  ;;  %v1130_v14 = vshrl.u32 %v3510_v29, %v1129_v30  ;;  %vm1148_vm13 = vcmp.lt.s32.totalorder %v1127_v6, 3  ;;  %vm1147_vm14 = vcmp.lt.s32.totalorder %v1127_v6, 2 }
 0x266   : > { %v1133_v44 = vor.u32 %v1132_v32, %v1131_v27  ;;  %v1136_v45 = vor.u32 %v1135_v22, %v1134_v19  ;;  %v1139_v48 = vor.u32 %v1138_v34, %v1137_v24  ;;  %v1142_v49 = vor.u32 %v1141_v38, %v1140_v36 }
 0x267   : > { %v1145_v9 = vor.u32 %v1144_v41, %v1143_v40  ;;  %v1066_v26 = vadd.s32 %v3849_v43, %v3854_v47  ;;  %v1083_v19 = vshll.u32 %v3867_v10, %v1081_v31  ;;  %v1089_v32 = vor.u32 4788187, %v1088_v28 }
 0x268   : > { %v1151_v51 = vsel %vm1149_vm12, %v1139_v48, 2102212464  ;;  %v1154_v15 = vsel %vm1146_vm11, %v1133_v44, %v1136_v45  ;;  %v1158_v13 = vsel %vm1146_vm11, %v1136_v45, %v1139_v48  ;;  %v1155_v52 = vsel %vm1149_vm12, %v1142_v49, 920167782 }
 0x269   : > { %v1159_v53 = vsel %vm1149_vm12, %v1145_v9, 1326507024  ;;  %v1156_v55 = vsel %vm1148_vm13, %v1139_v48, %v1155_v52  ;;  %v1150_v61 = vsel %vm1146_vm11, %v1130_v14, %v1133_v44  ;;  %v1152_v62 = vsel %vm1148_vm13, %v1136_v45, %v1151_v51 }
 0x26a   : > { %v1160_v7 = vsel %vm1148_vm13, %v1142_v49, %v1159_v53  ;;  %v1157_v0 = vsel %vm1147_vm14, %v1154_v15, %v1156_v55  ;;  %v1153_v18 = vsel %vm1147_vm14, %v1150_v61, %v1152_v62  ;;  %v1084_v6 = vshrl.u32 %v1066_v26, %v1082_v21 }
 0x26b   : > { %v1161_v60 = vsel %vm1147_vm14, %v1158_v13, %v1160_v7  ;;  %v3900_v12 = vmul.u32.u64.low %v1162_v59, %v1157_v0  ;;  %v3901_v17 = vmul.u32.u64.high %v1162_v59, %v1157_v0, %v3900_v12  ;;  %v1169_v58 = vmul.u32 %v1162_v59, %v1153_v18 }
 0x26c   : > { %v3897_v63 = vmul.u32.u64.low %v1162_v59, %v1161_v60  ;;  %v3898_v5 = vmul.u32.u64.high %v1162_v59, %v1161_v60, %v3897_v63  ;;  %v1085_v24 = vor.u32 %v1084_v6, %v1083_v19  ;;  %v1090_v36 = vand.u32 2147483647, %v1089_v32 }
 0x26d   : > { %v1172_v20 = vadd.s32 1, %v3901_v17  ;;  %v1096_v55 = vsub.s32 4, %v3864_v54  ;;  %vm1102_vm11 = vweird.f32 %v3827_v56  ;;  %vm1206_vm14 = vweird.f32 %v3880_v16 }
 0x26e   : > { %vm1171_vm15 = vc.u32 %v3898_v5, %v3900_v12  ;;  %v1092_v40 = vcvt.s32.f32 %v1085_v24  ;;  %v1170_v10 = vadd.s32 %v3900_v12, %v3898_v5 }
 0x26f   : > { %v1173_v25 = vsel %vm1171_vm15, %v1172_v20, %v3901_v17  ;;  %v1097_v8 = vsel %vm1012_vm1, %v1096_v55, %v3864_v54  ;;  %vm1341_vm15 = vcmask 1039360  }
 0x270   : > { %v1174_v30 = vadd.s32 %v1173_v25, %v1169_v58  ;;  %v1093_v42 = vmul.f32 %v1092_v40, %v1090_v36  ;;  %v1099_v60 = vsel %vm3915_vm2, 0, %v1097_v8 }
 0x271   : > { %v1103_v17 = vadd.s32 3, %v1099_v60 }
 0x272   : > { %v1175_v27 = vadd.s32 536870912, %v1174_v30  ;;  %v1094_v48 = vxor.u32 2147483648, %v1093_v42 }
 0x273   : > { %v1104_v21 = vand.u32 3, %v1103_v17 }
 0x274   : > { %v1176_v22 = vshrl.u32 %v1175_v27, 30  ;;  %v1095_v47 = vsel %vm1012_vm1, %v1094_v48, %v1093_v42  ;;  %vm1361_vm1 = vcmask 1014784  }
 0x275   : > { %v1098_v14 = vsel %vm3915_vm2, %v3827_v56, %v1095_v47  ;;  %vm1106_vm5 = vcmp.eq.s32.totalorder %v1104_v21, 0  ;;  %vm1109_vm6 = vcmp.eq.s32.totalorder %v1104_v21, 2  ;;  %vm1105_vm8 = vcmp.lt.s32.totalorder %v1104_v21, 2 }
 0x276   : > { %v1177_v34 = vshll.u32 %v1176_v22, 30  ;;  %3407 = vcosq.f32 %v1098_v14  ;;  %v1200_v0 = vsub.s32 4, %v1176_v22  ;;  %vm1369_vm2 = vcmask 1006592  }
 0x277   : > { %3409 = vsinq.f32 %v1098_v14 }
 0x278   : > { %v1178_v38 = vsub.s32 %v1174_v30, %v1177_v34  ;;  %v1201_v12 = vsel %vm1116_vm3, %v1200_v0, %v1176_v22 }
 0x279   : > { %v1203_v54 = vsel %vm1115_vm4, 0, %v1201_v12 }
 0x27a   : > { %v1180_v41 = vsub.s32 0, %v1178_v38  ;;  %v1207_v26 = vadd.s32 3, %v1203_v54 }
 0x27c   : > { %v3055_v44 = vmin.u32 %v1180_v41, %v1178_v38  ;;  %v1208_v6 = vand.u32 3, %v1207_v26  ;;  %v1596_v26 = vld [vmem:[%s4442_s9] sm:$0xff] }
 0x27e   : > { %v1182_v45 = vclz %v3055_v44  ;;  %vm1213_vm9 = vcmp.eq.s32.totalorder %v1208_v6, 2  ;;  %vm1210_vm12 = vcmp.eq.s32.totalorder %v1208_v6, 0  ;;  %vm1209_vm13 = vcmp.lt.s32.totalorder %v1208_v6, 2  ;;  %v1327_v44 = vpop.permute.xlu1 %1326 }
 0x280   : > { %v3056_v49 = vadd.s32 4294967294, %v1182_v45  ;;  %v3408_v11 = vpop.eup %3407 }
 0x281   : > { %v3410_v20 = vpop.eup %3409  ;;  %v1110_v25 = vxor.u32 2147483648, %v3408_v11 }
 0x282   : > { %vm3057_vm0 = vcmp.lt.s32.totalorder %v3056_v49, 0  ;;  %v1107_v58 = vxor.u32 2147483648, %v3410_v20 }
 0x283   : > { %v1185_v43 = vsel %vm3057_vm0, 0, %v3056_v49  ;;  %v1111_v30 = vsel %vm1109_vm6, %v1110_v25, %v3410_v20  ;;  %vm1349_vm0 = vcmask 1031168   ;;  %v1477_v25 = vld [vmem:[%s4440_s7] sm:$0xff]  ;;  %vm1428_vm6 = vcmask 457728  }
 0x284   : > { %v1186_v31 = vsub.s32 32, %v1185_v43  ;;  %v1190_v9 = vsub.s32 4294967266, %v1185_v43  ;;  %v1187_v51 = vshll.u32 %v1178_v38, %v1185_v43  ;;  %v1108_v28 = vsel %vm1106_vm5, %v3408_v11, %v1107_v58  ;;  %v1390_v58 = vld [vmem:[%s4485_s23] sm:$0xff]  ;;  %s3531_s23 = smov 101  }
 0x285   : > { %v1112_v19 = vsel %vm1105_vm8, %v1108_v28, %v1111_v30  ;;  %v1656_v28 = vld [vmem:[%s4443_s10] sm:$0xff]  ;;  %vm1432_vm5 = vcmask 1043456  }
 0x286   : > { %v1188_v15 = vshrl.u32 %v1170_v10, %v1186_v31  ;;  %v1191_v13 = vadd.s32 127, %v1190_v9  ;;  %v1113_v34 = vsel %vm1102_vm11, nan, %v1112_v19 }
 0x287   : > { %v1322_v41 = vmul.f32 %v1113_v34, %v1113_v34 }
 0x288   : > { %v1189_v52 = vor.u32 %v1188_v15, %v1187_v51  ;;  %v1192_v53 = vshll.u32 %v1191_v13, 23 }
 0x289   : > { %v1329_v48 = vmul.f32 %v1327_v44, %v1322_v41 }
 0x28a   : > { %v1193_v7 = vor.u32 4788187, %v1192_v53  ;;  %v1196_v61 = vcvt.s32.f32 %v1189_v52 }
 0x28c   : > { %v1194_v59 = vand.u32 2147483647, %v1193_v7 }
 0x28e   : > { %v1197_v62 = vmul.f32 %v1196_v61, %v1194_v59 }
 0x290   : > { %v1198_v63 = vxor.u32 2147483648, %v1197_v62 }
 0x292   : > { %v1199_v5 = vsel %vm1116_vm3, %v1198_v63, %v1197_v62  ;;  %vm1377_vm3 = vcmask 998400  }
 0x293   : > { %v1202_v18 = vsel %vm1115_vm4, %v3880_v16, %v1199_v5  ;;  %vm1420_vm4 = vcmask 23552  }
 0x294   : > { %3411 = vcosq.f32 %v1202_v18 }
 0x295   : > { %3413 = vsinq.f32 %v1202_v18 }
 0x29e   : > { %v3412_v23 = vpop.eup %3411 }
 0x29f   : > { %v3414_v27 = vpop.eup %3413  ;;  %v1214_v32 = vxor.u32 2147483648, %v3412_v23 }
 0x2a0   : > { %v1211_v22 = vxor.u32 2147483648, %v3414_v27 }
 0x2a1   : > { %v1215_v24 = vsel %vm1213_vm9, %v1214_v32, %v3414_v27 }
 0x2a2   : > { %v1212_v36 = vsel %vm1210_vm12, %v3412_v23, %v1211_v22 }
 0x2a3   : > { %v1216_v38 = vsel %vm1209_vm13, %v1212_v36, %v1215_v24 }
 0x2a4   : > { %v1217_v40 = vsel %vm1206_vm14, nan, %v1216_v38 }
 0x2a5   : > { %v1323_v42 = vmul.f32 %v1217_v40, %v1217_v40 }
 0x2a7   : > { %v1330_v45 = vmul.f32 %v1327_v44, %v1323_v42  ;;  %v1389_v42 = vld [vmem:[%s4486_s3] sm:$0xf] }
 0x2a9   : > { %v1333_v49 = vadd.f32 %v1330_v45, %v3875_v3 }
 0x2ab   : > { %v3320_v43 = vpack.i.bf16 %v1333_v49, %v1329_v48  ;;  %v3325_v56 = vpack.i.bf16 %v1329_v48, %v1333_v49 }
 0x2ad   : > { %3321 = vrot.lane.b32.xlu1 %v3320_v43, %s3518_s25  ;;  %3316 = vrot.lane.b32.xlu0 %v3320_v43, %s3519_s27  ;;  %s3525_s25 = smov 116   ;;  %s3526_s27 = smov 119  }
 0x2b1   : > { %3326 = vrot.lane.b32.xlu1 %v3325_v56, %s3520_s26  ;;  %1353 = vrot.lane.b32.xlu0 %v1333_v49, %s4463_s2  ;;  %s3527_s26 = smov 110  }
 0x2b5   : > { %3336 = vrot.lane.b32.xlu1 %v3325_v56, %s3522_s0  ;;  %3331 = vrot.lane.b32.xlu0 %v3325_v56, %s3523_s1  ;;  %s3528_s1 = smov 113  }
 0x31f   : > { %v3322_v16 = vpop.permute.xlu1 %3321  ;;  %v3317_v47 = vpop.permute.xlu0 %3316 }
 0x320   : > { %v3324_v10 = vunpack.i.h.bf16 %v3322_v16  ;;  %v3323_v31 = vunpack.i.l.bf16 %v3322_v16  ;;  %v3319_v9 = vunpack.i.h.bf16 %v3317_v47  ;;  %v3318_v50 = vunpack.i.l.bf16 %v3317_v47 }
 0x322   : > { %v1382_v51 = vpack.c.bf16 %v3319_v9, %v1333_v49  ;;  %v1342_v15 = vsel %vm1341_vm15, %v3318_v50, %v3319_v9  ;;  %v1350_v53 = vsel %vm1349_vm0, %v3323_v31, %v3324_v10 }
 0x323   : > { %v3327_v13 = vpop.permute.xlu1 %3326  ;;  %v1354_v14 = vpop.permute.xlu0 %1353  ;;  %v1381_v52 = vpack.c.bf16 %v1342_v15, %v1329_v48 }
 0x324   : > { %1406 = vrot.lane.b32.xlu1 %v1382_v51, %s3524_s5  ;;  %v3329_v55 = vunpack.i.h.bf16 %v3327_v13  ;;  %v3328_v7 = vunpack.i.l.bf16 %v3327_v13  ;;  %v1384_v59 = vpack.c.bf16 %v1354_v14, %v3324_v10  ;;  %v1383_v61 = vpack.c.bf16 %v1354_v14, %v1350_v53 }
 0x325   : > { %1404 = vrot.lane.b32.xlu0 %v1381_v52, %s3524_s5 }
 0x326   : > { %v1362_v17 = vsel %vm1361_vm1, %v3328_v7, %v3329_v55 }
 0x327   : > { %v3337_v8 = vpop.permute.xlu1 %3336  ;;  %v3332_v62 = vpop.permute.xlu0 %3331 }
 0x328   : > { %v3339_v0 = vunpack.i.h.bf16 %v3337_v8  ;;  %v3338_v60 = vunpack.i.l.bf16 %v3337_v8  ;;  %v3334_v63 = vunpack.i.h.bf16 %v3332_v62  ;;  %v3333_v5 = vunpack.i.l.bf16 %v3332_v62  ;;  %1410 = vrot.lane.b32.xlu1 %v1384_v59, %s3524_s5 }
 0x329   : > { %1408 = vrot.lane.b32.xlu0 %v1383_v61, %s3524_s5 }
 0x32a   : > { %v1385_v12 = vpack.c.bf16 %v3333_v5, %v3328_v7  ;;  %v1370_v18 = vsel %vm1369_vm2, %v3333_v5, %v3334_v63  ;;  %v1378_v20 = vsel %vm1377_vm3, %v3338_v60, %v3339_v0  ;;  %v1387_v54 = vpack.c.bf16 %v3338_v60, %v3338_v60 }
 0x32b   : > { %v1386_v11 = vpack.c.bf16 %v1370_v18, %v1362_v17  ;;  %v1388_v21 = vpack.c.bf16 %v1378_v20, %v1378_v20 }
 0x32d   : > { %1414 = vrot.lane.b32.xlu1 %v1386_v11, %s3524_s5  ;;  %1412 = vrot.lane.b32.xlu0 %v1385_v12, %s3524_s5 }
 0x331   : > { %1418 = vrot.lane.b32.xlu1 %v1388_v21, %s3524_s5  ;;  %1416 = vrot.lane.b32.xlu0 %v1387_v54, %s3524_s5 }
 0x335   : > { %1393 = vperm.xlu0 %3306, %v1390_v58   ;;  %1480 = vperm.xlu1 %3340, %v1477_v25  }
 0x339   : > { %1599 = vperm.xlu1 %3340, %v1596_v26   ;;  %3341 = vset.pattern.permute.xlu0 %v3508_v2 }
 0x33a   : > { %1590 = vperm.xlu0 %3341, %v1477_v25  }
 0x33d   : > { %1659 = vperm.xlu1 %3340, %v1656_v28  }
 0x33e   : > { %1981 = vperm.xlu0 %3341, %v1656_v28  }
 0x342   : > { %3367 = vset.pattern.permute.xlu0 %v3507_v1 }
 0x396   : > { %v1407_v30 = vpop.permute.xlu1 %1406 }
 0x397   : > { %v1405_v6 = vpop.permute.xlu0 %1404 }
 0x398   : > { %v1421_v23 = vsel %vm1420_vm4, %v1405_v6, %v1407_v30 }
 0x399   : > { %3142 = vmatpush3.bf16.msra.mxu1 %v1421_v23 }
 0x39a   : > { %v1411_v27 = vpop.permute.xlu1 %1410  ;;  %3143 = vmatprep.subr.bf16.mxu1 %v3509_v4 }
 0x39b   : > { %v1409_v19 = vpop.permute.xlu0 %1408 }
 0x39c   : > { %v1422_v32 = vsel %vm1420_vm4, %v1409_v19, %v1411_v27 }
 0x39d   : > { %3144 = vmatpush3.bf16.msra.mxu1 %v1422_v32 }
 0x39e   : > { %3145 = vmatprep.subr.bf16.mxu1 %v3509_v4 }
 0x39f   : > { %v1415_v22 = vpop.permute.xlu1 %1414  ;;  %v1413_v24 = vpop.permute.xlu0 %1412 }
 0x3a0   : > { %v1423_v34 = vsel %vm1420_vm4, %v1413_v24, %v1415_v22 }
 0x3a1   : > { %3146 = vmatpush3.bf16.msra.mxu1 %v1423_v34 }
 0x3a2   : > { %3147 = vmatprep.subr.bf16.mxu1 %v3509_v4 }
 0x3a3   : > { %v1419_v36 = vpop.permute.xlu1 %1418  ;;  %v1417_v38 = vpop.permute.xlu0 %1416 }
 0x3a4   : > { %v1424_v40 = vsel %vm1420_vm4, %v1417_v38, %v1419_v36 }
 0x3a5   : > { %v1434_v41 = vsel %vm1432_vm5, %v1424_v40, 0 }
 0x3a6   : > { %3148 = vmatpush3.bf16.msra.mxu1 %v1434_v41 }
 0x3a7   : > { %3171 = vmatprep.subr.bf16.mxu1 %v3509_v4 }
 0x3a9   : > { %3150 = vmatmul.mubr.msk.bf16.vlgmr.msra.gmra.mrb[0].mxu1 %vm1428_vm6, %v1389_v42 }
 0x3aa   : > { %3173 = vmatprep.mubr.msk.bf16.mxu1 %vm3516_vm10, %v3509_v4 }
 0x3b4   : > { %v1394_v44 = vpop.permute.xlu0 %1393  ;;  %v1481_v43 = vpop.permute.xlu1 %1480 }
 0x47c   : > { %v1470_v45 = vpop.f32.mrb[0].mxu1 }
 0x47d   : > { %v3967_v48 = vadd.f32 %v1470_v45, %v1394_v44  ;;  %v3151_v49 = vpop.f32.mrb[1].mxu1 }
 0x47e   : > { %v1473_v56 = vpop.f32.mrb[2].mxu1 }
 0x47f   : > { %v3970_v16 = vmul.f32 %v1481_v43, %v3967_v48  ;;  %v3152_v47 = vpop.f32.mrb[3].mxu1 }
 0x481   : > { %v1487_v10 = vand.u32 2139095040, %v3970_v16  ;;  %v1484_v31 = vand.u32 2147483647, %v3970_v16  ;;  %vm1486_vm0 = vcmp.lt.s32.totalorder %v3970_v16, 0 }
 0x483   : > { %v1488_v9 = vshrl.u32 %v1487_v10, 23  ;;  %v1491_v51 = vand.u32 8388607, %v1484_v31  ;;  %vm1485_vm1 = vcmp.le.f32.partialorder %v1484_v31, 0.7853982 }
 0x485   : > { %v3063_v50 = vadd.s32 4294967169, %v1488_v9  ;;  %v1492_v14 = vor.u32 8388608, %v1491_v51 }
 0x487   : > { %v1494_v15 = vadd.s32 1, %v3063_v50  ;;  %v1532_v61 = vshll.u32 %v1492_v14, 8 }
 0x489   : > { %vm1495_vm8 = vcmp.gt.s32.totalorder %v1494_v15, 0 }
 0x48a   : > { %v1496_v13 = vsel %vm1495_vm8, %v1494_v15, 0 }
 0x48b   : > { %v1498_v52 = vand.u32 31, %v1496_v13  ;;  %v1497_v53 = vshrl.u32 %v1496_v13, 5 }
 0x48d   : > { %v1499_v55 = vsub.s32 32, %v1498_v52  ;;  %v1510_v7 = vshll.u32 %v3513_v37, %v1498_v52  ;;  %v1513_v59 = vshll.u32 %v3514_v39, %v1498_v52  ;;  %v1501_v0 = vshll.u32 %v3510_v29, %v1498_v52 }
 0x48e   : > { %v1504_v63 = vshll.u32 %v3511_v33, %v1498_v52  ;;  %v1507_v12 = vshll.u32 %v3512_v35, %v1498_v52  ;;  %vm1519_vm9 = vcmp.lt.s32.totalorder %v1497_v53, 4  ;;  %vm1516_vm11 = vcmp.lt.s32.totalorder %v1497_v53, 1 }
 0x48f   : > { %v1511_v8 = vshrl.u32 %v3514_v39, %v1499_v55  ;;  %v1514_v62 = vshrl.u32 %v3515_v46, %v1499_v55  ;;  %v1502_v60 = vshrl.u32 %v3511_v33, %v1499_v55  ;;  %v1505_v5 = vshrl.u32 %v3512_v35, %v1499_v55 }
 0x490   : > { %v1508_v17 = vshrl.u32 %v3513_v37, %v1499_v55  ;;  %v1500_v54 = vshrl.u32 %v3510_v29, %v1499_v55  ;;  %vm1517_vm12 = vcmp.lt.s32.totalorder %v1497_v53, 2  ;;  %vm1518_vm13 = vcmp.lt.s32.totalorder %v1497_v53, 3 }
 0x491   : > { %v1512_v18 = vor.u32 %v1511_v8, %v1510_v7  ;;  %v1515_v11 = vor.u32 %v1514_v62, %v1513_v59  ;;  %v1503_v20 = vor.u32 %v1502_v60, %v1501_v0  ;;  %v1506_v21 = vor.u32 %v1505_v5, %v1504_v63 }
 0x492   : > { %v1509_v58 = vor.u32 %v1508_v17, %v1507_v12 }
 0x493   : > { %v1525_v25 = vsel %vm1519_vm9, %v1512_v18, 920167782  ;;  %v1529_v26 = vsel %vm1519_vm9, %v1515_v11, 1326507024  ;;  %v1524_v30 = vsel %vm1516_vm11, %v1503_v20, %v1506_v21  ;;  %v1520_v27 = vsel %vm1516_vm11, %v1500_v54, %v1503_v20 }
 0x494   : > { %v1521_v28 = vsel %vm1519_vm9, %v1509_v58, 2102212464  ;;  %v1526_v6 = vsel %vm1518_vm13, %v1509_v58, %v1525_v25  ;;  %v1528_v23 = vsel %vm1516_vm11, %v1506_v21, %v1509_v58  ;;  %v1530_v22 = vsel %vm1518_vm13, %v1512_v18, %v1529_v26 }
 0x495   : > { %v1522_v19 = vsel %vm1518_vm13, %v1506_v21, %v1521_v28  ;;  %v1527_v32 = vsel %vm1517_vm12, %v1524_v30, %v1526_v6  ;;  %v1531_v24 = vsel %vm1517_vm12, %v1528_v23, %v1530_v22  ;;  %vm1576_vm9 = vweird.f32 %v3970_v16 }
 0x496   : > { %v3987_v34 = vmul.u32.u64.low %v1532_v61, %v1527_v32  ;;  %v3988_v36 = vmul.u32.u64.high %v1532_v61, %v1527_v32, %v3987_v34  ;;  %v3990_v38 = vmul.u32.u64.low %v1532_v61, %v1531_v24  ;;  %v3991_v40 = vmul.u32.u64.high %v1532_v61, %v1531_v24, %v3990_v38 }
 0x497   : > { %v1523_v41 = vsel %vm1517_vm12, %v1520_v27, %v1522_v19  ;;  %v1591_v19 = vpop.permute.xlu0 %1590  ;;  %vm1602_vm11 = vcmask 64512  }
 0x498   : > { %v1542_v42 = vadd.s32 1, %v3988_v36  ;;  %v1539_v44 = vmul.u32 %v1532_v61, %v1523_v41  ;;  %vm1541_vm14 = vc.u32 %v3991_v40, %v3987_v34  ;;  %v1540_v14 = vadd.s32 %v3987_v34, %v3991_v40 }
 0x49a   : > { %v1543_v45 = vsel %vm1541_vm14, %v1542_v42, %v3988_v36  ;;  %v1476_v36 = vld [vmem:[%s4441_s8] sm:$0xf] }
 0x49b   : > { %v1544_v49 = vadd.s32 %v1543_v45, %v1539_v44 }
 0x49d   : > { %v1545_v43 = vadd.s32 536870912, %v1544_v49 }
 0x49f   : > { %v1546_v56 = vshrl.u32 %v1545_v43, 30 }
 0x4a1   : > { %v1547_v47 = vshll.u32 %v1546_v56, 30  ;;  %v1570_v5 = vsub.s32 4, %v1546_v56 }
 0x4a3   : > { %v1548_v10 = vsub.s32 %v1544_v49, %v1547_v47  ;;  %v1571_v18 = vsel %vm1486_vm0, %v1570_v5, %v1546_v56 }
 0x4a4   : > { %v1573_v20 = vsel %vm1485_vm1, 0, %v1571_v18 }
 0x4a5   : > { %v1550_v9 = vsub.s32 0, %v1548_v10  ;;  %v1577_v54 = vadd.s32 3, %v1573_v20 }
 0x4a7   : > { %v3064_v50 = vmin.u32 %v1550_v9, %v1548_v10  ;;  %v1578_v21 = vand.u32 3, %v1577_v54 }
 0x4a9   : > { %v1552_v51 = vclz %v3064_v50  ;;  %vm1583_vm2 = vcmp.eq.s32.totalorder %v1578_v21, 2  ;;  %vm1580_vm4 = vcmp.eq.s32.totalorder %v1578_v21, 0  ;;  %vm1579_vm8 = vcmp.lt.s32.totalorder %v1578_v21, 2 }
 0x4ab   : > { %v3065_v15 = vadd.s32 4294967294, %v1552_v51 }
 0x4ad   : > { %vm3066_vm15 = vcmp.lt.s32.totalorder %v3065_v15, 0 }
 0x4ae   : > { %v1555_v13 = vsel %vm3066_vm15, 0, %v3065_v15 }
 0x4af   : > { %v1556_v52 = vsub.s32 32, %v1555_v13  ;;  %v1560_v53 = vsub.s32 4294967266, %v1555_v13  ;;  %v1557_v55 = vshll.u32 %v1548_v10, %v1555_v13 }
 0x4b1   : > { %v1558_v7 = vshrl.u32 %v1540_v14, %v1556_v52  ;;  %v1561_v59 = vadd.s32 127, %v1560_v53 }
 0x4b3   : > { %v1559_v61 = vor.u32 %v1558_v7, %v1557_v55  ;;  %v1562_v8 = vshll.u32 %v1561_v59, 23 }
 0x4b5   : > { %v1563_v62 = vor.u32 4788187, %v1562_v8  ;;  %v1566_v60 = vcvt.s32.f32 %v1559_v61 }
 0x4b7   : > { %v1564_v0 = vand.u32 2147483647, %v1563_v62 }
 0x4b9   : > { %v1567_v63 = vmul.f32 %v1566_v60, %v1564_v0 }
 0x4bb   : > { %v1568_v12 = vxor.u32 2147483648, %v1567_v63 }
 0x4bd   : > { %v1569_v17 = vsel %vm1486_vm0, %v1568_v12, %v1567_v63 }
 0x4be   : > { %v1572_v11 = vsel %vm1485_vm1, %v3970_v16, %v1569_v17  ;;  %v1600_v16 = vpop.permute.xlu1 %1599 }
 0x4bf   : > { %3415 = vcosq.f32 %v1572_v11 }
 0x4c0   : > { %3417 = vsinq.f32 %v1572_v11 }
 0x4c2   : > { %v4011_v38 = vpop.permute.xlu1 %1659 }
 0x4c9   : > { %v3416_v58 = vpop.eup %3415 }
 0x4ca   : > { %v3418_v25 = vpop.eup %3417  ;;  %v1584_v26 = vxor.u32 2147483648, %v3416_v58 }
 0x4cb   : > { %v1581_v28 = vxor.u32 2147483648, %v3418_v25 }
 0x4cc   : > { %v1585_v30 = vsel %vm1583_vm2, %v1584_v26, %v3418_v25 }
 0x4cd   : > { %v1582_v6 = vsel %vm1580_vm4, %v3416_v58, %v1581_v28 }
 0x4ce   : > { %v1586_v31 = vsel %vm1579_vm8, %v1582_v6, %v1585_v30 }
 0x4cf   : > { %v1587_v23 = vsel %vm1576_vm9, nan, %v1586_v31 }
 0x4d0   : > { %v1588_v27 = vmul.f32 %v1587_v23, %v1587_v23 }
 0x4d2   : > { %v1593_v32 = vmul.f32 %v1591_v19, %v1588_v27 }
 0x4d4   : > { %v1594_v22 = vadd.f32 %v1593_v32, %v3967_v48  ;;  %v4014_v48 = vmul.f32 0.0, %v4011_v38 }
 0x4d6   : > { %v1595_v24 = vpack.c.bf16 %v1594_v22, %v1594_v22  ;;  %v1668_v40 = vand.u32 2139095040, %v4014_v48  ;;  %v1665_v10 = vand.u32 2147483647, %v4014_v48 }
 0x4d8   : > { %v1607_v34 = vsel %vm1432_vm5, %v1595_v24, 0  ;;  %v1669_v41 = vshrl.u32 %v1668_v40, 23  ;;  %v1672_v59 = vand.u32 8388607, %v1665_v10 }
 0x4d9   : > { %3154 = vmatpush3.bf16.msra.mxu0 %v1607_v34 }
 0x4da   : > { %3159 = vmatprep.subr.bf16.mxu0 %v3509_v4  ;;  %v3068_v42 = vadd.s32 4294967169, %v1669_v41  ;;  %v1673_v63 = vor.u32 8388608, %v1672_v59 }
 0x4dc   : > { %3156 = vmatmul.mubr.msk.bf16.vlgmr.msra.gmra.mrb[4].mxu0 %vm1602_vm11, %v1476_v36  ;;  %v1675_v44 = vadd.s32 1, %v3068_v42  ;;  %v1713_v20 = vshll.u32 %v1673_v63, 8 }
 0x4dd   : > { %3167 = vmatprep.mubr.msk.bf16.mxu0 %vm3516_vm10, %v3509_v4 }
 0x4de   : > { %vm1676_vm12 = vcmp.gt.s32.totalorder %v1675_v44, 0 }
 0x4df   : > { %v1677_v45 = vsel %vm1676_vm12, %v1675_v44, 0 }
 0x4e0   : > { %v1679_v49 = vand.u32 31, %v1677_v45  ;;  %v1678_v9 = vshrl.u32 %v1677_v45, 5 }
 0x4e2   : > { %v1680_v43 = vsub.s32 32, %v1679_v49  ;;  %v1691_v56 = vshll.u32 %v3513_v37, %v1679_v49  ;;  %v1694_v50 = vshll.u32 %v3514_v39, %v1679_v49  ;;  %v1682_v15 = vshll.u32 %v3510_v29, %v1679_v49 }
 0x4e3   : > { %v1685_v13 = vshll.u32 %v3511_v33, %v1679_v49  ;;  %v1688_v53 = vshll.u32 %v3512_v35, %v1679_v49  ;;  %vm1700_vm13 = vcmp.lt.s32.totalorder %v1678_v9, 4  ;;  %vm1697_vm14 = vcmp.lt.s32.totalorder %v1678_v9, 1 }
 0x4e4   : > { %v1692_v47 = vshrl.u32 %v3514_v39, %v1680_v43  ;;  %v1695_v51 = vshrl.u32 %v3515_v46, %v1680_v43  ;;  %v1683_v14 = vshrl.u32 %v3511_v33, %v1680_v43  ;;  %v1686_v52 = vshrl.u32 %v3512_v35, %v1680_v43 }
 0x4e5   : > { %v1689_v55 = vshrl.u32 %v3513_v37, %v1680_v43  ;;  %vm1699_vm15 = vcmp.lt.s32.totalorder %v1678_v9, 3  ;;  %vm1698_vm0 = vcmp.lt.s32.totalorder %v1678_v9, 2  ;;  %v1681_v26 = vshrl.u32 %v3510_v29, %v1680_v43 }
 0x4e6   : > { %v1693_v7 = vor.u32 %v1692_v47, %v1691_v56  ;;  %v1696_v61 = vor.u32 %v1695_v51, %v1694_v50  ;;  %v1684_v8 = vor.u32 %v1683_v14, %v1682_v15  ;;  %v1687_v62 = vor.u32 %v1686_v52, %v1685_v13 }
 0x4e7   : > { %v1690_v0 = vor.u32 %v1689_v55, %v1688_v53 }
 0x4e8   : > { %v1706_v60 = vsel %vm1700_vm13, %v1693_v7, 920167782  ;;  %v1710_v5 = vsel %vm1700_vm13, %v1696_v61, 1326507024  ;;  %v1705_v12 = vsel %vm1697_vm14, %v1684_v8, %v1687_v62  ;;  %v1701_v31 = vsel %vm1697_vm14, %v1681_v26, %v1684_v8 }
 0x4e9   : > { %v1707_v17 = vsel %vm1699_vm15, %v1690_v0, %v1706_v60  ;;  %v1709_v18 = vsel %vm1697_vm14, %v1687_v62, %v1690_v0  ;;  %v1711_v11 = vsel %vm1699_vm15, %v1693_v7, %v1710_v5  ;;  %v1702_v6 = vsel %vm1700_vm13, %v1690_v0, 2102212464 }
 0x4ea   : > { %v1708_v54 = vsel %vm1698_vm0, %v1705_v12, %v1707_v17  ;;  %v1712_v21 = vsel %vm1698_vm0, %v1709_v18, %v1711_v11  ;;  %v1703_v23 = vsel %vm1699_vm15, %v1687_v62, %v1702_v6  ;;  %vm1667_vm15 = vcmp.lt.s32.totalorder %v4014_v48, 0 }
 0x4eb   : > { %v4038_v58 = vmul.u32.u64.low %v1713_v20, %v1708_v54  ;;  %v4039_v25 = vmul.u32.u64.high %v1713_v20, %v1708_v54, %v4038_v58  ;;  %v4043_v28 = vmul.u32.u64.low %v1713_v20, %v1712_v21  ;;  %v4044_v30 = vmul.u32.u64.high %v1713_v20, %v1712_v21, %v4043_v28 }
 0x4ec   : > { %v1704_v27 = vsel %vm1698_vm0, %v1701_v31, %v1703_v23 }
 0x4ed   : > { %v1723_v19 = vadd.s32 1, %v4039_v25  ;;  %vm1722_vm1 = vc.u32 %v4044_v30, %v4038_v58  ;;  %v1720_v32 = vmul.u32 %v1713_v20, %v1704_v27 }
 0x4ef   : > { %v1724_v22 = vsel %vm1722_vm1, %v1723_v19, %v4039_v25  ;;  %vm4100_vm1 = vcmp.le.f32.partialorder %v1665_v10, 0.7853982 }
 0x4f0   : > { %v1725_v24 = vadd.s32 %v1724_v22, %v1720_v32 }
 0x4f2   : > { %v1726_v34 = vadd.s32 536870912, %v1725_v24 }
 0x4f4   : > { %v4054_v36 = vshrl.u32 %v1726_v34, 30 }
 0x4f6   : > { %v1728_v40 = vshll.u32 %v4054_v36, 30 }
 0x4f8   : > { %v4057_v41 = vsub.s32 %v1725_v24, %v1728_v40 }
 0x4fa   : > { %v1731_v49 = vsub.s32 0, %v4057_v41 }
 0x4fc   : > { %v3069_v50 = vmin.u32 %v1731_v49, %v4057_v41 }
 0x5af   : > { %v1643_v42 = vpop.f32.mrb[4].mxu0 }
 0x5b0   : > { %v1644_v44 = vadd.f32 %v1643_v42, %v1600_v16  ;;  %v3157_v45 = vpop.f32.mrb[5].mxu0  ;;  %v1733_v16 = vclz %v3069_v50 }
 0x5b1   : > { %v1646_v43 = vpop.f32.mrb[6].mxu0 }
 0x5b2   : > { %v1650_v56 = vsel %vm685_vm7, %v1644_v44, 0.0  ;;  %v3158_v47 = vpop.f32.mrb[7].mxu0  ;;  %v3070_v52 = vadd.s32 4294967294, %v1733_v16 }
 0x5b3   : > { %v4063_v9 = vadd.f32 %v1650_v56, %v3875_v3 }
 0x5b4   : > { %vm3071_vm4 = vcmp.lt.s32.totalorder %v3070_v52, 0 }
 0x5b5   : > { %v4068_v51 = vmul.f32 %v4011_v38, %v4063_v9  ;;  %v1736_v8 = vsel %vm3071_vm4, 0, %v3070_v52 }
 0x5b6   : > { %v1741_v31 = vsub.s32 4294967266, %v1736_v8 }
 0x5b7   : > { %v1772_v15 = vand.u32 2139095040, %v4068_v51  ;;  %v1769_v55 = vand.u32 2147483647, %v4068_v51 }
 0x5b8   : > { %v1742_v52 = vadd.s32 127, %v1741_v31 }
 0x5b9   : > { %v1773_v13 = vshrl.u32 %v1772_v15, 23  ;;  %v1776_v59 = vand.u32 8388607, %v1769_v55  ;;  %vm1770_vm4 = vcmp.le.f32.partialorder %v1769_v55, 0.7853982 }
 0x5bb   : > { %v3072_v14 = vadd.s32 4294967169, %v1773_v13  ;;  %v1777_v54 = vor.u32 8388608, %v1776_v59  ;;  %v1721_v13 = vadd.s32 %v4038_v58, %v4044_v30  ;;  %v1738_v59 = vshll.u32 %v4057_v41, %v1736_v8 }
 0x5bd   : > { %v1779_v53 = vadd.s32 1, %v3072_v14  ;;  %v1817_v42 = vshll.u32 %v1777_v54, 8  ;;  %v1737_v14 = vsub.s32 32, %v1736_v8 }
 0x5bf   : > { %vm1780_vm2 = vcmp.gt.s32.totalorder %v1779_v53, 0 }
 0x5c0   : > { %v1781_v7 = vsel %vm1780_vm2, %v1779_v53, 0  ;;  %vm1771_vm2 = vcmp.lt.s32.totalorder %v4068_v51, 0 }
 0x5c1   : > { %v1783_v3 = vand.u32 31, %v1781_v7  ;;  %v1782_v38 = vshrl.u32 %v1781_v7, 5 }
 0x5c3   : > { %v1784_v61 = vsub.s32 32, %v1783_v3  ;;  %v1786_v62 = vshll.u32 %v3510_v29, %v1783_v3  ;;  %v1789_v0 = vshll.u32 %v3511_v33, %v1783_v3  ;;  %v1792_v5 = vshll.u32 %v3512_v35, %v1783_v3 }
 0x5c4   : > { %v1795_v17 = vshll.u32 %v3513_v37, %v1783_v3  ;;  %v1798_v11 = vshll.u32 %v3514_v39, %v1783_v3  ;;  %vm1801_vm8 = vcmp.lt.s32.totalorder %v1782_v38, 1  ;;  %vm1804_vm9 = vcmp.lt.s32.totalorder %v1782_v38, 4 }
 0x5c5   : > { %v1787_v60 = vshrl.u32 %v3511_v33, %v1784_v61  ;;  %v1790_v63 = vshrl.u32 %v3512_v35, %v1784_v61  ;;  %v1793_v12 = vshrl.u32 %v3513_v37, %v1784_v61  ;;  %v1796_v18 = vshrl.u32 %v3514_v39, %v1784_v61 }
 0x5c6   : > { %v1799_v20 = vshrl.u32 %v3515_v46, %v1784_v61  ;;  %v1785_v32 = vshrl.u32 %v3510_v29, %v1784_v61  ;;  %vm1803_vm12 = vcmp.lt.s32.totalorder %v1782_v38, 3  ;;  %vm1802_vm13 = vcmp.lt.s32.totalorder %v1782_v38, 2 }
 0x5c7   : > { %v1788_v21 = vor.u32 %v1787_v60, %v1786_v62  ;;  %v1791_v25 = vor.u32 %v1790_v63, %v1789_v0  ;;  %v1794_v26 = vor.u32 %v1793_v12, %v1792_v5  ;;  %v1797_v28 = vor.u32 %v1796_v18, %v1795_v17 }
 0x5c8   : > { %v1800_v6 = vor.u32 %v1799_v20, %v1798_v11  ;;  %v1739_v61 = vshrl.u32 %v1721_v13, %v1737_v14  ;;  %v1743_v38 = vshll.u32 %v1742_v52, 23 }
 0x5c9   : > { %v1806_v23 = vsel %vm1804_vm9, %v1794_v26, 2102212464  ;;  %v1809_v27 = vsel %vm1801_vm8, %v1788_v21, %v1791_v25  ;;  %v1813_v19 = vsel %vm1801_vm8, %v1791_v25, %v1794_v26  ;;  %v1810_v22 = vsel %vm1804_vm9, %v1797_v28, 920167782 }
 0x5ca   : > { %v1814_v24 = vsel %vm1804_vm9, %v1800_v6, 1326507024  ;;  %v1811_v34 = vsel %vm1803_vm12, %v1794_v26, %v1810_v22  ;;  %v1805_v44 = vsel %vm1801_vm8, %v1785_v32, %v1788_v21  ;;  %v1807_v45 = vsel %vm1803_vm12, %v1791_v25, %v1806_v23 }
 0x5cb   : > { %v1815_v40 = vsel %vm1803_vm12, %v1797_v28, %v1814_v24  ;;  %v1812_v49 = vsel %vm1802_vm13, %v1809_v27, %v1811_v34  ;;  %v1808_v16 = vsel %vm1802_vm13, %v1805_v44, %v1807_v45  ;;  %v1740_v60 = vor.u32 %v1739_v61, %v1738_v59 }
 0x5cc   : > { %v1816_v43 = vsel %vm1802_vm13, %v1813_v19, %v1815_v40  ;;  %v4088_v50 = vmul.u32.u64.low %v1817_v42, %v1812_v49  ;;  %v4089_v15 = vmul.u32.u64.high %v1817_v42, %v1812_v49, %v4088_v50  ;;  %v1824_v7 = vmul.u32 %v1817_v42, %v1808_v16 }
 0x5cd   : > { %v4085_v56 = vmul.u32.u64.low %v1817_v42, %v1816_v43  ;;  %v4086_v47 = vmul.u32.u64.high %v1817_v42, %v1816_v43, %v4085_v56  ;;  %v1744_v63 = vor.u32 4788187, %v1743_v38  ;;  %v1747_v30 = vcvt.s32.f32 %v1740_v60 }
 0x5ce   : > { %v1827_v53 = vadd.s32 1, %v4089_v15  ;;  %v1751_v32 = vsub.s32 4, %v4054_v36  ;;  %vm1757_vm13 = vweird.f32 %v4014_v48 }
 0x5cf   : > { %vm1826_vm14 = vc.u32 %v4086_v47, %v4088_v50  ;;  %v1745_v58 = vand.u32 2147483647, %v1744_v63  ;;  %v1825_v28 = vadd.s32 %v4088_v50, %v4086_v47 }
 0x5d0   : > { %v1828_v3 = vsel %vm1826_vm14, %v1827_v53, %v4089_v15  ;;  %v1752_v40 = vsel %vm1667_vm15, %v1751_v32, %v4054_v36 }
 0x5d1   : > { %v1829_v62 = vadd.s32 %v1828_v3, %v1824_v7  ;;  %v1748_v11 = vmul.f32 %v1747_v30, %v1745_v58  ;;  %v1754_v45 = vsel %vm4100_vm1, 0, %v1752_v40 }
 0x5d2   : > { %v1758_v47 = vadd.s32 3, %v1754_v45 }
 0x5d3   : > { %v1830_v0 = vadd.s32 536870912, %v1829_v62  ;;  %v1749_v21 = vxor.u32 2147483648, %v1748_v11 }
 0x5d4   : > { %v1759_v14 = vand.u32 3, %v1758_v47 }
 0x5d5   : > { %v1831_v5 = vshrl.u32 %v1830_v0, 30  ;;  %v1750_v26 = vsel %vm1667_vm15, %v1749_v21, %v1748_v11 }
 0x5d6   : > { %v1753_v10 = vsel %vm4100_vm1, %v4014_v48, %v1750_v26  ;;  %vm1761_vm8 = vcmp.eq.s32.totalorder %v1759_v14, 0  ;;  %vm1764_vm9 = vcmp.eq.s32.totalorder %v1759_v14, 2  ;;  %vm1760_vm12 = vcmp.lt.s32.totalorder %v1759_v14, 2 }
 0x5d7   : > { %v1832_v12 = vshll.u32 %v1831_v5, 30  ;;  %3419 = vcosq.f32 %v1753_v10  ;;  %v1855_v43 = vsub.s32 4, %v1831_v5  ;;  %vm1861_vm1 = vweird.f32 %v4068_v51 }
 0x5d8   : > { %3421 = vsinq.f32 %v1753_v10 }
 0x5d9   : > { %v1833_v17 = vsub.s32 %v1829_v62, %v1832_v12  ;;  %v1856_v15 = vsel %vm1771_vm2, %v1855_v43, %v1831_v5 }
 0x5da   : > { %v1858_v52 = vsel %vm1770_vm4, 0, %v1856_v15 }
 0x5db   : > { %v1835_v18 = vsub.s32 0, %v1833_v17  ;;  %v1862_v3 = vadd.s32 3, %v1858_v52 }
 0x5dd   : > { %v3073_v20 = vmin.u32 %v1835_v18, %v1833_v17  ;;  %v1863_v38 = vand.u32 3, %v1862_v3  ;;  %v2307_v3 = vld [vmem:[%s4449_s16] sm:$0xff] }
 0x5df   : > { %v1837_v54 = vclz %v3073_v20  ;;  %vm1868_vm14 = vcmp.eq.s32.totalorder %v1863_v38, 2  ;;  %vm1865_vm15 = vcmp.eq.s32.totalorder %v1863_v38, 0  ;;  %v1982_v20 = vpop.permute.xlu0 %1981 }
 0x5e1   : > { %v3074_v25 = vadd.s32 4294967294, %v1837_v54  ;;  %v3420_v36 = vpop.eup %3419 }
 0x5e2   : > { %v3422_v13 = vpop.eup %3421  ;;  %v1765_v7 = vxor.u32 2147483648, %v3420_v36 }
 0x5e3   : > { %vm3075_vm0 = vcmp.lt.s32.totalorder %v3074_v25, 0  ;;  %v1762_v53 = vxor.u32 2147483648, %v3422_v13 }
 0x5e4   : > { %v1840_v8 = vsel %vm3075_vm0, 0, %v3074_v25  ;;  %v1766_v61 = vsel %vm1764_vm9, %v1765_v7, %v3422_v13  ;;  %vm1864_vm0 = vcmp.lt.s32.totalorder %v1863_v38, 2  ;;  %vm2031_vm9 = vcmask 900096   ;;  %v2129_v7 = vld [vmem:[%s4446_s13] sm:$0xff] }
 0x5e5   : > { %v1841_v6 = vsub.s32 32, %v1840_v8  ;;  %v1845_v31 = vsub.s32 4294967266, %v1840_v8  ;;  %v1842_v23 = vshll.u32 %v1833_v17, %v1840_v8  ;;  %v1763_v59 = vsel %vm1761_vm8, %v3420_v36, %v1762_v53  ;;  %v2044_v53 = vld [vmem:[%s4445_s12] sm:$0xff] }
 0x5e6   : > { %v1767_v0 = vsel %vm1760_vm12, %v1763_v59, %v1766_v61  ;;  %vm2023_vm8 = vcmask 924672   ;;  %v2248_v59 = vld [vmem:[%s4448_s15] sm:$0xff] }
 0x5e7   : > { %v1843_v27 = vshrl.u32 %v1825_v28, %v1841_v6  ;;  %v1846_v19 = vadd.s32 127, %v1845_v31  ;;  %v1768_v12 = vsel %vm1757_vm13, nan, %v1767_v0 }
 0x5e8   : > { %v1977_v18 = vmul.f32 %v1768_v12, %v1768_v12 }
 0x5e9   : > { %v1844_v22 = vor.u32 %v1843_v27, %v1842_v23  ;;  %v1847_v24 = vshll.u32 %v1846_v19, 23 }
 0x5ea   : > { %v1984_v21 = vmul.f32 %v1982_v20, %v1977_v18 }
 0x5eb   : > { %v1848_v34 = vor.u32 4788187, %v1847_v24  ;;  %v1851_v44 = vcvt.s32.f32 %v1844_v22 }
 0x5ed   : > { %v1849_v42 = vand.u32 2147483647, %v1848_v34 }
 0x5ef   : > { %v1852_v49 = vmul.f32 %v1851_v44, %v1849_v42 }
 0x5f1   : > { %v1853_v56 = vxor.u32 2147483648, %v1852_v49 }
 0x5f3   : > { %v1854_v50 = vsel %vm1771_vm2, %v1853_v56, %v1852_v49  ;;  %vm1996_vm2 = vcmask 1022976  }
 0x5f4   : > { %v1857_v16 = vsel %vm1770_vm4, %v4068_v51, %v1854_v50  ;;  %vm2015_vm4 = vcmask 949248  }
 0x5f5   : > { %3423 = vcosq.f32 %v1857_v16 }
 0x5f6   : > { %3425 = vsinq.f32 %v1857_v16 }
 0x5ff   : > { %v3424_v55 = vpop.eup %3423 }
 0x600   : > { %v3426_v62 = vpop.eup %3425  ;;  %v1869_v60 = vxor.u32 2147483648, %v3424_v55 }
 0x601   : > { %v1866_v63 = vxor.u32 2147483648, %v3426_v62 }
 0x602   : > { %v1870_v5 = vsel %vm1868_vm14, %v1869_v60, %v3426_v62 }
 0x603   : > { %v1867_v58 = vsel %vm1865_vm15, %v3424_v55, %v1866_v63 }
 0x604   : > { %v1871_v30 = vsel %vm1864_vm0, %v1867_v58, %v1870_v5 }
 0x605   : > { %v1872_v17 = vsel %vm1861_vm1, nan, %v1871_v30 }
 0x606   : > { %v1978_v11 = vmul.f32 %v1872_v17, %v1872_v17 }
 0x608   : > { %v1985_v54 = vmul.f32 %v1982_v20, %v1978_v11  ;;  %v2043_v11 = vld [vmem:[%s4444_s11] sm:$0xf] }
 0x60a   : > { %v1988_v48 = vadd.f32 %v1985_v54, %v4063_v9 }
 0x60c   : > { %v3347_v25 = vpack.i.bf16 %v1988_v48, %v1984_v21  ;;  %v3352_v41 = vpack.i.bf16 %v1984_v21, %v1988_v48 }
 0x60e   : > { %3348 = vrot.lane.b32.xlu0 %v3347_v25, %s3522_s0  ;;  %3343 = vrot.lane.b32.xlu1 %v3347_v25, %s4489_s24  ;;  %s3529_s0 = smov 9   ;;  %s3532_s24 = smov 74  }
 0x612   : > { %3353 = vrot.lane.b32.xlu0 %v3352_v41, %s3525_s25  ;;  %2007 = vrot.lane.b32.xlu1 %v1988_v48, %s3526_s27  ;;  %s3533_s25 = smov 83  }
 0x616   : > { %3363 = vrot.lane.b32.xlu0 %v3352_v41, %s3527_s26  ;;  %3358 = vrot.lane.b32.xlu1 %v3352_v41, %s3528_s1  ;;  %s3105_s1 = sshll.u32 %s3672_s4, 7 }
 0x680   : > { %v3349_v51 = vpop.permute.xlu0 %3348  ;;  %v3344_v8 = vpop.permute.xlu1 %3343 }
 0x681   : > { %v3351_v26 = vunpack.i.h.bf16 %v3349_v51  ;;  %v3350_v28 = vunpack.i.l.bf16 %v3349_v51  ;;  %v3346_v6 = vunpack.i.h.bf16 %v3344_v8  ;;  %v3345_v31 = vunpack.i.l.bf16 %v3344_v8 }
 0x683   : > { %v2036_v23 = vpack.c.bf16 %v3346_v6, %v1988_v48  ;;  %v1997_v27 = vsel %vm1996_vm2, %v3345_v31, %v3346_v6  ;;  %v2004_v22 = vsel %vm1377_vm3, %v3350_v28, %v3351_v26  ;;  %vm2074_vm3 = vcmask 72704  }
 0x684   : > { %v3354_v19 = vpop.permute.xlu0 %3353  ;;  %v2008_v32 = vpop.permute.xlu1 %2007  ;;  %v2035_v10 = vpack.c.bf16 %v1997_v27, %v1984_v21 }
 0x685   : > { %2060 = vrot.lane.b32.xlu0 %v2036_v23, %s3529_s0  ;;  %v3356_v24 = vunpack.i.h.bf16 %v3354_v19  ;;  %v3355_v34 = vunpack.i.l.bf16 %v3354_v19  ;;  %v2038_v40 = vpack.c.bf16 %v2008_v32, %v3351_v26  ;;  %v2037_v42 = vpack.c.bf16 %v2008_v32, %v2004_v22 }
 0x686   : > { %2058 = vrot.lane.b32.xlu1 %v2035_v10, %s3529_s0 }
 0x687   : > { %v2016_v15 = vsel %vm2015_vm4, %v3355_v34, %v3356_v24 }
 0x688   : > { %v3364_v44 = vpop.permute.xlu0 %3363  ;;  %v3359_v45 = vpop.permute.xlu1 %3358 }
 0x689   : > { %v3366_v49 = vunpack.i.h.bf16 %v3364_v44  ;;  %v3365_v43 = vunpack.i.l.bf16 %v3364_v44  ;;  %v3361_v56 = vunpack.i.h.bf16 %v3359_v45  ;;  %v3360_v47 = vunpack.i.l.bf16 %v3359_v45  ;;  %2064 = vrot.lane.b32.xlu0 %v2038_v40, %s3529_s0 }
 0x68a   : > { %2062 = vrot.lane.b32.xlu1 %v2037_v42, %s3529_s0 }
 0x68b   : > { %v2039_v50 = vpack.c.bf16 %v3360_v47, %v3355_v34  ;;  %v2024_v16 = vsel %vm2023_vm8, %v3360_v47, %v3361_v56  ;;  %v2032_v13 = vsel %vm2031_vm9, %v3365_v43, %v3366_v49  ;;  %v2041_v14 = vpack.c.bf16 %v3365_v43, %v3365_v43 }
 0x68c   : > { %v2040_v36 = vpack.c.bf16 %v2024_v16, %v2016_v15  ;;  %v2042_v52 = vpack.c.bf16 %v2032_v13, %v2032_v13 }
 0x68e   : > { %2068 = vrot.lane.b32.xlu0 %v2040_v36, %s3529_s0  ;;  %2066 = vrot.lane.b32.xlu1 %v2039_v50, %s3529_s0 }
 0x692   : > { %2072 = vrot.lane.b32.xlu0 %v2042_v52, %s3529_s0  ;;  %2070 = vrot.lane.b32.xlu1 %v2041_v14, %s3529_s0 }
 0x696   : > { %2047 = vperm.xlu1 %3340, %v2044_v53   ;;  %2132 = vperm.xlu0 %3367, %v2129_v7  }
 0x69a   : > { %2310 = vperm.xlu0 %3367, %v2307_v3   ;;  %3368 = vset.pattern.permute.xlu1 %v3508_v2 }
 0x69b   : > { %2242 = vperm.xlu1 %3368, %v2129_v7  }
 0x69f   : > { %3369 = vset.pattern.permute.xlu1 %v3507_v1 }
 0x6a0   : > { %2251 = vperm.xlu1 %3369, %v2248_v59  }
 0x6a4   : > { %3370 = vset.pattern.permute.xlu1 %v3508_v2 }
 0x6a5   : > { %2632 = vperm.xlu1 %3370, %v2307_v3  }
 0x6a9   : > { %3396 = vset.pattern.permute.xlu1 %v3507_v1 }
 0x6f7   : > { %v2061_v61 = vpop.permute.xlu0 %2060 }
 0x6f8   : > { %v2059_v38 = vpop.permute.xlu1 %2058 }
 0x6f9   : > { %v2075_v55 = vsel %vm2074_vm3, %v2059_v38, %v2061_v61 }
 0x6fa   : > { %3160 = vmatpush3.bf16.msra.mxu0 %v2075_v55 }
 0x6fb   : > { %v2065_v62 = vpop.permute.xlu0 %2064  ;;  %3161 = vmatprep.subr.bf16.mxu0 %v3509_v4 }
 0x6fc   : > { %v2063_v0 = vpop.permute.xlu1 %2062 }
 0x6fd   : > { %v2076_v60 = vsel %vm2074_vm3, %v2063_v0, %v2065_v62 }
 0x6fe   : > { %3162 = vmatpush3.bf16.msra.mxu0 %v2076_v60 }
 0x6ff   : > { %3163 = vmatprep.subr.bf16.mxu0 %v3509_v4 }
 0x700   : > { %v2069_v63 = vpop.permute.xlu0 %2068  ;;  %v2067_v5 = vpop.permute.xlu1 %2066 }
 0x701   : > { %v2077_v12 = vsel %vm2074_vm3, %v2067_v5, %v2069_v63 }
 0x702   : > { %3164 = vmatpush3.bf16.msra.mxu0 %v2077_v12 }
 0x703   : > { %3165 = vmatprep.subr.bf16.mxu0 %v3509_v4 }
 0x704   : > { %v2073_v58 = vpop.permute.xlu0 %2072  ;;  %v2071_v30 = vpop.permute.xlu1 %2070 }
 0x705   : > { %v2078_v17 = vsel %vm2074_vm3, %v2071_v30, %v2073_v58 }
 0x706   : > { %v2086_v18 = vsel %vm1432_vm5, %v2078_v17, 0 }
 0x707   : > { %3166 = vmatpush3.bf16.msra.mxu0 %v2086_v18 }
 0x708   : > { %3189 = vmatprep.subr.bf16.mxu0 %v3509_v4 }
 0x70a   : > { %3168 = vmatmul.mubr.msk.bf16.vlgmr.msra.gmra.mrb[8].mxu0 %vm1428_vm6, %v2043_v11 }
 0x70b   : > { %3191 = vmatprep.mubr.msk.bf16.mxu0 %vm3516_vm10, %v3509_v4 }
 0x715   : > { %v2048_v20 = vpop.permute.xlu1 %2047  ;;  %v2133_v25 = vpop.permute.xlu0 %2132 }
 0x7dd   : > { %v2122_v54 = vpop.f32.mrb[8].mxu0 }
 0x7de   : > { %v4160_v21 = vadd.f32 %v2122_v54, %v2048_v20  ;;  %v3169_v48 = vpop.f32.mrb[9].mxu0 }
 0x7df   : > { %v2125_v41 = vpop.f32.mrb[10].mxu0 }
 0x7e0   : > { %v4163_v51 = vmul.f32 %v2133_v25, %v4160_v21  ;;  %v3170_v8 = vpop.f32.mrb[11].mxu0 }
 0x7e2   : > { %v2139_v26 = vand.u32 2139095040, %v4163_v51  ;;  %v2136_v23 = vand.u32 2147483647, %v4163_v51  ;;  %vm2138_vm4 = vcmp.lt.s32.totalorder %v4163_v51, 0 }
 0x7e4   : > { %v2140_v28 = vshrl.u32 %v2139_v26, 23  ;;  %v2143_v32 = vand.u32 8388607, %v2136_v23  ;;  %vm2137_vm8 = vcmp.le.f32.partialorder %v2136_v23, 0.7853982 }
 0x7e6   : > { %v3081_v6 = vadd.s32 4294967169, %v2140_v28  ;;  %v2144_v50 = vor.u32 8388608, %v2143_v32 }
 0x7e8   : > { %v2146_v31 = vadd.s32 1, %v3081_v6  ;;  %v2184_v62 = vshll.u32 %v2144_v50, 8 }
 0x7ea   : > { %vm2147_vm12 = vcmp.gt.s32.totalorder %v2146_v31, 0 }
 0x7eb   : > { %v2148_v27 = vsel %vm2147_vm12, %v2146_v31, 0 }
 0x7ec   : > { %v2150_v19 = vand.u32 31, %v2148_v27  ;;  %v2149_v22 = vshrl.u32 %v2148_v27, 5 }
 0x7ee   : > { %v2151_v10 = vsub.s32 32, %v2150_v19  ;;  %v2153_v24 = vshll.u32 %v3510_v29, %v2150_v19  ;;  %v2156_v34 = vshll.u32 %v3511_v33, %v2150_v19  ;;  %v2159_v44 = vshll.u32 %v3512_v35, %v2150_v19 }
 0x7ef   : > { %v2162_v49 = vshll.u32 %v3513_v37, %v2150_v19  ;;  %v2165_v56 = vshll.u32 %v3514_v39, %v2150_v19  ;;  %vm2168_vm13 = vcmp.lt.s32.totalorder %v2149_v22, 1  ;;  %vm2171_vm14 = vcmp.lt.s32.totalorder %v2149_v22, 4 }
 0x7f0   : > { %v2154_v40 = vshrl.u32 %v3511_v33, %v2151_v10  ;;  %v2157_v42 = vshrl.u32 %v3512_v35, %v2151_v10  ;;  %v2160_v45 = vshrl.u32 %v3513_v37, %v2151_v10  ;;  %v2163_v43 = vshrl.u32 %v3514_v39, %v2151_v10 }
 0x7f1   : > { %v2166_v47 = vshrl.u32 %v3515_v46, %v2151_v10  ;;  %v2152_v3 = vshrl.u32 %v3510_v29, %v2151_v10  ;;  %vm2170_vm15 = vcmp.lt.s32.totalorder %v2149_v22, 3  ;;  %vm2169_vm0 = vcmp.lt.s32.totalorder %v2149_v22, 2 }
 0x7f2   : > { %v2155_v15 = vor.u32 %v2154_v40, %v2153_v24  ;;  %v2158_v16 = vor.u32 %v2157_v42, %v2156_v34  ;;  %v2161_v36 = vor.u32 %v2160_v45, %v2159_v44  ;;  %v2164_v13 = vor.u32 %v2163_v43, %v2162_v49 }
 0x7f3   : > { %v2167_v14 = vor.u32 %v2166_v47, %v2165_v56 }
 0x7f4   : > { %v2173_v52 = vsel %vm2171_vm14, %v2161_v36, 2102212464  ;;  %v2176_v53 = vsel %vm2168_vm13, %v2155_v15, %v2158_v16  ;;  %v2180_v7 = vsel %vm2168_vm13, %v2158_v16, %v2161_v36  ;;  %v2177_v59 = vsel %vm2171_vm14, %v2164_v13, 920167782 }
 0x7f5   : > { %v2181_v61 = vsel %vm2171_vm14, %v2167_v14, 1326507024  ;;  %v2178_v38 = vsel %vm2170_vm15, %v2161_v36, %v2177_v59  ;;  %v2172_v0 = vsel %vm2168_vm13, %v2152_v3, %v2155_v15  ;;  %v2174_v60 = vsel %vm2170_vm15, %v2158_v16, %v2173_v52 }
 0x7f6   : > { %v2182_v55 = vsel %vm2170_vm15, %v2164_v13, %v2181_v61  ;;  %v2179_v63 = vsel %vm2169_vm0, %v2176_v53, %v2178_v38  ;;  %v2175_v18 = vsel %vm2169_vm0, %v2172_v0, %v2174_v60  ;;  %vm2228_vm14 = vweird.f32 %v4163_v51  ;;  %v2243_v0 = vpop.permute.xlu1 %2242 }
 0x7f7   : > { %v2183_v5 = vsel %vm2169_vm0, %v2180_v7, %v2182_v55  ;;  %v4183_v30 = vmul.u32.u64.low %v2184_v62, %v2179_v63  ;;  %v4184_v17 = vmul.u32.u64.high %v2184_v62, %v2179_v63, %v4183_v30  ;;  %v2191_v20 = vmul.u32 %v2184_v62, %v2175_v18 }
 0x7f8   : > { %v4180_v12 = vmul.u32.u64.low %v2184_v62, %v2183_v5  ;;  %v4181_v58 = vmul.u32.u64.high %v2184_v62, %v2183_v5, %v4180_v12 }
 0x7f9   : > { %v2194_v11 = vadd.s32 1, %v4184_v17 }
 0x7fa   : > { %vm2193_vm1 = vc.u32 %v4181_v58, %v4183_v30  ;;  %v2192_v32 = vadd.s32 %v4183_v30, %v4181_v58  ;;  %v2128_v58 = vld [vmem:[%s4447_s14] sm:$0xf] }
 0x7fb   : > { %v2195_v54 = vsel %vm2193_vm1, %v2194_v11, %v4184_v17 }
 0x7fc   : > { %v2196_v48 = vadd.s32 %v2195_v54, %v2191_v20 }
 0x7fe   : > { %v2197_v25 = vadd.s32 536870912, %v2196_v48 }
 0x800   : > { %v2198_v41 = vshrl.u32 %v2197_v25, 30 }
 0x802   : > { %v2199_v8 = vshll.u32 %v2198_v41, 30  ;;  %v2222_v47 = vsub.s32 4, %v2198_v41 }
 0x804   : > { %v2200_v26 = vsub.s32 %v2196_v48, %v2199_v8  ;;  %v2223_v16 = vsel %vm2138_vm4, %v2222_v47, %v2198_v41 }
 0x805   : > { %v2225_v13 = vsel %vm2137_vm8, 0, %v2223_v16 }
 0x806   : > { %v2202_v28 = vsub.s32 0, %v2200_v26  ;;  %v2229_v14 = vadd.s32 3, %v2225_v13 }
 0x808   : > { %v3082_v6 = vmin.u32 %v2202_v28, %v2200_v26  ;;  %v2230_v52 = vand.u32 3, %v2229_v14 }
 0x80a   : > { %v2204_v31 = vclz %v3082_v6  ;;  %vm2235_vm3 = vcmp.eq.s32.totalorder %v2230_v52, 2  ;;  %vm2232_vm12 = vcmp.eq.s32.totalorder %v2230_v52, 0  ;;  %vm2231_vm13 = vcmp.lt.s32.totalorder %v2230_v52, 2 }
 0x80c   : > { %v3083_v27 = vadd.s32 4294967294, %v2204_v31 }
 0x80e   : > { %vm3084_vm2 = vcmp.lt.s32.totalorder %v3083_v27, 0 }
 0x80f   : > { %v2207_v19 = vsel %vm3084_vm2, 0, %v3083_v27 }
 0x810   : > { %v2208_v10 = vsub.s32 32, %v2207_v19  ;;  %v2212_v22 = vsub.s32 4294967266, %v2207_v19  ;;  %v2209_v24 = vshll.u32 %v2200_v26, %v2207_v19 }
 0x812   : > { %v2210_v34 = vshrl.u32 %v2192_v32, %v2208_v10  ;;  %v2213_v40 = vadd.s32 127, %v2212_v22 }
 0x814   : > { %v2211_v42 = vor.u32 %v2210_v34, %v2209_v24  ;;  %v2214_v44 = vshll.u32 %v2213_v40, 23 }
 0x816   : > { %v2215_v45 = vor.u32 4788187, %v2214_v44  ;;  %v2218_v43 = vcvt.s32.f32 %v2211_v42 }
 0x818   : > { %v2216_v49 = vand.u32 2147483647, %v2215_v45 }
 0x81a   : > { %v2219_v56 = vmul.f32 %v2218_v43, %v2216_v49 }
 0x81c   : > { %v2220_v50 = vxor.u32 2147483648, %v2219_v56 }
 0x81e   : > { %v2221_v15 = vsel %vm2138_vm4, %v2220_v50, %v2219_v56 }
 0x81f   : > { %v2224_v36 = vsel %vm2137_vm8, %v4163_v51, %v2221_v15  ;;  %v4204_v51 = vpop.permute.xlu0 %2310 }
 0x820   : > { %3427 = vcosq.f32 %v2224_v36  ;;  %v4207_v30 = vmul.f32 0.0, %v4204_v51 }
 0x821   : > { %3429 = vsinq.f32 %v2224_v36 }
 0x822   : > { %v2316_v8 = vand.u32 2147483647, %v4207_v30 }
 0x824   : > { %v2323_v34 = vand.u32 8388607, %v2316_v8 }
 0x826   : > { %v2324_v43 = vor.u32 8388608, %v2323_v34 }
 0x828   : > { %v2364_v36 = vshll.u32 %v2324_v43, 8 }
 0x82a   : > { %v3428_v53 = vpop.eup %3427 }
 0x82b   : > { %v3430_v7 = vpop.eup %3429  ;;  %v2236_v3 = vxor.u32 2147483648, %v3428_v53 }
 0x82c   : > { %v2233_v59 = vxor.u32 2147483648, %v3430_v7 }
 0x82d   : > { %v2237_v61 = vsel %vm2235_vm3, %v2236_v3, %v3430_v7 }
 0x82e   : > { %v2234_v38 = vsel %vm2232_vm12, %v3428_v53, %v2233_v59 }
 0x82f   : > { %v2238_v23 = vsel %vm2231_vm13, %v2234_v38, %v2237_v61 }
 0x830   : > { %v2239_v55 = vsel %vm2228_vm14, nan, %v2238_v23 }
 0x831   : > { %v2240_v62 = vmul.f32 %v2239_v55, %v2239_v55 }
 0x833   : > { %v2245_v60 = vmul.f32 %v2243_v0, %v2240_v62 }
 0x835   : > { %v2246_v63 = vadd.f32 %v2245_v60, %v4160_v21  ;;  %v2319_v21 = vand.u32 2139095040, %v4207_v30 }
 0x837   : > { %v2247_v5 = vpack.c.bf16 %v2246_v63, %v2246_v63  ;;  %v2320_v17 = vshrl.u32 %v2319_v21, 23 }
 0x839   : > { %v2258_v12 = vsel %vm1432_vm5, %v2247_v5, 0  ;;  %v3086_v18 = vadd.s32 4294967169, %v2320_v17  ;;  %v2252_v17 = vpop.permute.xlu1 %2251 }
 0x83a   : > { %3172 = vmatpush3.bf16.msra.mxu1 %v2258_v12 }
 0x83b   : > { %3177 = vmatprep.subr.bf16.mxu1 %v3509_v4  ;;  %v2326_v11 = vadd.s32 1, %v3086_v18 }
 0x83d   : > { %3174 = vmatmul.mubr.msk.bf16.vlgmr.msra.gmra.mrb[4].mxu1 %vm1602_vm11, %v2128_v58  ;;  %vm2327_vm15 = vcmp.gt.s32.totalorder %v2326_v11, 0 }
 0x83e   : > { %3185 = vmatprep.mubr.msk.bf16.mxu1 %vm3516_vm10, %v3509_v4  ;;  %v2328_v20 = vsel %vm2327_vm15, %v2326_v11, 0 }
 0x83f   : > { %v2330_v54 = vand.u32 31, %v2328_v20  ;;  %v2329_v26 = vshrl.u32 %v2328_v20, 5 }
 0x841   : > { %v2331_v48 = vsub.s32 32, %v2330_v54  ;;  %v2342_v25 = vshll.u32 %v3513_v37, %v2330_v54  ;;  %v2345_v28 = vshll.u32 %v3514_v39, %v2330_v54  ;;  %v2333_v31 = vshll.u32 %v3510_v29, %v2330_v54 }
 0x842   : > { %v2336_v27 = vshll.u32 %v3511_v33, %v2330_v54  ;;  %v2339_v10 = vshll.u32 %v3512_v35, %v2330_v54  ;;  %vm2351_vm10 = vcmp.lt.s32.totalorder %v2329_v26, 4  ;;  %vm2348_vm0 = vcmp.lt.s32.totalorder %v2329_v26, 1 }
 0x843   : > { %v2343_v41 = vshrl.u32 %v3514_v39, %v2331_v48  ;;  %v2346_v6 = vshrl.u32 %v3515_v46, %v2331_v48  ;;  %v2334_v19 = vshrl.u32 %v3511_v33, %v2331_v48  ;;  %v2337_v32 = vshrl.u32 %v3512_v35, %v2331_v48 }
 0x844   : > { %v2340_v22 = vshrl.u32 %v3513_v37, %v2331_v48  ;;  %vm2350_vm1 = vcmp.lt.s32.totalorder %v2329_v26, 3  ;;  %vm2349_vm2 = vcmp.lt.s32.totalorder %v2329_v26, 2  ;;  %v2332_v7 = vshrl.u32 %v3510_v29, %v2331_v48 }
 0x845   : > { %v2344_v24 = vor.u32 %v2343_v41, %v2342_v25  ;;  %v2347_v40 = vor.u32 %v2346_v6, %v2345_v28  ;;  %v2335_v42 = vor.u32 %v2334_v19, %v2333_v31  ;;  %v2338_v44 = vor.u32 %v2337_v32, %v2336_v27 }
 0x846   : > { %v2341_v45 = vor.u32 %v2340_v22, %v2339_v10 }
 0x847   : > { %v2357_v49 = vsel %vm2351_vm10, %v2344_v24, 920167782  ;;  %v2361_v56 = vsel %vm2351_vm10, %v2347_v40, 1326507024  ;;  %v2356_v47 = vsel %vm2348_vm0, %v2335_v42, %v2338_v44  ;;  %v2352_v38 = vsel %vm2348_vm0, %v2332_v7, %v2335_v42 }
 0x848   : > { %v2358_v50 = vsel %vm2350_vm1, %v2341_v45, %v2357_v49  ;;  %v2360_v15 = vsel %vm2348_vm0, %v2338_v44, %v2341_v45  ;;  %v2362_v16 = vsel %vm2350_vm1, %v2344_v24, %v2361_v56  ;;  %v2353_v61 = vsel %vm2351_vm10, %v2341_v45, 2102212464 }
 0x849   : > { %v2359_v13 = vsel %vm2349_vm2, %v2356_v47, %v2358_v50  ;;  %v2363_v14 = vsel %vm2349_vm2, %v2360_v15, %v2362_v16  ;;  %v2354_v23 = vsel %vm2350_vm1, %v2338_v44, %v2353_v61  ;;  %vm2318_vm0 = vcmp.lt.s32.totalorder %v4207_v30, 0 }
 0x84a   : > { %v4231_v52 = vmul.u32.u64.low %v2364_v36, %v2359_v13  ;;  %v4232_v53 = vmul.u32.u64.high %v2364_v36, %v2359_v13, %v4231_v52  ;;  %v4236_v3 = vmul.u32.u64.low %v2364_v36, %v2363_v14  ;;  %v4237_v59 = vmul.u32.u64.high %v2364_v36, %v2363_v14, %v4236_v3 }
 0x84b   : > { %v2355_v55 = vsel %vm2349_vm2, %v2352_v38, %v2354_v23  ;;  %vm4293_vm2 = vcmp.le.f32.partialorder %v2316_v8, 0.7853982 }
 0x84c   : > { %v2374_v62 = vadd.s32 1, %v4232_v53  ;;  %vm2373_vm4 = vc.u32 %v4237_v59, %v4231_v52  ;;  %v2371_v0 = vmul.u32 %v2364_v36, %v2355_v55 }
 0x84e   : > { %v2375_v60 = vsel %vm2373_vm4, %v2374_v62, %v4232_v53 }
 0x84f   : > { %v2376_v63 = vadd.s32 %v2375_v60, %v2371_v0 }
 0x851   : > { %v2377_v5 = vadd.s32 536870912, %v2376_v63 }
 0x853   : > { %v4247_v12 = vshrl.u32 %v2377_v5, 30 }
 0x855   : > { %v2379_v58 = vshll.u32 %v4247_v12, 30 }
 0x857   : > { %v4250_v21 = vsub.s32 %v2376_v63, %v2379_v58 }
 0x859   : > { %v2382_v54 = vsub.s32 0, %v4250_v21 }
 0x85b   : > { %v3087_v28 = vmin.u32 %v2382_v54, %v4250_v21 }
 0x85d   : > { %v2384_v27 = vclz %v3087_v28 }
 0x85f   : > { %v3088_v10 = vadd.s32 4294967294, %v2384_v27 }
 0x861   : > { %vm3089_vm3 = vcmp.lt.s32.totalorder %v3088_v10, 0 }
 0x862   : > { %v2387_v44 = vsel %vm3089_vm3, 0, %v3088_v10 }
 0x863   : > { %v2392_v23 = vsub.s32 4294967266, %v2387_v44 }
 0x865   : > { %v2393_v10 = vadd.s32 127, %v2392_v23 }
 0x910   : > { %v2294_v18 = vpop.f32.mrb[4].mxu1 }
 0x911   : > { %v2295_v11 = vadd.f32 %v2294_v18, %v2252_v17  ;;  %v3175_v20 = vpop.f32.mrb[5].mxu1 }
 0x912   : > { %v2297_v48 = vpop.f32.mrb[6].mxu1 }
 0x913   : > { %v2301_v25 = vsel %vm685_vm7, %v2295_v11, 0.0  ;;  %v3176_v41 = vpop.f32.mrb[7].mxu1 }
 0x914   : > { %v4256_v26 = vadd.f32 %v2301_v25, %v4063_v9 }
 0x916   : > { %v4261_v6 = vmul.f32 %v4204_v51, %v4256_v26 }
 0x918   : > { %v2423_v31 = vand.u32 2139095040, %v4261_v6  ;;  %v2420_v24 = vand.u32 2147483647, %v4261_v6  ;;  %vm2422_vm4 = vcmp.lt.s32.totalorder %v4261_v6, 0 }
 0x91a   : > { %v2424_v19 = vshrl.u32 %v2423_v31, 23  ;;  %v2427_v40 = vand.u32 8388607, %v2420_v24 }
 0x91c   : > { %v3090_v32 = vadd.s32 4294967169, %v2424_v19  ;;  %v2428_v14 = vor.u32 8388608, %v2427_v40  ;;  %v2372_v19 = vadd.s32 %v4231_v52, %v4237_v59  ;;  %v2389_v40 = vshll.u32 %v4250_v21, %v2387_v44 }
 0x91e   : > { %v2430_v22 = vadd.s32 1, %v3090_v32  ;;  %v2468_v18 = vshll.u32 %v2428_v14, 8  ;;  %v2388_v32 = vsub.s32 32, %v2387_v44 }
 0x920   : > { %vm2431_vm8 = vcmp.gt.s32.totalorder %v2430_v22, 0 }
 0x921   : > { %v2432_v34 = vsel %vm2431_vm8, %v2430_v22, 0  ;;  %vm2421_vm8 = vcmp.le.f32.partialorder %v2420_v24, 0.7853982 }
 0x922   : > { %v2434_v9 = vand.u32 31, %v2432_v34  ;;  %v2433_v51 = vshrl.u32 %v2432_v34, 5 }
 0x924   : > { %v2435_v42 = vsub.s32 32, %v2434_v9  ;;  %v2437_v45 = vshll.u32 %v3510_v29, %v2434_v9  ;;  %v2440_v49 = vshll.u32 %v3511_v33, %v2434_v9  ;;  %v2443_v47 = vshll.u32 %v3512_v35, %v2434_v9 }
 0x925   : > { %v2446_v15 = vshll.u32 %v3513_v37, %v2434_v9  ;;  %v2449_v36 = vshll.u32 %v3514_v39, %v2434_v9  ;;  %vm2452_vm12 = vcmp.lt.s32.totalorder %v2433_v51, 1  ;;  %vm2455_vm13 = vcmp.lt.s32.totalorder %v2433_v51, 4 }
 0x926   : > { %v2438_v43 = vshrl.u32 %v3511_v33, %v2435_v42  ;;  %v2441_v56 = vshrl.u32 %v3512_v35, %v2435_v42  ;;  %v2444_v50 = vshrl.u32 %v3513_v37, %v2435_v42  ;;  %v2447_v16 = vshrl.u32 %v3514_v39, %v2435_v42 }
 0x927   : > { %v2450_v13 = vshrl.u32 %v3515_v46, %v2435_v42  ;;  %v2436_v60 = vshrl.u32 %v3510_v29, %v2435_v42  ;;  %vm2454_vm14 = vcmp.lt.s32.totalorder %v2433_v51, 3  ;;  %vm2453_vm15 = vcmp.lt.s32.totalorder %v2433_v51, 2 }
 0x928   : > { %v2439_v53 = vor.u32 %v2438_v43, %v2437_v45  ;;  %v2442_v7 = vor.u32 %v2441_v56, %v2440_v49  ;;  %v2445_v3 = vor.u32 %v2444_v50, %v2443_v47  ;;  %v2448_v61 = vor.u32 %v2447_v16, %v2446_v15 }
 0x929   : > { %v2451_v38 = vor.u32 %v2450_v13, %v2449_v36  ;;  %v2390_v42 = vshrl.u32 %v2372_v19, %v2388_v32  ;;  %v2394_v51 = vshll.u32 %v2393_v10, 23 }
 0x92a   : > { %v2457_v55 = vsel %vm2455_vm13, %v2445_v3, 2102212464  ;;  %v2460_v62 = vsel %vm2452_vm12, %v2439_v53, %v2442_v7  ;;  %v2464_v0 = vsel %vm2452_vm12, %v2442_v7, %v2445_v3  ;;  %v2461_v63 = vsel %vm2455_vm13, %v2448_v61, 920167782 }
 0x92b   : > { %v2465_v5 = vsel %vm2455_vm13, %v2451_v38, 1326507024  ;;  %v2462_v58 = vsel %vm2454_vm14, %v2445_v3, %v2461_v63  ;;  %v2456_v11 = vsel %vm2452_vm12, %v2436_v60, %v2439_v53  ;;  %v2458_v20 = vsel %vm2454_vm14, %v2442_v7, %v2457_v55 }
 0x92c   : > { %v2466_v17 = vsel %vm2454_vm14, %v2448_v61, %v2465_v5  ;;  %v2463_v54 = vsel %vm2453_vm15, %v2460_v62, %v2462_v58  ;;  %v2459_v27 = vsel %vm2453_vm15, %v2456_v11, %v2458_v20  ;;  %v2391_v43 = vor.u32 %v2390_v42, %v2389_v40 }
 0x92d   : > { %v2467_v48 = vsel %vm2453_vm15, %v2464_v0, %v2466_v17  ;;  %v4281_v28 = vmul.u32.u64.low %v2468_v18, %v2463_v54  ;;  %v4282_v31 = vmul.u32.u64.high %v2468_v18, %v2463_v54, %v4281_v28  ;;  %v2475_v34 = vmul.u32 %v2468_v18, %v2459_v27 }
 0x92e   : > { %v4278_v25 = vmul.u32.u64.low %v2468_v18, %v2467_v48  ;;  %v4279_v41 = vmul.u32.u64.high %v2468_v18, %v2467_v48, %v4278_v25  ;;  %v2395_v56 = vor.u32 4788187, %v2394_v51  ;;  %v2398_v59 = vcvt.s32.f32 %v2391_v43 }
 0x92f   : > { %v2478_v22 = vadd.s32 1, %v4282_v31  ;;  %v2402_v60 = vsub.s32 4, %v4247_v12  ;;  %vm2408_vm14 = vweird.f32 %v4207_v30 }
 0x930   : > { %vm2477_vm10 = vc.u32 %v4279_v41, %v4281_v28  ;;  %v2396_v52 = vand.u32 2147483647, %v2395_v56  ;;  %v2476_v61 = vadd.s32 %v4281_v28, %v4279_v41 }
 0x931   : > { %v2479_v9 = vsel %vm2477_vm10, %v2478_v22, %v4282_v31  ;;  %v2403_v17 = vsel %vm2318_vm0, %v2402_v60, %v4247_v12 }
 0x932   : > { %v2480_v45 = vadd.s32 %v2479_v9, %v2475_v34  ;;  %v2399_v36 = vmul.f32 %v2398_v59, %v2396_v52  ;;  %v2405_v20 = vsel %vm4293_vm2, 0, %v2403_v17 }
 0x933   : > { %v2409_v41 = vadd.s32 3, %v2405_v20 }
 0x934   : > { %v2481_v49 = vadd.s32 536870912, %v2480_v45  ;;  %v2400_v53 = vxor.u32 2147483648, %v2399_v36 }
 0x935   : > { %v2410_v32 = vand.u32 3, %v2409_v41 }
 0x936   : > { %v2482_v47 = vshrl.u32 %v2481_v49, 30  ;;  %v2401_v3 = vsel %vm2318_vm0, %v2400_v53, %v2399_v36 }
 0x937   : > { %v2404_v8 = vsel %vm4293_vm2, %v4207_v30, %v2401_v3  ;;  %vm2412_vm3 = vcmp.eq.s32.totalorder %v2410_v32, 0  ;;  %vm2415_vm12 = vcmp.eq.s32.totalorder %v2410_v32, 2  ;;  %vm2411_vm13 = vcmp.lt.s32.totalorder %v2410_v32, 2 }
 0x938   : > { %v2483_v50 = vshll.u32 %v2482_v47, 30  ;;  %3431 = vcosq.f32 %v2404_v8  ;;  %v2506_v48 = vsub.s32 4, %v2482_v47  ;;  %vm2647_vm2 = vcmask 973824  }
 0x939   : > { %3433 = vsinq.f32 %v2404_v8 }
 0x93a   : > { %v2484_v15 = vsub.s32 %v2480_v45, %v2483_v50  ;;  %v2507_v31 = vsel %vm2422_vm4, %v2506_v48, %v2482_v47 }
 0x93b   : > { %v2509_v10 = vsel %vm2421_vm8, 0, %v2507_v31 }
 0x93c   : > { %v2486_v16 = vsub.s32 0, %v2484_v15  ;;  %v2513_v9 = vadd.s32 3, %v2509_v10 }
 0x93e   : > { %v3091_v13 = vmin.u32 %v2486_v16, %v2484_v15  ;;  %v2514_v51 = vand.u32 3, %v2513_v9  ;;  %v2899_v9 = vld [vmem:[%s4454_s21] sm:$0xff] }
 0x940   : > { %v2488_v14 = vclz %v3091_v13  ;;  %vm2519_vm15 = vcmp.eq.s32.totalorder %v2514_v51, 2  ;;  %vm2516_vm10 = vcmp.eq.s32.totalorder %v2514_v51, 0  ;;  %vm2515_vm0 = vcmp.lt.s32.totalorder %v2514_v51, 2  ;;  %v2633_v13 = vpop.permute.xlu1 %2632 }
 0x942   : > { %v3092_v7 = vadd.s32 4294967294, %v2488_v14  ;;  %v3432_v12 = vpop.eup %3431 }
 0x943   : > { %v3434_v19 = vpop.eup %3433  ;;  %v2416_v34 = vxor.u32 2147483648, %v3432_v12 }
 0x944   : > { %vm3093_vm1 = vcmp.lt.s32.totalorder %v3092_v7, 0  ;;  %v2413_v22 = vxor.u32 2147483648, %v3434_v19 }
 0x945   : > { %v2491_v44 = vsel %vm3093_vm1, 0, %v3092_v7  ;;  %v2417_v42 = vsel %vm2415_vm12, %v2416_v34, %v3434_v19  ;;  %vm2512_vm1 = vweird.f32 %v4261_v6  ;;  %v2780_v34 = vld [vmem:[%s4452_s19] sm:$0xff] }
 0x946   : > { %v2492_v38 = vsub.s32 32, %v2491_v44  ;;  %v2496_v23 = vsub.s32 4294967266, %v2491_v44  ;;  %v2493_v55 = vshll.u32 %v2484_v15, %v2491_v44  ;;  %v2414_v40 = vsel %vm2412_vm3, %v3432_v12, %v2413_v22  ;;  %v2695_v22 = vld [vmem:[%s4451_s18] sm:$0xff] }
 0x947   : > { %v2418_v49 = vsel %vm2411_vm13, %v2414_v40, %v2417_v42  ;;  %vm2682_vm3 = vcmask 605184  }
 0x948   : > { %v2494_v62 = vshrl.u32 %v2476_v61, %v2492_v38  ;;  %v2497_v0 = vadd.s32 127, %v2496_v23  ;;  %v2419_v50 = vsel %vm2408_vm14, nan, %v2418_v49 }
 0x949   : > { %v2628_v16 = vmul.f32 %v2419_v50, %v2419_v50 }
 0x94a   : > { %v2495_v63 = vor.u32 %v2494_v62, %v2493_v55  ;;  %v2498_v5 = vshll.u32 %v2497_v0, 23 }
 0x94b   : > { %v2635_v53 = vmul.f32 %v2633_v13, %v2628_v16 }
 0x94c   : > { %v2499_v58 = vor.u32 4788187, %v2498_v5  ;;  %v2502_v11 = vcvt.s32.f32 %v2495_v63 }
 0x94e   : > { %v2500_v18 = vand.u32 2147483647, %v2499_v58 }
 0x950   : > { %v2503_v54 = vmul.f32 %v2502_v11, %v2500_v18 }
 0x952   : > { %v2504_v25 = vxor.u32 2147483648, %v2503_v54 }
 0x954   : > { %v2505_v28 = vsel %vm2422_vm4, %v2504_v25, %v2503_v54  ;;  %vm2666_vm4 = vcmask 752640  }
 0x955   : > { %v2508_v27 = vsel %vm2421_vm8, %v4261_v6, %v2505_v28  ;;  %vm2674_vm8 = vcmask 678912  }
 0x956   : > { %3435 = vcosq.f32 %v2508_v27 }
 0x957   : > { %3437 = vsinq.f32 %v2508_v27 }
 0x960   : > { %v3436_v24 = vpop.eup %3435 }
 0x961   : > { %v3438_v45 = vpop.eup %3437  ;;  %v2520_v43 = vxor.u32 2147483648, %v3436_v24 }
 0x962   : > { %v2517_v56 = vxor.u32 2147483648, %v3438_v45 }
 0x963   : > { %v2521_v47 = vsel %vm2519_vm15, %v2520_v43, %v3438_v45 }
 0x964   : > { %v2518_v52 = vsel %vm2516_vm10, %v3436_v24, %v2517_v56 }
 0x965   : > { %v2522_v59 = vsel %vm2515_vm0, %v2518_v52, %v2521_v47 }
 0x966   : > { %v2523_v15 = vsel %vm2512_vm1, nan, %v2522_v59  ;;  %v2694_v59 = vld [vmem:[%s4450_s17] sm:$0xf] }
 0x967   : > { %v2629_v36 = vmul.f32 %v2523_v15, %v2523_v15 }
 0x969   : > { %v2636_v14 = vmul.f32 %v2633_v13, %v2629_v36 }
 0x96b   : > { %v2639_v30 = vadd.f32 %v2636_v14, %v4256_v26 }
 0x96d   : > { %v3376_v7 = vpack.i.bf16 %v2639_v30, %v2635_v53  ;;  %v3381_v21 = vpack.i.bf16 %v2635_v53, %v2639_v30 }
 0x96f   : > { %3377 = vrot.lane.b32.xlu1 %v3376_v7, %s3527_s26  ;;  %3372 = vrot.lane.b32.xlu0 %v3376_v7, %s3526_s27  ;;  %s3534_s27 = smov 27  }
 0x973   : > { %3382 = vrot.lane.b32.xlu1 %v3381_v21, %s3530_s29  ;;  %2658 = vrot.lane.b32.xlu0 %v2639_v30, %s3531_s23  ;;  %s4391_s29 = scalar_lea.hbm %s4455_s22, %s3105_s1 }
 0x977   : > { %3392 = vrot.lane.b32.xlu1 %v3381_v21, %s3532_s24  ;;  %3387 = vrot.lane.b32.xlu0 %v3381_v21, %s3533_s25  ;;  %s3535_s24 = smov [#allocation3]  }
 0x978   : > { %s3447_s25 = sshll.u32 %s3535_s24, 4  ;;  %s3448_s25 = int_to_ptr.vmem [resolvable:$false] %s3447_s25 }
 0x9e1   : > { %v3378_v6 = vpop.permute.xlu1 %3377  ;;  %v3373_v44 = vpop.permute.xlu0 %3372 }
 0x9e2   : > { %v3380_v3 = vunpack.i.h.bf16 %v3378_v6  ;;  %v3379_v61 = vunpack.i.l.bf16 %v3378_v6  ;;  %v3375_v38 = vunpack.i.h.bf16 %v3373_v44  ;;  %v3374_v23 = vunpack.i.l.bf16 %v3373_v44 }
 0x9e4   : > { %v2687_v55 = vpack.c.bf16 %v3375_v38, %v2639_v30  ;;  %v2648_v62 = vsel %vm2647_vm2, %v3374_v23, %v3375_v38  ;;  %v2655_v63 = vsel %vm2031_vm9, %v3379_v61, %v3380_v3  ;;  %vm2725_vm9 = vcmask 220160  }
 0x9e5   : > { %v3383_v0 = vpop.permute.xlu1 %3382  ;;  %v2659_v60 = vpop.permute.xlu0 %2658  ;;  %v2686_v8 = vpack.c.bf16 %v2648_v62, %v2635_v53 }
 0x9e6   : > { %2711 = vrot.lane.b32.xlu1 %v2687_v55, %s3534_s27  ;;  %v3385_v5 = vunpack.i.h.bf16 %v3383_v0  ;;  %v3384_v58 = vunpack.i.l.bf16 %v3383_v0  ;;  %v2689_v17 = vpack.c.bf16 %v2659_v60, %v3380_v3  ;;  %v2688_v18 = vpack.c.bf16 %v2659_v60, %v2655_v63 }
 0x9e7   : > { %2709 = vrot.lane.b32.xlu0 %v2686_v8, %s3534_s27 }
 0x9e8   : > { %v2667_v31 = vsel %vm2666_vm4, %v3384_v58, %v3385_v5 }
 0x9e9   : > { %v3393_v11 = vpop.permute.xlu1 %3392  ;;  %v3388_v20 = vpop.permute.xlu0 %3387 }
 0x9ea   : > { %v3395_v54 = vunpack.i.h.bf16 %v3393_v11  ;;  %v3394_v48 = vunpack.i.l.bf16 %v3393_v11  ;;  %v3390_v25 = vunpack.i.h.bf16 %v3388_v20  ;;  %v3389_v41 = vunpack.i.l.bf16 %v3388_v20  ;;  %2715 = vrot.lane.b32.xlu1 %v2689_v17, %s3534_s27 }
 0x9eb   : > { %2713 = vrot.lane.b32.xlu0 %v2688_v18, %s3534_s27 }
 0x9ec   : > { %v2690_v28 = vpack.c.bf16 %v3389_v41, %v3384_v58  ;;  %v2675_v27 = vsel %vm2674_vm8, %v3389_v41, %v3390_v25  ;;  %v2683_v19 = vsel %vm2682_vm3, %v3394_v48, %v3395_v54  ;;  %v2692_v32 = vpack.c.bf16 %v3394_v48, %v3394_v48 }
 0x9ed   : > { %v2691_v12 = vpack.c.bf16 %v2675_v27, %v2667_v31  ;;  %v2693_v10 = vpack.c.bf16 %v2683_v19, %v2683_v19 }
 0x9ef   : > { %2719 = vrot.lane.b32.xlu1 %v2691_v12, %s3534_s27  ;;  %2717 = vrot.lane.b32.xlu0 %v2690_v28, %s3534_s27 }
 0x9f3   : > { %2723 = vrot.lane.b32.xlu1 %v2693_v10, %s3534_s27  ;;  %2721 = vrot.lane.b32.xlu0 %v2692_v32, %s3534_s27  ;;  %s674_s27 = sand.u32 1, %s3497_s28  }
 0x9f4   : > { %s3032_s26 = sshll.u32 %s674_s27, 3  ;;  %s2956_s4 = scalar_lea.sflag [#allocation4], %s674_s27 }
 0x9f5   : > { %s676_s0 = scalar_lea.vmem [#allocation3], %s3032_s26  ;;  %s3449_s26 = scalar_lea.vmem %s3448_s25, 256 }
 0x9f6   : > { %s2969_s2 = sshll.u32 %s676_s0, 4  ;;  %s4393_s2 = int_to_ptr.vmem [resolvable:$true] %s2969_s2 }
 0x9f7   : > { %2698 = vperm.xlu0 %3367, %v2695_v22   ;;  %2783 = vperm.xlu1 %3396, %v2780_v34   ;;  %s3443_s23 = scalar_lea.vmem %s4393_s2, 128  ;;  %p3450_p0 = scmp.lt.s32.totalorder %s4393_s2, %s3448_s25 }
 0x9f8   : > { %p3444_p11 = scmp.ne.s32.totalorder %s4393_s2, %s3443_s23  ;;  %p3451_p1 = scmp.lt.s32.totalorder %s3449_s26, %s3443_s23 }
 0x9fa   : > { %p3445_p12 = pnand %p3444_p11, %p3689_p5  ;;  %p3452_p2 = por %p3451_p1, %p3450_p0 }
 0x9fb   : > { %2902 = vperm.xlu1 %3396, %v2899_v9   ;;  %3397 = vset.pattern.permute.xlu0 %v3508_v2 }
 0x9fc   : > { %2893 = vperm.xlu0 %3397, %v2780_v34   ;;  %p3446_p13 = pneg %p3445_p12 }
 0x9fe   : > { %p3453_p3 = pnand %p3452_p2, %p3446_p13 }
 0xa00   : > { %3398 = vset.pattern.permute.xlu0 %v3507_v1 }
 0xa58   : > { %v2712_v40 = vpop.permute.xlu1 %2711 }
 0xa59   : > { %v2710_v42 = vpop.permute.xlu0 %2709 }
 0xa5a   : > { %v2726_v51 = vsel %vm2725_vm9, %v2710_v42, %v2712_v40 }
 0xa5b   : > { %3178 = vmatpush3.bf16.msra.mxu1 %v2726_v51 }
 0xa5c   : > { %v2716_v24 = vpop.permute.xlu1 %2715  ;;  %3179 = vmatprep.subr.bf16.mxu1 %v3509_v4 }
 0xa5d   : > { %v2714_v45 = vpop.permute.xlu0 %2713 }
 0xa5e   : > { %v2727_v49 = vsel %vm2725_vm9, %v2714_v45, %v2716_v24 }
 0xa5f   : > { %3180 = vmatpush3.bf16.msra.mxu1 %v2727_v49 }
 0xa60   : > { %3181 = vmatprep.subr.bf16.mxu1 %v3509_v4 }
 0xa61   : > { %v2720_v43 = vpop.permute.xlu1 %2719  ;;  %v2718_v2 = vpop.permute.xlu0 %2717 }
 0xa62   : > { %v2728_v56 = vsel %vm2725_vm9, %v2718_v2, %v2720_v43 }
 0xa63   : > { %3182 = vmatpush3.bf16.msra.mxu1 %v2728_v56 }
 0xa64   : > { %3183 = vmatprep.subr.bf16.mxu1 %v3509_v4 }
 0xa65   : > { %v2724_v1 = vpop.permute.xlu1 %2723  ;;  %v2722_v47 = vpop.permute.xlu0 %2721 }
 0xa66   : > { %v2729_v50 = vsel %vm2725_vm9, %v2722_v47, %v2724_v1 }
 0xa67   : > { %v2737_v52 = vsel %vm1432_vm5, %v2729_v50, 0 }
 0xa68   : > { %3184 = vmatpush3.bf16.msra.mxu1 %v2737_v52 }
 0xa6b   : > { %3186 = vmatmul.mubr.msk.bf16.vlgmr.msra.gmra.mrb[8].mxu1 %vm1428_vm6, %v2694_v59 }
 0xa76   : > { %v2699_v15 = vpop.permute.xlu0 %2698  ;;  %v2784_v14 = vpop.permute.xlu1 %2783 }
 0xb3e   : > { %v2773_v16 = vpop.f32.mrb[8].mxu1 }
 0xb3f   : > { %v4342_v36 = vadd.f32 %v2773_v16, %v2699_v15  ;;  %v3187_v13 = vpop.f32.mrb[9].mxu1 }
 0xb40   : > { %v2776_v4 = vpop.f32.mrb[10].mxu1 }
 0xb41   : > { %v4345_v53 = vmul.f32 %v2784_v14, %v4342_v36  ;;  %v3188_v30 = vpop.f32.mrb[11].mxu1 }
 0xb43   : > { %v2790_v7 = vand.u32 2139095040, %v4345_v53  ;;  %v2787_v21 = vand.u32 2147483647, %v4345_v53  ;;  %vm2789_vm1 = vcmp.lt.s32.totalorder %v4345_v53, 0  ;;  %vm2879_vm9 = vweird.f32 %v4345_v53 }
 0xb45   : > { %v2791_v6 = vshrl.u32 %v2790_v7, 23  ;;  %v2794_v3 = vand.u32 8388607, %v2787_v21  ;;  %vm2788_vm2 = vcmp.le.f32.partialorder %v2787_v21, 0.7853982 }
 0xb47   : > { %v3099_v44 = vadd.s32 4294967169, %v2791_v6  ;;  %v2795_v23 = vor.u32 8388608, %v2794_v3 }
 0xb49   : > { %v2797_v61 = vadd.s32 1, %v3099_v44  ;;  %v2835_v63 = vshll.u32 %v2795_v23, 8 }
 0xb4b   : > { %vm2798_vm6 = vcmp.gt.s32.totalorder %v2797_v61, 0 }
 0xb4c   : > { %v2799_v38 = vsel %vm2798_vm6, %v2797_v61, 0 }
 0xb4d   : > { %v2801_v55 = vand.u32 31, %v2799_v38  ;;  %v2800_v62 = vshrl.u32 %v2799_v38, 5 }
 0xb4f   : > { %v2802_v0 = vsub.s32 32, %v2801_v55  ;;  %v2813_v60 = vshll.u32 %v3513_v37, %v2801_v55  ;;  %v2816_v8 = vshll.u32 %v3514_v39, %v2801_v55  ;;  %v2804_v17 = vshll.u32 %v3510_v29, %v2801_v55 }
 0xb50   : > { %v2807_v11 = vshll.u32 %v3511_v33, %v2801_v55  ;;  %v2810_v54 = vshll.u32 %v3512_v35, %v2801_v55  ;;  %vm2822_vm12 = vcmp.lt.s32.totalorder %v2800_v62, 4  ;;  %vm2819_vm13 = vcmp.lt.s32.totalorder %v2800_v62, 1 }
 0xb51   : > { %v2814_v5 = vshrl.u32 %v3514_v39, %v2802_v0  ;;  %v2817_v58 = vshrl.u32 %v3515_v46, %v2802_v0  ;;  %v2805_v18 = vshrl.u32 %v3511_v33, %v2802_v0  ;;  %v2808_v20 = vshrl.u32 %v3512_v35, %v2802_v0 }
 0xb52   : > { %v2811_v48 = vshrl.u32 %v3513_v37, %v2802_v0  ;;  %v2803_v39 = vshrl.u32 %v3510_v29, %v2802_v0  ;;  %vm2820_vm14 = vcmp.lt.s32.totalorder %v2800_v62, 2  ;;  %vm2821_vm15 = vcmp.lt.s32.totalorder %v2800_v62, 3 }
 0xb53   : > { %v2815_v25 = vor.u32 %v2814_v5, %v2813_v60  ;;  %v2818_v41 = vor.u32 %v2817_v58, %v2816_v8  ;;  %v2806_v28 = vor.u32 %v2805_v18, %v2804_v17  ;;  %v2809_v31 = vor.u32 %v2808_v20, %v2807_v11 }
 0xb54   : > { %v2812_v46 = vor.u32 %v2811_v48, %v2810_v54 }
 0xb55   : > { %v2828_v27 = vsel %vm2822_vm12, %v2815_v25, 920167782  ;;  %v2832_v12 = vsel %vm2822_vm12, %v2818_v41, 1326507024  ;;  %v2827_v19 = vsel %vm2819_vm13, %v2806_v28, %v2809_v31  ;;  %v2823_v35 = vsel %vm2819_vm13, %v2803_v39, %v2806_v28  ;;  %v2894_v28 = vpop.permute.xlu0 %2893 }
 0xb56   : > { %v2824_v33 = vsel %vm2822_vm12, %v2812_v46, 2102212464  ;;  %v2829_v32 = vsel %vm2821_vm15, %v2812_v46, %v2828_v27  ;;  %v2831_v10 = vsel %vm2819_vm13, %v2809_v31, %v2812_v46  ;;  %v2833_v34 = vsel %vm2821_vm15, %v2815_v25, %v2832_v12 }
 0xb57   : > { %v2825_v22 = vsel %vm2821_vm15, %v2809_v31, %v2824_v33  ;;  %v2830_v37 = vsel %vm2820_vm14, %v2827_v19, %v2829_v32  ;;  %v2834_v9 = vsel %vm2820_vm14, %v2831_v10, %v2833_v34  ;;  %v2779_v19 = vld [vmem:[%s4453_s20] sm:$0xf] }
 0xb58   : > { %v4362_v40 = vmul.u32.u64.low %v2835_v63, %v2830_v37  ;;  %v4363_v42 = vmul.u32.u64.high %v2835_v63, %v2830_v37, %v4362_v40  ;;  %v4365_v29 = vmul.u32.u64.low %v2835_v63, %v2834_v9  ;;  %v4366_v51 = vmul.u32.u64.high %v2835_v63, %v2834_v9, %v4365_v29 }
 0xb59   : > { %v2826_v24 = vsel %vm2820_vm14, %v2823_v35, %v2825_v22 }
 0xb5a   : > { %v2845_v45 = vadd.s32 1, %v4363_v42  ;;  %v2842_v49 = vmul.u32 %v2835_v63, %v2826_v24  ;;  %vm2844_vm10 = vc.u32 %v4366_v51, %v4362_v40  ;;  %v2843_v14 = vadd.s32 %v4362_v40, %v4366_v51 }
 0xb5c   : > { %v2846_v43 = vsel %vm2844_vm10, %v2845_v45, %v4363_v42 }
 0xb5d   : > { %v2847_v2 = vadd.s32 %v2846_v43, %v2842_v49 }
 0xb5f   : > { %v2848_v56 = vadd.s32 536870912, %v2847_v2 }
 0xb61   : > { %v2849_v1 = vshrl.u32 %v2848_v56, 30 }
 0xb63   : > { %v2850_v47 = vshll.u32 %v2849_v1, 30  ;;  %v2873_v0 = vsub.s32 4, %v2849_v1 }
 0xb65   : > { %v2851_v50 = vsub.s32 %v2847_v2, %v2850_v47  ;;  %v2874_v63 = vsel %vm2789_vm1, %v2873_v0, %v2849_v1 }
 0xb66   : > { %v2876_v58 = vsel %vm2788_vm2, 0, %v2874_v63 }
 0xb67   : > { %v2853_v52 = vsub.s32 0, %v2851_v50  ;;  %v2880_v17 = vadd.s32 3, %v2876_v58 }
 0xb69   : > { %v3100_v59 = vmin.u32 %v2853_v52, %v2851_v50  ;;  %v2881_v18 = vand.u32 3, %v2880_v17 }
 0xb6b   : > { %v2855_v15 = vclz %v3100_v59  ;;  %vm2886_vm4 = vcmp.eq.s32.totalorder %v2881_v18, 2  ;;  %vm2883_vm8 = vcmp.eq.s32.totalorder %v2881_v18, 0  ;;  %vm2882_vm3 = vcmp.lt.s32.totalorder %v2881_v18, 2 }
 0xb6d   : > { %v3101_v16 = vadd.s32 4294967294, %v2855_v15 }
 0xb6f   : > { %vm3102_vm0 = vcmp.lt.s32.totalorder %v3101_v16, 0 }
 0xb70   : > { %v2858_v13 = vsel %vm3102_vm0, 0, %v3101_v16 }
 0xb71   : > { %v2859_v4 = vsub.s32 32, %v2858_v13  ;;  %v2863_v30 = vsub.s32 4294967266, %v2858_v13  ;;  %v2860_v7 = vshll.u32 %v2851_v50, %v2858_v13 }
 0xb73   : > { %v2861_v6 = vshrl.u32 %v2843_v14, %v2859_v4  ;;  %v2864_v44 = vadd.s32 127, %v2863_v30 }
 0xb75   : > { %v2862_v3 = vor.u32 %v2861_v6, %v2860_v7  ;;  %v2865_v61 = vshll.u32 %v2864_v44, 23 }
 0xb77   : > { %v2866_v38 = vor.u32 4788187, %v2865_v61  ;;  %v2869_v55 = vcvt.s32.f32 %v2862_v3 }
 0xb79   : > { %v2867_v23 = vand.u32 2147483647, %v2866_v38 }
 0xb7b   : > { %v2870_v62 = vmul.f32 %v2869_v55, %v2867_v23 }
 0xb7d   : > { %v2871_v60 = vxor.u32 2147483648, %v2870_v62 }
 0xb7f   : > { %v2872_v8 = vsel %vm2789_vm1, %v2871_v60, %v2870_v62 }
 0xb80   : > { %v2875_v5 = vsel %vm2788_vm2, %v4345_v53, %v2872_v8  ;;  %v2903_v53 = vpop.permute.xlu1 %2902 }
 0xb81   : > { %3439 = vcosq.f32 %v2875_v5 }
 0xb82   : > { %3441 = vsinq.f32 %v2875_v5 }
 0xb8b   : > { %v3440_v11 = vpop.eup %3439 }
 0xb8c   : > { %v3442_v20 = vpop.eup %3441  ;;  %v2887_v54 = vxor.u32 2147483648, %v3440_v11 }
 0xb8d   : > { %v2884_v48 = vxor.u32 2147483648, %v3442_v20 }
 0xb8e   : > { %v2888_v25 = vsel %vm2886_vm4, %v2887_v54, %v3442_v20 }
 0xb8f   : > { %v2885_v41 = vsel %vm2883_vm8, %v3440_v11, %v2884_v48 }
 0xb90   : > { %v2889_v21 = vsel %vm2882_vm3, %v2885_v41, %v2888_v25 }
 0xb91   : > { %v2890_v39 = vsel %vm2879_vm9, nan, %v2889_v21 }
 0xb92   : > { %v2891_v31 = vmul.f32 %v2890_v39, %v2890_v39 }
 0xb94   : > { %v2896_v46 = vmul.f32 %v2894_v28, %v2891_v31 }
 0xb96   : > { %v2897_v27 = vadd.f32 %v2896_v46, %v4342_v36 }
 0xb98   : > { %v2898_v12 = vpack.c.bf16 %v2897_v27, %v2897_v27 }
 0xb9a   : > { %v2909_v33 = vsel %vm1432_vm5, %v2898_v12, 0 }
 0xb9b   : > { %3190 = vmatpush3.bf16.msra.mxu0 %v2909_v33 }
 0xb9e   : > { %3192 = vmatmul.mubr.msk.bf16.vlgmr.msra.gmra.mrb[12].mxu0 %vm1602_vm11, %v2779_v19 }
 0xc71   : > { %v2945_v32 = vpop.f32.mrb[12].mxu0 }
 0xc72   : > { %v2946_v10 = vadd.f32 %v2945_v32, %v2903_v53  ;;  %v3193_v35 = vpop.f32.mrb[13].mxu0 }
 0xc73   : > { %v2948_v36 = vpop.f32.mrb[14].mxu0 }
 0xc74   : > { %v2952_v22 = vsel %vm685_vm7, %v2946_v10, 0.0  ;;  %v3194_v37 = vpop.f32.mrb[15].mxu0 }
 0xc75   : > { %v2953_v34 = vadd.f32 %v2952_v22, %v4256_v26 }
 0xc77   : > { %2954 = vst [vmem:[%s676_s0] sm:$0xff] %v2953_v34 }
 0xc78   : > { %3456 = shalt.err (!%p3453_p3)
}
 0xc79   : > { %s3457_s27 = scalar_lea.hbm %s4391_s29, 128  ;;  %s3461_s5 = scalar_lea.hbm %s4455_s22, 256 }
 0xc7a   : > { %p3458_p4 = scmp.ne.s32.totalorder %s4391_s29, %s3457_s27  ;;  %p3462_p9 = scmp.lt.u32.totalorder %s4391_s29, %s4455_s22 }
 0xc7b   : > { %p3463_p10 = scmp.lt.u32.totalorder %s3461_s5, %s3457_s27  ;;  %p3465_p12 = scmp.lt.u32.totalorder %s3457_s27, %s4391_s29 }
 0xc7c   : > { %p3459_p7 = pnand %p3458_p4, %p3689_p5 }
 0xc7d   : > { %p3464_p11 = por %p3463_p10, %p3462_p9 }
 0xc7e   : > { %p3460_p8 = pneg %p3459_p7 }
 0xc7f   : > { %p3466_p13 = por %p3465_p12, %p3464_p11 }
 0xc81   : > { %p3467_p0 = pnand %p3466_p13, %p3460_p8 }
 0xc83   : > { %3470 = shalt.err (!%p3467_p0)
}
 0xc84   : > { %3239 = dma.vmem_to_hbm [thread:$0]  (%p3689_p5), %s4393_s2, 128, %s4391_s29, %s2956_s4  }
 0xc85 PF: > { %s4492_s23 = sld [smem:[#allocation6_spill]]  ;;  %p3245_p1 = scmp.ge.s32.totalorder %s3505_s30, 2 }
 0xc87   : > { %p3242_p2 = pnand %p3245_p1, %p3693_p6 }
 0xc8b   : > { %s2981_s26 = sand.u32 1, %s4492_s23  }
 0xc8c   : > { %s2982_s1 = scalar_lea.sflag [#allocation4], %s2981_s26 }
 0xc8d   : > { %3488 = dma.done.wait (!%p3242_p2), %s2982_s1, 128  }
 0xc8e   : > { %3490 = vsyncadd (!%p3242_p2), %s2982_s1, 4294967168  ;;  %s4494_s30 = sld [smem:[#allocation8_spill]]  ;;  %s4495_s27 = sld [smem:[#allocation7_spill]] }
 0xc8f   : > { %s4496_s29 = sld [smem:[#allocation9_spill]]  ;;  %s4497_s3 = smov %s3497_s28 }
 0xc94   : > { %p32_p3 = scmp.ge.s32.totalorder %s4494_s30, 4   ;;  %s4498_s28 = smov %s4495_s27 }
 0xc96   :  { %34 = sbr.rel (!%p32_p3) target bundleno = 11 (0xb), region = 143 }
 0xc9d   :  { %2987 = vsyncpa [#allocation4], 1 }
 0xc9e   :  { %2989 = vsyncpa [#allocation4 + $0x1], 1 }

</bundles_post_ra>
